<compile_context>
chip_gen: v5e
topology: v5e:2x2
jax: 0.10.0
libtpu: 0.0.40
codegen_flags: <defaults>
</compile_context>

<pallas_src>
import functools

import jax
import jax.numpy as jnp
from jax.experimental import pallas as pl
from jax.experimental.pallas import tpu as pltpu

EPS = 1e-5


def _round_up(x, m):
    return (x + m - 1) // m * m


def _choose_tile(dim, candidates):
    for c in candidates:
        if dim >= c and dim % c == 0:
            return c
    return dim


def _vmem_limit_bytes():
    # Stay under the smallest per-core VMEM (64 MiB on v7x) with headroom.
    cap = 64 * 1024 * 1024
    try:
        cap = int(pltpu.get_tpu_info().vmem_capacity_bytes)
    except Exception:
        pass
    return int(max(32 * 1024 * 1024,
                   min(cap - 16 * 1024 * 1024, 48 * 1024 * 1024)))


VMEM_LIMIT = _vmem_limit_bytes()


def _apply_act(x, act):
    if act == "silu":
        return x * jax.nn.sigmoid(x)
    if act == "relu":
        return jnp.maximum(x, 0.0)
    return x


# ----------------------------------------------------------------------------
# Fused matmul kernel: y = act(x @ w + bias [+ shortcut])
# (used for every 1x1 conv and the final Linear; BN scale pre-folded into w)
# ----------------------------------------------------------------------------
def _mm_kernel(*refs, act, has_res):
    if has_res:
        x_ref, w_ref, b_ref, r_ref, o_ref, acc_ref = refs
    else:
        x_ref, w_ref, b_ref, o_ref, acc_ref = refs
        r_ref = None

    @pl.when(pl.program_id(2) == 0)
    def _init():
        acc_ref[...] = jnp.zeros_like(acc_ref)

    acc_ref[...] += jnp.dot(x_ref[...], w_ref[...],
                            preferred_element_type=jnp.float32)

    @pl.when(pl.program_id(2) == pl.num_programs(2) - 1)
    def _finalize():
        acc = acc_ref[...] + b_ref[...]
        if r_ref is not None:
            acc = acc + r_ref[...].astype(jnp.float32)
        o_ref[...] = _apply_act(acc, act).astype(o_ref.dtype)


def matmul_bias_act(x, w, bias, act="none", shortcut=None,
                    out_dtype=jnp.bfloat16):
    M, K = x.shape
    K2, N = w.shape
    assert K == K2
    x = x.astype(jnp.bfloat16)
    w = w.astype(jnp.bfloat16)
    bias2 = bias.reshape(1, N).astype(jnp.float32)
    has_res = shortcut is not None
    if has_res:
        shortcut = shortcut.reshape(M, N).astype(jnp.bfloat16)

    Mp = _round_up(M, 8)
    if Mp != M:
        x = jnp.pad(x, ((0, Mp - M), (0, 0)))
        if has_res:
            shortcut = jnp.pad(shortcut, ((0, Mp - M), (0, 0)))

    bm = _choose_tile(Mp, (512, 256, 128, 64, 32, 16, 8))
    bn = _choose_tile(N, (512, 256, 128))
    bk = _choose_tile(K, (512, 256, 128))
    grid = (Mp // bm, N // bn, K // bk)

    in_specs = [
        pl.BlockSpec((bm, bk), lambda i, j, k: (i, k)),
        pl.BlockSpec((bk, bn), lambda i, j, k: (k, j)),
        pl.BlockSpec((1, bn), lambda i, j, k: (0, j)),
    ]
    args = [x, w, bias2]
    if has_res:
        in_specs.append(pl.BlockSpec((bm, bn), lambda i, j, k: (i, j)))
        args.append(shortcut)

    out = pl.pallas_call(
        functools.partial(_mm_kernel, act=act, has_res=has_res),
        out_shape=jax.ShapeDtypeStruct((Mp, N), out_dtype),
        grid=grid,
        in_specs=in_specs,
        out_specs=pl.BlockSpec((bm, bn), lambda i, j, k: (i, j)),
        scratch_shapes=[pltpu.VMEM((bm, bn), jnp.float32)],
        compiler_params=pltpu.CompilerParams(
            dimension_semantics=("parallel", "parallel", "arbitrary"),
            vmem_limit_bytes=VMEM_LIMIT),
    )(*args)
    return out[:M] if Mp != M else out


def conv1x1(x_nhwc, w, bias, stride=1, act="none", shortcut=None,
            out_dtype=jnp.bfloat16):
    if stride != 1:
        # TODO(synk): express the stride-2 subsample via the matmul index_map
        # instead of materializing the strided slice in HBM.
        x_nhwc = x_nhwc[:, ::stride, ::stride, :]
    N, H, W, C = x_nhwc.shape
    y = matmul_bias_act(x_nhwc.reshape(N * H * W, C), w, bias, act=act,
                        shortcut=shortcut, out_dtype=out_dtype)
    return y.reshape(N, H, W, -1)


# ----------------------------------------------------------------------------
# Direct kxk stride-1 conv kernel (no im2col): accumulate the k*k taps
# in-kernel as shifted matmuls over a row-flattened padded input.  The
# accumulator keeps the padded-width row pitch; junk columns are dropped
# afterwards (cheap, only (Wp-Wo)/Wp overhead on a tiny writeback).
# ----------------------------------------------------------------------------
def _conv_taps_kernel(x_ref, w_ref, b_ref, o_ref, *, k, wp, rows, act):
    bn = o_ref.shape[-1]
    acc = jnp.zeros((rows, bn), jnp.float32)
    t = 0
    for di in range(k):
        for dj in range(k):
            base = di * wp + dj
            acc = acc + jnp.dot(x_ref[0, base:base + rows, :], w_ref[t],
                                preferred_element_type=jnp.float32)
            t += 1
    acc = _apply_act(acc + b_ref[...], act)
    o_ref[0] = acc.astype(o_ref.dtype)


def conv_kxk_s1(x_pad, w_taps, bias, k, act, out_dtype=jnp.bfloat16):
    """Valid stride-1 kxk conv on a pre-padded NHWC input via in-kernel taps."""
    N, Hp, Wp, Cin = x_pad.shape
    T, Cin2, Cout = w_taps.shape
    assert T == k * k and Cin2 == Cin
    Ho, Wo = Hp - k + 1, Wp - k + 1
    rows = Ho * Wp                       # accumulator rows (padded-width pitch)
    R = Hp * Wp + (k - 1)                # flattened rows + tail pad
    xf = x_pad.reshape(N, Hp * Wp, Cin).astype(jnp.bfloat16)
    if k > 1:
        xf = jnp.pad(xf, ((0, 0), (0, k - 1), (0, 0)))

    bn = _choose_tile(Cout, (256, 128))
    grid = (N, Cout // bn)
    # TODO(synk): add an output-row tile axis (halo blocks) for very large
    # spatial sizes; per-image blocks are ample at these resolutions.

    y = pl.pallas_call(
        functools.partial(_conv_taps_kernel, k=k, wp=Wp, rows=rows, act=act),
        out_shape=jax.ShapeDtypeStruct((N, rows, Cout), out_dtype),
        grid=grid,
        in_specs=[
            pl.BlockSpec((1, R, Cin), lambda b, j: (b, 0, 0)),
            pl.BlockSpec((T, Cin, bn), lambda b, j: (0, 0, j)),
            pl.BlockSpec((1, bn), lambda b, j: (0, j)),
        ],
        out_specs=pl.BlockSpec((1, rows, bn), lambda b, j: (b, 0, j)),
        compiler_params=pltpu.CompilerParams(
            dimension_semantics=("parallel", "parallel"),
            vmem_limit_bytes=VMEM_LIMIT),
    )(xf, w_taps.astype(jnp.bfloat16),
      bias.reshape(1, Cout).astype(jnp.float32))
    return y.reshape(N, Ho, Wp, Cout)[:, :, :Wo, :]


def _space_to_depth(x):
    # (N, H, W, C) -> (N, H//2, W//2, 4C); channel order (row-par, col-par, c)
    N, H, W, C = x.shape
    x = x.reshape(N, H // 2, 2, W // 2, 2, C)
    x = jnp.transpose(x, (0, 1, 3, 2, 4, 5))
    return x.reshape(N, H // 2, W // 2, 4 * C)


def conv3x3(x_nhwc, w_taps, bias, stride, act):
    xp = jnp.pad(x_nhwc, ((0, 0), (1, 1), (1, 1), (0, 0)))
    if stride == 1:
        return conv_kxk_s1(xp, w_taps, bias, 3, act)
    # stride 2: rewritten exactly as a 2x2 stride-1 conv on a space-to-depth
    # input (weights were rearranged accordingly at parameter build time).
    assert stride == 2
    assert x_nhwc.shape[1] % 2 == 0 and x_nhwc.shape[2] % 2 == 0
    xs = _space_to_depth(xp)
    return conv_kxk_s1(xs, w_taps, bias, 2, act)


# ----------------------------------------------------------------------------
# Global average pool (AdaptiveAvgPool2d((1,1)))
# ----------------------------------------------------------------------------
def _avgpool_kernel(x_ref, o_ref):
    o_ref[...] = jnp.mean(x_ref[...].astype(jnp.float32), axis=1)


def global_avg_pool(x_nhwc):
    N, H, W, C = x_nhwc.shape
    x = x_nhwc.reshape(N, H * W, C)
    rb = 8 if N % 8 == 0 else N
    return pl.pallas_call(
        _avgpool_kernel,
        out_shape=jax.ShapeDtypeStruct((N, C), jnp.float32),
        grid=(N // rb,),
        in_specs=[pl.BlockSpec((rb, H * W, C), lambda i: (i, 0, 0))],
        out_specs=pl.BlockSpec((rb, C), lambda i: (i, 0)),
        compiler_params=pltpu.CompilerParams(
            dimension_semantics=("parallel",),
            vmem_limit_bytes=VMEM_LIMIT),
    )(x)


# ----------------------------------------------------------------------------
# Deterministic parameter construction (BN folded into weights at build time)
# ----------------------------------------------------------------------------
class ParamGen:
    def __init__(self, key):
        self.key = key

    def next(self):
        self.key, k = jax.random.split(self.key)
        return k


def make_bn(c):
    # Fresh nn.BatchNorm2d (eval): gamma=1, beta=0, running mean=0, var=1.
    gamma = jnp.ones((c,), jnp.float32)
    beta = jnp.zeros((c,), jnp.float32)
    mean = jnp.zeros((c,), jnp.float32)
    var = jnp.ones((c,), jnp.float32)
    scale = gamma / jnp.sqrt(var + EPS)
    bias = beta - mean * scale
    return scale, bias


def make_conv1x1(pg, cin, cout):
    w = jax.random.normal(pg.next(), (cin, cout), jnp.float32) * jnp.sqrt(2.0 / cin)
    scale, bias = make_bn(cout)
    return (w * scale[None, :]).astype(jnp.bfloat16), bias


def _s2d_weights(w):
    # (3,3,Cin,Cout) stride-2 weights -> (4, 4*Cin, Cout) weights of the
    # equivalent 2x2 stride-1 conv on the space-to-depth input.
    _, _, cin, cout = w.shape
    wp = jnp.pad(w, ((0, 1), (0, 1), (0, 0), (0, 0)))     # zero taps at 3
    wp = wp.reshape(2, 2, 2, 2, cin, cout)                # (dI, pi, dJ, pj, ..)
    wp = jnp.transpose(wp, (0, 2, 1, 3, 4, 5))            # (dI, dJ, pi, pj, ..)
    return wp.reshape(4, 4 * cin, cout)


def make_conv3x3(pg, cin, cout, stride):
    fan_in = 9 * cin
    w = (jax.random.normal(pg.next(), (3, 3, cin, cout), jnp.float32)
         * jnp.sqrt(2.0 / fan_in))
    scale, bias = make_bn(cout)
    w = w * scale[None, None, None, :]
    w_taps = w.reshape(9, cin, cout) if stride == 1 else _s2d_weights(w)
    return w_taps.astype(jnp.bfloat16), bias


def make_bottleneck(pg, cin, cout, stride):
    p = {"stride": stride}
    p["c1"] = make_conv1x1(pg, cin, cout)
    p["c2"] = make_conv3x3(pg, cout, cout, stride)
    p["c3"] = make_conv1x1(pg, cout, cout * 4)
    if stride != 1 or cin != cout * 4:
        p["sc"] = make_conv1x1(pg, cin, cout * 4)
    return p


def make_resnet(key, num_block=(1, 1, 1, 1), num_classes=128):
    pg = ParamGen(key)
    params = {"focus": make_conv1x1(pg, 4, 64)}
    in_ch = 64
    layers = []
    for out_ch, nb, stride in zip((64, 128, 256, 512), num_block, (1, 2, 2, 2)):
        for st in [stride] + [1] * (nb - 1):
            layers.append(make_bottleneck(pg, in_ch, out_ch, st))
            in_ch = out_ch * 4
    params["layers"] = layers
    params["fc_w"] = (jax.random.normal(pg.next(), (in_ch, num_classes),
                                        jnp.float32)
                      / jnp.sqrt(float(in_ch))).astype(jnp.bfloat16)
    params["fc_b"] = jnp.zeros((num_classes,), jnp.float32)
    return params


# ----------------------------------------------------------------------------
# Forward pass
# ----------------------------------------------------------------------------
def bottleneck_forward(x, p):
    s = p["stride"]
    if "sc" in p:
        sc = conv1x1(x, *p["sc"], stride=s, act="none")
    else:
        sc = x
    out = conv1x1(x, *p["c1"], stride=1, act="relu")
    out = conv3x3(out, *p["c2"], stride=s, act="relu")
    # Third 1x1 conv: BN + residual add + ReLU fused into the matmul epilogue.
    out = conv1x1(out, *p["c3"], stride=1, act="relu", shortcut=sc)
    return out


def resnet_forward(params, x):
    # x: (B, G, C, H, W) -- same 5-D input the PyTorch Focus.forward expects.
    B, G, C, H, W = x.shape
    # Focus space-to-depth (torch: cat along dim=2 then reshape to NCHW).
    x = jnp.concatenate(
        [x[..., ::2, ::2], x[..., 1::2, ::2],
         x[..., ::2, 1::2], x[..., 1::2, 1::2]], axis=2)
    x = x.reshape(B * G, C * 4, H // 2, W // 2)          # NCHW
    x = jnp.transpose(x, (0, 2, 3, 1))                   # -> NHWC
    x = conv1x1(x, *params["focus"], stride=1, act="silu")
    for p in params["layers"]:
        x = bottleneck_forward(x, p)
    pooled = global_avg_pool(x)                          # (B*G, 2048) f32
    logits = matmul_bias_act(pooled, params["fc_w"], params["fc_b"],
                             act="none", out_dtype=jnp.float32)
    num_classes = params["fc_w"].shape[1]
    assert (B * G) % 8 == 0
    return logits.reshape((B * G) // 8, 8, num_classes)


if __name__ == "__main__":
    key = jax.random.PRNGKey(0)
    kx, kp = jax.random.split(key)
    # (B, G, C, H, W): G=8 so the final reshape(... / 8, 8, num_classes) works.
    x = jax.random.normal(kx, (2, 8, 1, 16, 16), jnp.float32)
    params = make_resnet(kp, num_block=(1, 1, 1, 1), num_classes=128)
    out = resnet_forward(params, x)
    out = jax.block_until_ready(out)
    assert out.shape == (2, 8, 128), out.shape
    assert bool(jnp.all(jnp.isfinite(out)))
    print("KERNEL_OK")
</pallas_src>

<mosaic_0001>
module attributes {stable_mosaic.version = 11 : i64} {
  func.func @_mm_kernel(%arg0: i32, %arg1: i32, %arg2: i32, %arg3: memref<512x4xbf16, #tpu.memory_space<vmem>>, %arg4: memref<4x64xbf16, #tpu.memory_space<vmem>>, %arg5: memref<1x64xf32, #tpu.memory_space<vmem>>, %arg6: memref<512x64xbf16, #tpu.memory_space<vmem>>, %arg7: memref<512x64xf32, #tpu.memory_space<vmem>>) attributes {dimension_semantics = [#tpu.dimension_semantics<parallel>, #tpu.dimension_semantics<parallel>, #tpu.dimension_semantics<arbitrary>], iteration_bounds = array<i64: 2, 1, 1>, scalar_prefetch = 0 : i64, scratch_operands = 1 : i64, tpu.core_type = #tpu.core_type<tc>, window_params = [{transform_indices = @transform_0, window_bounds = array<i64: 512, 4>}, {transform_indices = @transform_1, window_bounds = array<i64: 4, 64>}, {transform_indices = @transform_2, window_bounds = array<i64: 1, 64>}, {transform_indices = @transform_3, window_bounds = array<i64: 512, 64>}]} {
    %c0_i32 = arith.constant 0 : i32
    %0 = arith.cmpi eq, %arg2, %c0_i32 : i32
    %1 = arith.extui %0 : i1 to i32
    %c0_i32_0 = arith.constant 0 : i32
    %2 = arith.cmpi ne, %1, %c0_i32_0 : i32
    scf.if %2 {
      %cst_10 = arith.constant 0.000000e+00 : f32
      %12 = vector.broadcast %cst_10 : f32 to vector<512x64xf32>
      %c0_11 = arith.constant 0 : index
      %c0_12 = arith.constant 0 : index
      %13 = vector.load %arg7[%c0_11, %c0_12] : memref<512x64xf32, #tpu.memory_space<vmem>>, vector<512x64xf32>
      tpu.vector_store %arg7[%c0_11, %c0_12], %12 {strides = array<i32>} : memref<512x64xf32, #tpu.memory_space<vmem>>, vector<512x64xf32>,
    } else {
    }
    %c0 = arith.constant 0 : index
    %c0_1 = arith.constant 0 : index
    %3 = vector.load %arg7[%c0, %c0_1] : memref<512x64xf32, #tpu.memory_space<vmem>>, vector<512x64xf32>
    %c0_2 = arith.constant 0 : index
    %c0_3 = arith.constant 0 : index
    %4 = vector.load %arg3[%c0_2, %c0_3] : memref<512x4xbf16, #tpu.memory_space<vmem>>, vector<512x4xbf16>
    %c0_4 = arith.constant 0 : index
    %c0_5 = arith.constant 0 : index
    %5 = vector.load %arg4[%c0_4, %c0_5] : memref<4x64xbf16, #tpu.memory_space<vmem>>, vector<4x64xbf16>
    %cst = arith.constant dense<0.000000e+00> : vector<512x64xf32>
    %6 = tpu.matmul %4, %5, %cst {dimension_numbers = #tpu.dot_dimension_numbers<[1], [0], [0], [1], [0, 0, 1, 1], [], []>} : vector<512x4xbf16>, vector<4x64xbf16>, vector<512x64xf32> -> vector<512x64xf32>
    %7 = arith.addf %3, %6 : vector<512x64xf32>
    %c0_6 = arith.constant 0 : index
    %c0_7 = arith.constant 0 : index
    %8 = vector.load %arg7[%c0_6, %c0_7] : memref<512x64xf32, #tpu.memory_space<vmem>>, vector<512x64xf32>
    tpu.vector_store %arg7[%c0_6, %c0_7], %7 {strides = array<i32>} : memref<512x64xf32, #tpu.memory_space<vmem>>, vector<512x64xf32>,
    %c0_i32_8 = arith.constant 0 : i32
    %9 = arith.cmpi eq, %arg2, %c0_i32_8 : i32
    %10 = arith.extui %9 : i1 to i32
    %c0_i32_9 = arith.constant 0 : i32
    %11 = arith.cmpi ne, %10, %c0_i32_9 : i32
    scf.if %11 {
      %c0_10 = arith.constant 0 : index
      %c0_11 = arith.constant 0 : index
      %12 = vector.load %arg7[%c0_10, %c0_11] : memref<512x64xf32, #tpu.memory_space<vmem>>, vector<512x64xf32>
      %c0_12 = arith.constant 0 : index
      %c0_13 = arith.constant 0 : index
      %13 = vector.load %arg5[%c0_12, %c0_13] : memref<1x64xf32, #tpu.memory_space<vmem>>, vector<1x64xf32>
      %14 = vector.broadcast %13 : vector<1x64xf32> to vector<512x64xf32>
      %15 = arith.addf %12, %14 : vector<512x64xf32>
      %16 = arith.negf %15 : vector<512x64xf32>
      %17 = math.exp %16 : vector<512x64xf32>
      %cst_14 = arith.constant 1.000000e+00 : f32
      %18 = vector.broadcast %cst_14 : f32 to vector<512x64xf32>
      %19 = arith.addf %18, %17 : vector<512x64xf32>
      %20 = arith.divf %18, %19 : vector<512x64xf32>
      %21 = arith.mulf %15, %20 : vector<512x64xf32>
      %22 = arith.truncf %21 : vector<512x64xf32> to vector<512x64xbf16>
      %c0_15 = arith.constant 0 : index
      %c0_16 = arith.constant 0 : index
      %23 = vector.load %arg6[%c0_15, %c0_16] : memref<512x64xbf16, #tpu.memory_space<vmem>>, vector<512x64xbf16>
      tpu.vector_store %arg6[%c0_15, %c0_16], %22 {strides = array<i32>} : memref<512x64xbf16, #tpu.memory_space<vmem>>, vector<512x64xbf16>,
    } else {
    }
    return
  }
  func.func @transform_0(%arg0: i32, %arg1: i32, %arg2: i32) -> (i32, i32) {
    %c0_i32 = arith.constant 0 : i32
    return %arg0, %arg2 : i32, i32
  }
  func.func @transform_1(%arg0: i32, %arg1: i32, %arg2: i32) -> (i32, i32) {
    %c0_i32 = arith.constant 0 : i32
    return %arg2, %arg1 : i32, i32
  }
  func.func @transform_2(%arg0: i32, %arg1: i32, %arg2: i32) -> (i32, i32) {
    %c0_i32 = arith.constant 0 : i32
    %c0_i32_0 = arith.constant 0 : i32
    return %c0_i32, %arg1 : i32, i32
  }
  func.func @transform_3(%arg0: i32, %arg1: i32, %arg2: i32) -> (i32, i32) {
    %c0_i32 = arith.constant 0 : i32
    return %arg0, %arg1 : i32, i32
  }
}

</mosaic_0001>

<bundles_post_ra>
// kernel: tpu_custom_call.1
= control target key start
LH: loop header
LB: loop body
LE: loop exit
PB: predicated region body
PF: predicated region fallthrough
CT: control target
= control target key end

     0   :  { %s3268_s12 = smov 0   ;;  %s3270_s13 = smov 0   ;;  %s5061_s0 = inlined_call_operand.vmem [shape: bf16[1024,4], index: 0, kind: input, shape index: {}]   ;;  %s5062_s1 = inlined_call_operand.vmem [shape: bf16[4,64], index: 1, kind: input, shape index: {}]   ;;  %s5063_s2 = inlined_call_operand.vmem [shape: f32[1,64], index: 2, kind: input, shape index: {}]   ;;  %s5064_s3 = inlined_call_operand.vmem [shape: bf16[1024,64], index: 3, kind: output, shape index: {}]  }
   0x1   :  { %s3272_s14 = smov 0  }
   0x2 LB: > { %s32_s15 = sadd.s32 1, %s3241_s13  ;;  %p2673_p0 = scmp.ge.s32.totalorder %s3245_s14, 1  ;;  %s3245_s14 = sphi %s3272_s14, %s13_s14   ;;  %s3241_s13 = sphi %s3270_s13, %s5276_s13   ;;  %s3237_s12 = sphi %s3268_s12, %s5275_s12  }
   0x3   : > { %p34_p1 = scmp.ge.s32.totalorder %s32_s15, 2  ;;  %p186_p2 = scmp.lt.s32.totalorder %s3245_s14, 3 }
   0x5   : > { %s5278_s15 = smov (%p34_p1, %s32_s15), 0  ;;  %p187_p3 = pnand %p2673_p0, %p186_p2 }
   0x6   : > { %s2674_s18 = sshll.u32 (!%p187_p3), %s3237_s12, 6 }
   0x7   : > { %190 = sbr.rel (%p187_p3) target bundleno = 500 (0x1f4), region = 32  ;;  %p227_p4 = scmp.lt.s32.totalorder (!%p187_p3), %s2674_s18, 127 }
   0xc   : > { %v452_v0 = vld [vmem:[%s5062_s1] sm:$0x3]  ;;  %vm710_vm0 = vcmask 1041408   ;;  %s5280_s18 = smov (!%p227_p4, %s2674_s18), 127  ;;  %vm613_vm1 = vcmask 31744   ;;  %vm5065_vm2 = vcmask 523264  }
   0xd   : > { %v712_v1 = vsel %vm710_vm0, %v452_v0, 0  ;;  %s2675_s19 = sshll.u32 %s5280_s18, 2  ;;  %v3247_v26 = vmov 0.0   ;;  %v3465_v39 = vld [vmem:[%s5063_s2] ss:$0 sm:$0xff]  ;;  %vm5066_vm7 = vcmask 519168  }
   0xe   : > { %721 = vmatpush.bf16.msra.mxu0 %v712_v1  ;;  %2936 = vmatpush.bf16.msra.mxu1 %v712_v1  ;;  %s3297_s22 = scalar_lea.vmem %s5061_s0, %s2675_s19  ;;  %260 = vst.msk [vmem:[#allocation2] sm:$0xff] %vm5065_vm2, %v3247_v26  ;;  %s3567_s27 = scalar_lea.vmem %s5064_s3, %s2675_s19 }
   0xf   : > { %2937 = vmatpush.bf16.msra.mxu2 %v712_v1  ;;  %2938 = vmatpush.bf16.msra.mxu3 %v712_v1  ;;  %v2904_v2 = vld [vmem:[%s3297_s22] sm:$0xff]  ;;  %v2905_v6 = vld [vmem:[%s3297_s22 + $0x8] sm:$0xff]  ;;  %v2906_v10 = vld [vmem:[%s3297_s22 + $0x10] sm:$0xff]  ;;  %261 = vst.msk [vmem:[#allocation2 + $0x8] sm:$0xff] %vm5065_vm2, %v3247_v26 }
  0x10   : > { %v2912_v3 = vld [vmem:[%s3297_s22 + $0x40] sm:$0xff]  ;;  %v2913_v7 = vld [vmem:[%s3297_s22 + $0x48] sm:$0xff]  ;;  %v2914_v11 = vld [vmem:[%s3297_s22 + $0x50] sm:$0xff]  ;;  %262 = vst.msk [vmem:[#allocation2 + $0x10] sm:$0xff] %vm5065_vm2, %v3247_v26 }
  0x11   : > { %v2920_v4 = vld [vmem:[%s3297_s22 + $0x80] sm:$0xff]  ;;  %2806 = vmatmul.msk.bf16.vlgmr.msra.gmra.mxu0 %vm613_vm1, %v2904_v2  ;;  %2814 = vmatmul.msk.bf16.vlgmr.msra.gmra.mxu1 %vm613_vm1, %v2912_v3  ;;  %v2921_v8 = vld [vmem:[%s3297_s22 + $0x88] sm:$0xff]  ;;  %v2922_v12 = vld [vmem:[%s3297_s22 + $0x90] sm:$0xff]  ;;  %263 = vst.msk [vmem:[#allocation2 + $0x18] sm:$0xff] %vm5065_vm2, %v3247_v26 }
  0x12   : > { %v2928_v5 = vld [vmem:[%s3297_s22 + $0xc0] sm:$0xff]  ;;  %2822 = vmatmul.msk.bf16.vlgmr.msra.gmra.mxu2 %vm613_vm1, %v2920_v4  ;;  %v2929_v9 = vld [vmem:[%s3297_s22 + $0xc8] sm:$0xff]  ;;  %v2930_v13 = vld [vmem:[%s3297_s22 + $0xd0] sm:$0xff]  ;;  %264 = vst.msk [vmem:[#allocation2 + $0x20] sm:$0xff] %vm5065_vm2, %v3247_v26 }
  0x13   : > { %2830 = vmatmul.msk.bf16.vlgmr.msra.gmra.mxu3 %vm613_vm1, %v2928_v5  ;;  %v2907_v14 = vld [vmem:[%s3297_s22 + $0x18] sm:$0xff]  ;;  %v2908_v18 = vld [vmem:[%s3297_s22 + $0x20] sm:$0xff]  ;;  %v2909_v22 = vld [vmem:[%s3297_s22 + $0x28] sm:$0xff]  ;;  %265 = vst.msk [vmem:[#allocation2 + $0x28] sm:$0xff] %vm5065_vm2, %v3247_v26 }
  0x14   : > { %v2915_v15 = vld [vmem:[%s3297_s22 + $0x58] sm:$0xff]  ;;  %v2916_v19 = vld [vmem:[%s3297_s22 + $0x60] sm:$0xff]  ;;  %v2917_v23 = vld [vmem:[%s3297_s22 + $0x68] sm:$0xff]  ;;  %266 = vst.msk [vmem:[#allocation2 + $0x30] sm:$0xff] %vm5065_vm2, %v3247_v26 }
  0x15   : > { %v2923_v16 = vld [vmem:[%s3297_s22 + $0x98] sm:$0xff]  ;;  %v2924_v20 = vld [vmem:[%s3297_s22 + $0xa0] sm:$0xff]  ;;  %v2925_v24 = vld [vmem:[%s3297_s22 + $0xa8] sm:$0xff]  ;;  %267 = vst.msk [vmem:[#allocation2 + $0x38] sm:$0xff] %vm5065_vm2, %v3247_v26 }
  0x16   : > { %v2931_v17 = vld [vmem:[%s3297_s22 + $0xd8] sm:$0xff]  ;;  %v2932_v21 = vld [vmem:[%s3297_s22 + $0xe0] sm:$0xff]  ;;  %v2933_v25 = vld [vmem:[%s3297_s22 + $0xe8] sm:$0xff]  ;;  %268 = vst.msk [vmem:[#allocation2 + $0x40] sm:$0xff] %vm5065_vm2, %v3247_v26 }
  0x17   : > { %269 = vst.msk [vmem:[#allocation2 + $0x48] sm:$0xff] %vm5065_vm2, %v3247_v26  ;;  %v2910_v27 = vld [vmem:[%s3297_s22 + $0x30] sm:$0xff]  ;;  %v2911_v31 = vld [vmem:[%s3297_s22 + $0x38] sm:$0xff]  ;;  %v324_v35 = vld [vmem:[#allocation2] sm:$0xff] }
  0x18   : > { %v2918_v28 = vld [vmem:[%s3297_s22 + $0x70] sm:$0xff]  ;;  %270 = vst.msk [vmem:[#allocation2 + $0x50] sm:$0xff] %vm5065_vm2, %v3247_v26  ;;  %v2919_v32 = vld [vmem:[%s3297_s22 + $0x78] sm:$0xff]  ;;  %v325_v53 = vld [vmem:[#allocation2 + $0x8] sm:$0xff] }
  0x19   : > { %v2926_v29 = vld [vmem:[%s3297_s22 + $0xb0] sm:$0xff]  ;;  %271 = vst.msk [vmem:[#allocation2 + $0x58] sm:$0xff] %vm5065_vm2, %v3247_v26  ;;  %v2927_v33 = vld [vmem:[%s3297_s22 + $0xb8] sm:$0xff] }
  0x1a   : > { %v2934_v30 = vld [vmem:[%s3297_s22 + $0xf0] sm:$0xff]  ;;  %272 = vst.msk [vmem:[#allocation2 + $0x60] sm:$0xff] %vm5065_vm2, %v3247_v26  ;;  %v2935_v34 = vld [vmem:[%s3297_s22 + $0xf8] sm:$0xff] }
  0x1b   : > { %273 = vst.msk [vmem:[#allocation2 + $0x68] sm:$0xff] %vm5065_vm2, %v3247_v26  ;;  %v326_v1 = vld [vmem:[#allocation2 + $0x10] sm:$0xff] }
  0x1c   : > { %274 = vst.msk [vmem:[#allocation2 + $0x70] sm:$0xff] %vm5065_vm2, %v3247_v26 }
  0x1d   : > { %275 = vst.msk [vmem:[#allocation2 + $0x78] sm:$0xff] %vm5065_vm2, %v3247_v26 }
  0x1e   : > { %276 = vst.msk [vmem:[#allocation2 + $0x80] sm:$0xff] %vm5065_vm2, %v3247_v26 }
  0x1f   : > { %277 = vst.msk [vmem:[#allocation2 + $0x88] sm:$0xff] %vm5065_vm2, %v3247_v26 }
  0x20   : > { %278 = vst.msk [vmem:[#allocation2 + $0x90] sm:$0xff] %vm5065_vm2, %v3247_v26 }
  0x21   : > { %2807 = vmatmul.msk.bf16.gmra.mxu0 %vm613_vm1, %v2905_v6  ;;  %2815 = vmatmul.msk.bf16.gmra.mxu1 %vm613_vm1, %v2913_v7  ;;  %279 = vst.msk [vmem:[#allocation2 + $0x98] sm:$0xff] %vm5065_vm2, %v3247_v26 }
  0x22   : > { %2823 = vmatmul.msk.bf16.gmra.mxu2 %vm613_vm1, %v2921_v8  ;;  %280 = vst.msk [vmem:[#allocation2 + $0xa0] sm:$0xff] %vm5065_vm2, %v3247_v26 }
  0x23   : > { %2831 = vmatmul.msk.bf16.gmra.mxu3 %vm613_vm1, %v2929_v9  ;;  %281 = vst.msk [vmem:[#allocation2 + $0xa8] sm:$0xff] %vm5065_vm2, %v3247_v26 }
  0x24   : > { %282 = vst.msk [vmem:[#allocation2 + $0xb0] sm:$0xff] %vm5065_vm2, %v3247_v26 }
  0x25   : > { %283 = vst.msk [vmem:[#allocation2 + $0xb8] sm:$0xff] %vm5065_vm2, %v3247_v26  ;;  %v340_v47 = vld [vmem:[#allocation2 + $0x80] sm:$0xff] }
  0x26   : > { %284 = vst.msk [vmem:[#allocation2 + $0xc0] sm:$0xff] %vm5065_vm2, %v3247_v26  ;;  %v341_v55 = vld [vmem:[#allocation2 + $0x88] sm:$0xff] }
  0x27   : > { %285 = vst.msk [vmem:[#allocation2 + $0xc8] sm:$0xff] %vm5065_vm2, %v3247_v26  ;;  %v342_v3 = vld [vmem:[#allocation2 + $0x90] sm:$0xff] }
  0x28   : > { %286 = vst.msk [vmem:[#allocation2 + $0xd0] sm:$0xff] %vm5065_vm2, %v3247_v26 }
  0x29   : > { %287 = vst.msk [vmem:[#allocation2 + $0xd8] sm:$0xff] %vm5065_vm2, %v3247_v26 }
  0x2a   : > { %288 = vst.msk [vmem:[#allocation2 + $0xe0] sm:$0xff] %vm5065_vm2, %v3247_v26 }
  0x2b   : > { %289 = vst.msk [vmem:[#allocation2 + $0xe8] sm:$0xff] %vm5065_vm2, %v3247_v26 }
  0x2c   : > { %290 = vst.msk [vmem:[#allocation2 + $0xf0] sm:$0xff] %vm5065_vm2, %v3247_v26 }
  0x2d   : > { %291 = vst.msk [vmem:[#allocation2 + $0xf8] sm:$0xff] %vm5065_vm2, %v3247_v26 }
  0x2e   : > { %292 = vst.msk [vmem:[#allocation2 + $0x100] sm:$0xff] %vm5065_vm2, %v3247_v26 }
  0x2f   : > { %293 = vst.msk [vmem:[#allocation2 + $0x108] sm:$0xff] %vm5065_vm2, %v3247_v26 }
  0x30   : > { %294 = vst.msk [vmem:[#allocation2 + $0x110] sm:$0xff] %vm5065_vm2, %v3247_v26 }
  0x31   : > { %2808 = vmatmul.msk.bf16.gmra.mxu0 %vm613_vm1, %v2906_v10  ;;  %2816 = vmatmul.msk.bf16.gmra.mxu1 %vm613_vm1, %v2914_v11  ;;  %295 = vst.msk [vmem:[#allocation2 + $0x118] sm:$0xff] %vm5065_vm2, %v3247_v26 }
  0x32   : > { %2824 = vmatmul.msk.bf16.gmra.mxu2 %vm613_vm1, %v2922_v12  ;;  %296 = vst.msk [vmem:[#allocation2 + $0x120] sm:$0xff] %vm5065_vm2, %v3247_v26 }
  0x33   : > { %2832 = vmatmul.msk.bf16.gmra.mxu3 %vm613_vm1, %v2930_v13  ;;  %297 = vst.msk [vmem:[#allocation2 + $0x128] sm:$0xff] %vm5065_vm2, %v3247_v26 }
  0x34   : > { %298 = vst.msk [vmem:[#allocation2 + $0x130] sm:$0xff] %vm5065_vm2, %v3247_v26 }
  0x35   : > { %299 = vst.msk [vmem:[#allocation2 + $0x138] sm:$0xff] %vm5065_vm2, %v3247_v26  ;;  %v356_v50 = vld [vmem:[#allocation2 + $0x100] sm:$0xff] }
  0x36   : > { %300 = vst.msk [vmem:[#allocation2 + $0x140] sm:$0xff] %vm5065_vm2, %v3247_v26  ;;  %v357_v58 = vld [vmem:[#allocation2 + $0x108] sm:$0xff] }
  0x37   : > { %301 = vst.msk [vmem:[#allocation2 + $0x148] sm:$0xff] %vm5065_vm2, %v3247_v26  ;;  %v358_v5 = vld [vmem:[#allocation2 + $0x110] sm:$0xff] }
  0x38   : > { %302 = vst.msk [vmem:[#allocation2 + $0x150] sm:$0xff] %vm5065_vm2, %v3247_v26 }
  0x39   : > { %303 = vst.msk [vmem:[#allocation2 + $0x158] sm:$0xff] %vm5065_vm2, %v3247_v26 }
  0x3a   : > { %304 = vst.msk [vmem:[#allocation2 + $0x160] sm:$0xff] %vm5065_vm2, %v3247_v26 }
  0x3b   : > { %305 = vst.msk [vmem:[#allocation2 + $0x168] sm:$0xff] %vm5065_vm2, %v3247_v26 }
  0x3c   : > { %306 = vst.msk [vmem:[#allocation2 + $0x170] sm:$0xff] %vm5065_vm2, %v3247_v26 }
  0x3d   : > { %307 = vst.msk [vmem:[#allocation2 + $0x178] sm:$0xff] %vm5065_vm2, %v3247_v26 }
  0x3e   : > { %308 = vst.msk [vmem:[#allocation2 + $0x180] sm:$0xff] %vm5065_vm2, %v3247_v26 }
  0x3f   : > { %309 = vst.msk [vmem:[#allocation2 + $0x188] sm:$0xff] %vm5065_vm2, %v3247_v26 }
  0x40   : > { %310 = vst.msk [vmem:[#allocation2 + $0x190] sm:$0xff] %vm5065_vm2, %v3247_v26 }
  0x41   : > { %2809 = vmatmul.msk.bf16.gmra.mxu0 %vm613_vm1, %v2907_v14  ;;  %2817 = vmatmul.msk.bf16.gmra.mxu1 %vm613_vm1, %v2915_v15  ;;  %311 = vst.msk [vmem:[#allocation2 + $0x198] sm:$0xff] %vm5065_vm2, %v3247_v26  ;;  %v327_v14 = vld [vmem:[#allocation2 + $0x18] sm:$0xff] }
  0x42   : > { %2825 = vmatmul.msk.bf16.gmra.mxu2 %vm613_vm1, %v2923_v16  ;;  %312 = vst.msk [vmem:[#allocation2 + $0x1a0] sm:$0xff] %vm5065_vm2, %v3247_v26 }
  0x43   : > { %2833 = vmatmul.msk.bf16.gmra.mxu3 %vm613_vm1, %v2931_v17  ;;  %313 = vst.msk [vmem:[#allocation2 + $0x1a8] sm:$0xff] %vm5065_vm2, %v3247_v26 }
  0x44   : > { %314 = vst.msk [vmem:[#allocation2 + $0x1b0] sm:$0xff] %vm5065_vm2, %v3247_v26 }
  0x45   : > { %315 = vst.msk [vmem:[#allocation2 + $0x1b8] sm:$0xff] %vm5065_vm2, %v3247_v26  ;;  %v372_v51 = vld [vmem:[#allocation2 + $0x180] sm:$0xff] }
  0x46   : > { %316 = vst.msk [vmem:[#allocation2 + $0x1c0] sm:$0xff] %vm5065_vm2, %v3247_v26  ;;  %v373_v61 = vld [vmem:[#allocation2 + $0x188] sm:$0xff] }
  0x47   : > { %317 = vst.msk [vmem:[#allocation2 + $0x1c8] sm:$0xff] %vm5065_vm2, %v3247_v26  ;;  %v374_v8 = vld [vmem:[#allocation2 + $0x190] sm:$0xff] }
  0x48   : > { %318 = vst.msk [vmem:[#allocation2 + $0x1d0] sm:$0xff] %vm5065_vm2, %v3247_v26 }
  0x49   : > { %319 = vst.msk [vmem:[#allocation2 + $0x1d8] sm:$0xff] %vm5065_vm2, %v3247_v26 }
  0x4a   : > { %320 = vst.msk [vmem:[#allocation2 + $0x1e0] sm:$0xff] %vm5065_vm2, %v3247_v26 }
  0x4b   : > { %321 = vst.msk [vmem:[#allocation2 + $0x1e8] sm:$0xff] %vm5065_vm2, %v3247_v26 }
  0x4c   : > { %322 = vst.msk [vmem:[#allocation2 + $0x1f0] sm:$0xff] %vm5065_vm2, %v3247_v26 }
  0x4d   : > { %323 = vst.msk [vmem:[#allocation2 + $0x1f8] sm:$0xff] %vm5065_vm2, %v3247_v26 }
  0x51   : > { %2810 = vmatmul.msk.bf16.gmra.mxu0 %vm613_vm1, %v2908_v18  ;;  %2818 = vmatmul.msk.bf16.gmra.mxu1 %vm613_vm1, %v2916_v19 }
  0x52   : > { %2826 = vmatmul.msk.bf16.gmra.mxu2 %vm613_vm1, %v2924_v20 }
  0x53   : > { %2834 = vmatmul.msk.bf16.gmra.mxu3 %vm613_vm1, %v2932_v21 }
  0x61   : > { %2811 = vmatmul.msk.bf16.gmra.mxu0 %vm613_vm1, %v2909_v22  ;;  %2819 = vmatmul.msk.bf16.gmra.mxu1 %vm613_vm1, %v2917_v23  ;;  %v343_v23 = vld [vmem:[#allocation2 + $0x98] sm:$0xff] }
  0x62   : > { %2827 = vmatmul.msk.bf16.gmra.mxu2 %vm613_vm1, %v2925_v24 }
  0x63   : > { %2835 = vmatmul.msk.bf16.gmra.mxu3 %vm613_vm1, %v2933_v25 }
  0x71   : > { %2812 = vmatmul.msk.bf16.gmra.mxu0 %vm613_vm1, %v2910_v27  ;;  %2820 = vmatmul.msk.bf16.gmra.mxu1 %vm613_vm1, %v2918_v28 }
  0x72   : > { %2828 = vmatmul.msk.bf16.gmra.mxu2 %vm613_vm1, %v2926_v29 }
  0x73   : > { %2836 = vmatmul.msk.bf16.gmra.mxu3 %vm613_vm1, %v2934_v30 }
  0x81   : > { %2813 = vmatmul.msk.bf16.gmra.mxu0 %vm613_vm1, %v2911_v31  ;;  %2821 = vmatmul.msk.bf16.gmra.mxu1 %vm613_vm1, %v2919_v32 }
  0x82   : > { %2829 = vmatmul.msk.bf16.gmra.mxu2 %vm613_vm1, %v2927_v33 }
  0x83   : > { %2837 = vmatmul.msk.bf16.gmra.mxu3 %vm613_vm1, %v2935_v34 }
  0x8e   : > { %v723_v36 = vpop.f32.mrf.mxu0  ;;  %v763_v38 = vpop.f32.mrf.mxu1 }
  0x8f   : > { %v883_v37 = vadd.f32 %v723_v36, %v324_v35  ;;  %v899_v52 = vadd.f32 %v763_v38, %v340_v47 }
  0x91   : > { %948 = vst.msk [vmem:[#allocation2] sm:$0xff] %vm5065_vm2, %v883_v37 }
  0x92   : > { %964 = vst.msk [vmem:[#allocation2 + $0x80] sm:$0xff] %vm5065_vm2, %v899_v52 }
  0x95   : > { %v803_v40 = vpop.f32.mrf.mxu2 }
  0x96   : > { %v843_v41 = vpop.f32.mrf.mxu3  ;;  %v725_v42 = vpop.f32.mrf.mxu0  ;;  %v915_v54 = vadd.f32 %v803_v40, %v356_v50 }
  0x97   : > { %v765_v45 = vpop.f32.mrf.mxu1  ;;  %v931_v57 = vadd.f32 %v843_v41, %v372_v51  ;;  %v884_v60 = vadd.f32 %v725_v42, %v325_v53 }
  0x98   : > { %v1015_v43 = vld [vmem:[#allocation2] sm:$0xff]  ;;  %v900_v0 = vadd.f32 %v765_v45, %v341_v55  ;;  %980 = vst.msk [vmem:[#allocation2 + $0x100] sm:$0xff] %vm5065_vm2, %v915_v54 }
  0x99   : > { %v3476_v44 = vadd.f32 %v3465_v39, %v1015_v43  ;;  %996 = vst.msk [vmem:[#allocation2 + $0x180] sm:$0xff] %vm5065_vm2, %v931_v57  ;;  %v1031_v13 = vld [vmem:[#allocation2 + $0x80] sm:$0xff] }
  0x9a   : > { %949 = vst.msk [vmem:[#allocation2 + $0x8] sm:$0xff] %vm5065_vm2, %v884_v60  ;;  %v3513_v17 = vadd.f32 %v3465_v39, %v1031_v13 }
  0x9b   : > { %v2838_v46 = vmul.f32 -1.442695, %v3476_v44  ;;  %965 = vst.msk [vmem:[#allocation2 + $0x88] sm:$0xff] %vm5065_vm2, %v900_v0 }
  0x9c   : > { %v2854_v26 = vmul.f32 -1.442695, %v3513_v17 }
  0x9d   : > { %2965 = vpow2.f32 %v2838_v46  ;;  %v805_v48 = vpop.f32.mrf.mxu2 }
  0x9e   : > { %v845_v49 = vpop.f32.mrf.mxu3  ;;  %v728_v56 = vpop.f32.mrf.mxu0  ;;  %v916_v2 = vadd.f32 %v805_v48, %v357_v58 }
  0x9f   : > { %v768_v62 = vpop.f32.mrf.mxu1  ;;  %v932_v4 = vadd.f32 %v845_v49, %v373_v61  ;;  %v885_v7 = vadd.f32 %v728_v56, %v326_v1  ;;  %v1047_v18 = vld [vmem:[#allocation2 + $0x100] sm:$0xff] }
  0xa0   : > { %v901_v10 = vadd.f32 %v768_v62, %v342_v3  ;;  %981 = vst.msk [vmem:[#allocation2 + $0x108] sm:$0xff] %vm5065_vm2, %v916_v2  ;;  %v3519_v21 = vadd.f32 %v3465_v39, %v1047_v18  ;;  %v1063_v22 = vld [vmem:[#allocation2 + $0x180] sm:$0xff] }
  0xa1   : > { %997 = vst.msk [vmem:[#allocation2 + $0x188] sm:$0xff] %vm5065_vm2, %v932_v4  ;;  %v3525_v27 = vadd.f32 %v3465_v39, %v1063_v22  ;;  %v1016_v28 = vld [vmem:[#allocation2 + $0x8] sm:$0xff] }
  0xa2   : > { %950 = vst.msk [vmem:[#allocation2 + $0x10] sm:$0xff] %vm5065_vm2, %v885_v7  ;;  %v2870_v32 = vmul.f32 -1.442695, %v3519_v21  ;;  %v3531_v33 = vadd.f32 %v3465_v39, %v1016_v28  ;;  %v1032_v34 = vld [vmem:[#allocation2 + $0x88] sm:$0xff] }
  0xa3   : > { %v2966_v59 = vpop.eup %2965  ;;  %966 = vst.msk [vmem:[#allocation2 + $0x90] sm:$0xff] %vm5065_vm2, %v901_v10  ;;  %v2886_v35 = vmul.f32 -1.442695, %v3525_v27  ;;  %v3536_v36 = vadd.f32 %v3465_v39, %v1032_v34 }
  0xa4   : > { %v3501_v63 = vadd.f32 1.0, %v2966_v59  ;;  %v2839_v40 = vmul.f32 -1.442695, %v3531_v33 }
  0xa5   : > { %v808_v6 = vpop.f32.mrf.mxu2  ;;  %v2855_v43 = vmul.f32 -1.442695, %v3536_v36 }
  0xa6   : > { %2967 = vrcp.f32 %v3501_v63  ;;  %v848_v9 = vpop.f32.mrf.mxu3  ;;  %v917_v11 = vadd.f32 %v808_v6, %v358_v5  ;;  %v730_v15 = vpop.f32.mrf.mxu0  ;;  %vm1408_vm3 = vweird.f32 %v3501_v63  ;;  %v1412_v25 = vand.u32 2147483647, %v3501_v63 }
  0xa7   : > { %v933_v12 = vadd.f32 %v848_v9, %v374_v8  ;;  %v886_v19 = vadd.f32 %v730_v15, %v327_v14  ;;  %v770_v24 = vpop.f32.mrf.mxu1  ;;  %v1414_v31 = vand.u32 2147483648, %v3501_v63  ;;  %2969 = vpow2.f32 %v2854_v26  ;;  %v1048_v37 = vld [vmem:[#allocation2 + $0x108] sm:$0xff] }
  0xa8   : > { %982 = vst.msk [vmem:[#allocation2 + $0x110] sm:$0xff] %vm5065_vm2, %v917_v11  ;;  %v902_v29 = vadd.f32 %v770_v24, %v343_v23  ;;  %2971 = vpow2.f32 %v2870_v32  ;;  %v3541_v41 = vadd.f32 %v3465_v39, %v1048_v37  ;;  %v1064_v42 = vld [vmem:[#allocation2 + $0x188] sm:$0xff]  ;;  %vm1413_vm6 = vcmp.eq.f32.partialorder %v1412_v25, 8.507059e+37 }
  0xa9   : > { %998 = vst.msk [vmem:[#allocation2 + $0x190] sm:$0xff] %vm5065_vm2, %v933_v12  ;;  %2973 = vpow2.f32 %v2886_v35  ;;  %v3545_v45 = vadd.f32 %v3465_v39, %v1064_v42  ;;  %v1017_v46 = vld [vmem:[#allocation2 + $0x10] sm:$0xff]  ;;  %v1415_v51 = vor.u32 1.1754944e-38, %v1414_v31 }
  0xaa   : > { %951 = vst.msk [vmem:[#allocation2 + $0x18] sm:$0xff] %vm5065_vm2, %v886_v19  ;;  %2975 = vpow2.f32 %v2839_v40  ;;  %v2871_v48 = vmul.f32 -1.442695, %v3541_v41  ;;  %v3549_v49 = vadd.f32 %v3465_v39, %v1017_v46  ;;  %v1033_v50 = vld [vmem:[#allocation2 + $0x90] sm:$0xff] }
  0xab   : > { %967 = vst.msk [vmem:[#allocation2 + $0x98] sm:$0xff] %vm5065_vm2, %v902_v29  ;;  %2977 = vpow2.f32 %v2855_v43  ;;  %v2887_v52 = vmul.f32 -1.442695, %v3545_v45  ;;  %v3556_v53 = vadd.f32 %v3465_v39, %v1033_v50 }
  0xac   : > { %v2968_v16 = vpop.eup %2967  ;;  %2979 = vpow2.f32 %v2871_v48  ;;  %v2840_v61 = vmul.f32 -1.442695, %v3549_v49 }
  0xad   : > { %v1404_v20 = vmul.f32 %v2968_v16, %v3501_v63  ;;  %vm1409_vm4 = vweird.f32 %v2968_v16  ;;  %v2970_v55 = vpop.eup %2969  ;;  %2981 = vpow2.f32 %v2887_v52  ;;  %v2856_v0 = vmul.f32 -1.442695, %v3556_v53 }
  0xae   : > { %vm1410_vm5 = vmor %vm1408_vm3, %vm1409_vm4  ;;  %v2972_v58 = vpop.eup %2971  ;;  %v3559_v60 = vadd.f32 1.0, %v2970_v55 }
  0xaf   : > { %v1405_v30 = vsub.f32 1.0, %v1404_v20  ;;  %v1049_v57 = vld [vmem:[#allocation2 + $0x110] sm:$0xff]  ;;  %v2974_v62 = vpop.eup %2973  ;;  %v3569_v63 = vadd.f32 1.0, %v2972_v58 }
  0xb0   : > { %v1065_v1 = vld [vmem:[#allocation2 + $0x190] sm:$0xff]  ;;  %2983 = vrcp.f32 %v3559_v60  ;;  %v3574_v3 = vadd.f32 %v3465_v39, %v1049_v57  ;;  %v3579_v6 = vadd.f32 1.0, %v2974_v62  ;;  %v1652_v10 = vand.u32 2147483647, %v3559_v60 }
  0xb1   : > { %v1406_v38 = vmul.f32 %v2968_v16, %v1405_v30  ;;  %2985 = vrcp.f32 %v3569_v63  ;;  %v3584_v8 = vadd.f32 %v3465_v39, %v1065_v1  ;;  %v1018_v9 = vld [vmem:[#allocation2 + $0x18] sm:$0xff]  ;;  %v1654_v11 = vand.u32 2147483648, %v3559_v60 }
  0xb2   : > { %2987 = vpow2.f32 %v2840_v61  ;;  %v1892_v13 = vand.u32 2147483647, %v3569_v63  ;;  %v1894_v14 = vand.u32 2147483648, %v3569_v63  ;;  %v3594_v15 = vmul.f32 -1.442695, %v3574_v3 }
  0xb3   : > { %v1407_v47 = vadd.f32 %v2968_v16, %v1406_v38  ;;  %2989 = vpow2.f32 %v2856_v0  ;;  %v2134_v18 = vand.u32 2147483648, %v3579_v6  ;;  %v3601_v20 = vadd.f32 %v3465_v39, %v1018_v9 }
  0xb4   : > { %2991 = vrcp.f32 %v3579_v6  ;;  %vm1648_vm8 = vweird.f32 %v3559_v60  ;;  %vm1888_vm9 = vweird.f32 %v3569_v63  ;;  %vm3608_vm10 = vcmp.eq.f32.partialorder %v1652_v10, 8.507059e+37 }
  0xb5   : > { %v1411_v54 = vsel %vm1410_vm5, %v2968_v16, %v1407_v47  ;;  %v1655_v28 = vor.u32 1.1754944e-38, %v1654_v11  ;;  %v2132_v29 = vand.u32 2147483647, %v3579_v6  ;;  %vm3614_vm12 = vcmp.eq.f32.partialorder %v1892_v13, 8.507059e+37 }
  0xb6   : > { %v1416_v56 = vsel %vm1413_vm6, %v1415_v51, %v1411_v54  ;;  %v1895_v34 = vor.u32 1.1754944e-38, %v1894_v14  ;;  %vm2128_vm13 = vweird.f32 %v3579_v6  ;;  %v2135_v40 = vor.u32 1.1754944e-38, %v2134_v18  ;;  %v773_v54 = vpop.f32.mrf.mxu1 }
  0xb7   : > { %v2363_v59 = vmul.f32 %v1416_v56, %v3476_v44  ;;  %v2976_v44 = vpop.eup %2975  ;;  %vm3627_vm0 = vcmp.eq.f32.partialorder %v2132_v29, 8.507059e+37 }
  0xb8   : > { %v2978_v4 = vpop.eup %2977  ;;  %v3581_v7 = vadd.f32 1.0, %v2976_v44 }
  0xb9   : > { %v2427_v2 = vpack.c.bf16 %v2363_v59, %v2363_v59  ;;  %v2980_v5 = vpop.eup %2979  ;;  %v3588_v12 = vadd.f32 1.0, %v2978_v4 }
  0xba   : > { %v2982_v16 = vpop.eup %2981  ;;  %2993 = vrcp.f32 %v3581_v7  ;;  %v3598_v19 = vadd.f32 1.0, %v2980_v5  ;;  %v1429_v23 = vand.u32 2147483648, %v3581_v7  ;;  %v1427_v35 = vand.u32 2147483647, %v3581_v7 }
  0xbb   : > { %2492 = vst.msk [vmem:[%s3567_s27] sm:$0xf] %vm5066_vm7, %v2427_v2  ;;  %v2984_v22 = vpop.eup %2983  ;;  %2995 = vrcp.f32 %v3588_v12  ;;  %v1669_v42 = vand.u32 2147483648, %v3588_v12  ;;  %vm1423_vm15 = vweird.f32 %v3581_v7  ;;  %v1667_v48 = vand.u32 2147483647, %v3588_v12 }
  0xbc   : > { %v2986_v24 = vpop.eup %2985  ;;  %v1644_v25 = vmul.f32 %v2984_v22, %v3559_v60  ;;  %vm1649_vm11 = vweird.f32 %v2984_v22  ;;  %2997 = vrcp.f32 %v3598_v19  ;;  %v1430_v47 = vor.u32 1.1754944e-38, %v1429_v23 }
  0xbd   : > { %v2988_v30 = vpop.eup %2987  ;;  %v1884_v31 = vmul.f32 %v2986_v24, %v3569_v63  ;;  %vm1889_vm14 = vweird.f32 %v2986_v24  ;;  %vm1663_vm1 = vweird.f32 %v3588_v12  ;;  %v1907_v55 = vand.u32 2147483647, %v3598_v19  ;;  %vm1650_vm6 = vmor %vm1648_vm8, %vm1649_vm11 }
  0xbe   : > { %v3619_v37 = vpop.eup %2989  ;;  %v1645_v38 = vsub.f32 1.0, %v1644_v25  ;;  %v1909_v56 = vand.u32 2147483648, %v3598_v19  ;;  %vm3635_vm4 = vcmp.eq.f32.partialorder %v1427_v35, 8.507059e+37  ;;  %v1670_v62 = vor.u32 1.1754944e-38, %v1669_v42  ;;  %vm1890_vm7 = vmor %vm1888_vm9, %vm1889_vm14 }
  0xbf   : > { %v2992_v43 = vpop.eup %2991  ;;  %v1885_v46 = vsub.f32 1.0, %v1884_v31  ;;  %v3643_v5 = vadd.f32 1.0, %v2982_v16  ;;  %v3648_v14 = vadd.f32 1.0, %v2988_v30  ;;  %vm5075_vm11 = vcmask 519168  }
  0xc0   : > { %v2994_v50 = vpop.eup %2993  ;;  %v1646_v51 = vmul.f32 %v2984_v22, %v1645_v38  ;;  %v2124_v52 = vmul.f32 %v2992_v43, %v3579_v6  ;;  %vm2129_vm3 = vweird.f32 %v2992_v43 }
  0xc1   : > { %v2996_v57 = vpop.eup %2995  ;;  %v1886_v58 = vmul.f32 %v2986_v24, %v1885_v46  ;;  %v1419_v59 = vmul.f32 %v2994_v50, %v3581_v7  ;;  %vm1424_vm5 = vweird.f32 %v2994_v50  ;;  %vm2130_vm8 = vmor %vm2128_vm13, %vm2129_vm3  ;;  %2999 = vrcp.f32 %v3643_v5 }
  0xc2   : > { %v1647_v0 = vadd.f32 %v2984_v22, %v1646_v51  ;;  %v2125_v1 = vsub.f32 1.0, %v2124_v52  ;;  %v1659_v44 = vmul.f32 %v2996_v57, %v3588_v12  ;;  %vm1664_vm2 = vweird.f32 %v2996_v57  ;;  %v2998_v9 = vpop.eup %2997  ;;  %vm1425_vm9 = vmor %vm1423_vm15, %vm1424_vm5  ;;  %v733_v12 = vpop.f32.mrf.mxu0 }
  0xc3   : > { %v1887_v2 = vadd.f32 %v2986_v24, %v1886_v58  ;;  %v1420_v4 = vsub.f32 1.0, %v1419_v59  ;;  %v1899_v25 = vmul.f32 %v2998_v9, %v3598_v19  ;;  %vm5076_vm13 = vmmov %vm5075_vm11  ;;  %3001 = vrcp.f32 %v3648_v14 }
  0xc4   : > { %v1651_v10 = vsel %vm1650_vm6, %v2984_v22, %v1647_v0  ;;  %v2126_v11 = vmul.f32 %v2992_v43, %v2125_v1  ;;  %v1660_v13 = vsub.f32 1.0, %v1659_v44  ;;  %vm1908_vm15 = vcmp.eq.f32.partialorder %v1907_v55, 8.507059e+37 }
  0xc5   : > { %v1656_v18 = vsel %vm3608_vm10, %v1655_v28, %v1651_v10  ;;  %v1891_v60 = vsel %vm1890_vm7, %v2986_v24, %v1887_v2  ;;  %v1421_v23 = vmul.f32 %v2994_v50, %v1420_v4  ;;  %v1900_v28 = vsub.f32 1.0, %v1899_v25  ;;  %v3660_v24 = vpop.f32.mrf.mxu2  ;;  %vm1665_vm10 = vmor %vm1663_vm1, %vm1664_vm2  ;;  %v359_v2 = vld [vmem:[#allocation2 + $0x118] sm:$0xff]  ;;  %v360_v25 = vld [vmem:[#allocation2 + $0x120] sm:$0xff] }
  0xc6   : > { %v2379_v16 = vmul.f32 %v1656_v18, %v3513_v17  ;;  %v1896_v22 = vsel %vm3614_vm12, %v1895_v34, %v1891_v60  ;;  %v2127_v29 = vadd.f32 %v2992_v43, %v2126_v11  ;;  %v1661_v31 = vmul.f32 %v2996_v57, %v1660_v13  ;;  %v328_v11 = vld [vmem:[#allocation2 + $0x20] sm:$0xff] }
  0xc7   : > { %v2395_v63 = vmul.f32 %v1896_v22, %v3519_v21  ;;  %v1422_v26 = vadd.f32 %v2994_v50, %v1421_v23  ;;  %vm1904_vm7 = vweird.f32 %v2998_v9  ;;  %v1901_v35 = vmul.f32 %v2998_v9, %v1900_v28  ;;  %v344_v23 = vld [vmem:[#allocation2 + $0xa0] sm:$0xff] }
  0xc8   : > { %v2443_v30 = vpack.c.bf16 %v2379_v16, %v2379_v16  ;;  %v2131_v17 = vsel %vm2130_vm8, %v2992_v43, %v2127_v29  ;;  %v1662_v32 = vadd.f32 %v2996_v57, %v1661_v31  ;;  %vm1668_vm12 = vcmp.eq.f32.partialorder %v1667_v48, 8.507059e+37  ;;  %v850_v43 = vpop.f32.mrf.mxu3  ;;  %v376_v31 = vld [vmem:[#allocation2 + $0x1a0] sm:$0xff] }
  0xc9   : > { %v2459_v21 = vpack.c.bf16 %v2395_v63, %v2395_v63  ;;  %v2136_v6 = vsel %vm3627_vm0, %v2135_v40, %v2131_v17  ;;  %v1426_v34 = vsel %vm1425_vm9, %v2994_v50, %v1422_v26  ;;  %v1902_v50 = vadd.f32 %v2998_v9, %v1901_v35  ;;  %vm5077_vm0 = vmmov %vm5075_vm11 }
  0xca   : > { %2508 = vst.msk [vmem:[%s3567_s27 + $0x40] sm:$0xf] %vm5075_vm11, %v2443_v30  ;;  %v2411_v38 = vmul.f32 %v2136_v6, %v3525_v27  ;;  %v1431_v7 = vsel %vm3635_vm4, %v1430_v47, %v1426_v34  ;;  %v1666_v42 = vsel %vm1665_vm10, %v2996_v57, %v1662_v32  ;;  %vm1903_vm2 = vweird.f32 %v3598_v19  ;;  %v3686_v57 = vpop.eup %2999  ;;  %vm5078_vm1 = vmmov %vm5077_vm0  ;;  %v329_v32 = vld [vmem:[#allocation2 + $0x28] sm:$0xff] }
  0xcb   : > { %2524 = vst.msk [vmem:[%s3567_s27 + $0x80] sm:$0xf] %vm5076_vm13, %v2459_v21  ;;  %v2364_v40 = vmul.f32 %v1431_v7, %v3531_v33  ;;  %v1671_v46 = vsel %vm1668_vm12, %v1670_v62, %v1666_v42  ;;  %vm1905_vm14 = vmor %vm1903_vm2, %vm1904_vm7  ;;  %v1910_v47 = vor.u32 1.1754944e-38, %v1909_v56  ;;  %v2888_v33 = vmul.f32 -1.442695, %v3584_v8  ;;  %v735_v21 = vpop.f32.mrf.mxu0 }
  0xcc   : > { %v2475_v51 = vpack.c.bf16 %v2411_v38, %v2411_v38  ;;  %v2380_v27 = vmul.f32 %v1671_v46, %v3536_v36  ;;  %v1906_v52 = vsel %vm1905_vm14, %v2998_v9, %v1902_v50  ;;  %v2147_v59 = vand.u32 2147483647, %v3643_v5  ;;  %vm5079_vm3 = vmmov %vm5077_vm0  ;;  %v3706_v9 = vpop.eup %3001  ;;  %v345_v46 = vld [vmem:[#allocation2 + $0xa8] sm:$0xff]  ;;  %v775_v50 = vpop.f32.mrf.mxu1 }
  0xcd   : > { %v2428_v48 = vpack.c.bf16 %v2364_v40, %v2364_v40  ;;  %v1911_v36 = vsel %vm1908_vm15, %v1910_v47, %v1906_v52  ;;  %v2149_v56 = vand.u32 2147483648, %v3643_v5  ;;  %v2139_v19 = vmul.f32 %v3686_v57, %v3643_v5  ;;  %v813_v4 = vpop.f32.mrf.mxu2  ;;  %vm5082_vm8 = vmmov %vm5077_vm0 }
  0xce   : > { %2540 = vst.msk [vmem:[%s3567_s27 + $0xc0] sm:$0xf] %vm5077_vm0, %v2475_v51  ;;  %v2444_v58 = vpack.c.bf16 %v2380_v27, %v2380_v27  ;;  %v2396_v61 = vmul.f32 %v1911_v36, %v3541_v41  ;;  %v1442_v55 = vand.u32 2147483647, %v3648_v14  ;;  %v3701_v62 = vadd.f32 1.0, %v3619_v37  ;;  %v1034_v41 = vld [vmem:[#allocation2 + $0x98] sm:$0xff] }
  0xcf   : > { %2493 = vst.msk [vmem:[%s3567_s27 + $0x4] sm:$0xf] %vm5078_vm1, %v2428_v48  ;;  %3003 = vpow2.f32 %v3594_v15  ;;  %v2841_v0 = vmul.f32 -1.442695, %v3601_v20  ;;  %v2140_v44 = vsub.f32 1.0, %v2139_v19  ;;  %vm2143_vm4 = vweird.f32 %v3643_v5  ;;  %v375_v15 = vld [vmem:[#allocation2 + $0x198] sm:$0xff] }
  0xd0   : > { %2509 = vst.msk [vmem:[%s3567_s27 + $0x44] sm:$0xf] %vm5079_vm3, %v2444_v58  ;;  %v2460_v1 = vpack.c.bf16 %v2396_v61, %v2396_v61  ;;  %3005 = vpow2.f32 %v2888_v33  ;;  %vm3708_vm5 = vcmp.eq.f32.partialorder %v2147_v59, 8.507059e+37  ;;  %v2150_v37 = vor.u32 1.1754944e-38, %v2149_v56  ;;  %v853_v63 = vpop.f32.mrf.mxu3 }
  0xd1   : > { %vm1438_vm6 = vweird.f32 %v3648_v14  ;;  %3007 = vrcp.f32 %v3701_v62  ;;  %v2141_v13 = vmul.f32 %v3686_v57, %v2140_v44  ;;  %vm2144_vm7 = vweird.f32 %v3686_v57 }
  0xd2   : > { %2525 = vst.msk [vmem:[%s3567_s27 + $0x84] sm:$0xf] %vm5082_vm8, %v2460_v1  ;;  %v1434_v18 = vmul.f32 %v3706_v9, %v3648_v14  ;;  %v1444_v60 = vand.u32 2147483648, %v3648_v14  ;;  %vm3721_vm9 = vcmp.eq.f32.partialorder %v1442_v55, 8.507059e+37  ;;  %3009 = vpow2.f32 %v2841_v0  ;;  %vm3734_vm10 = vmor %vm2143_vm4, %vm2144_vm7  ;;  %v361_v14 = vld [vmem:[#allocation2 + $0x128] sm:$0xff] }
  0xd3   : > { %v3726_v22 = vadd.f32 %v3465_v39, %v1034_v41  ;;  %v918_v29 = vadd.f32 %v3660_v24, %v359_v2  ;;  %v2142_v26 = vadd.f32 %v3686_v57, %v2141_v13  ;;  %v934_v30 = vadd.f32 %v850_v43, %v375_v15 }
  0xd4   : > { %v1435_v28 = vsub.f32 1.0, %v1434_v18  ;;  %v887_v17 = vadd.f32 %v733_v12, %v328_v11  ;;  %vm1439_vm11 = vweird.f32 %v3706_v9  ;;  %vm5087_vm12 = vcmask 523264  }
  0xd5   : > { %v3004_v6 = vpop.eup %3003  ;;  %v2857_v24 = vmul.f32 -1.442695, %v3726_v22  ;;  %983 = vst.msk [vmem:[#allocation2 + $0x118] sm:$0xff] %vm5087_vm12, %v918_v29  ;;  %v903_v35 = vadd.f32 %v773_v54, %v344_v23  ;;  %v919_v38 = vadd.f32 %v813_v4, %v360_v25  ;;  %v2146_v42 = vsel %vm3734_vm10, %v3686_v57, %v2142_v26  ;;  %vm5088_vm13 = vmmov %vm5087_vm12  ;;  %v815_v19 = vpop.f32.mrf.mxu2 }
  0xd6   : > { %v3006_v7 = vpop.eup %3005  ;;  %v1436_v43 = vmul.f32 %v3706_v9, %v1435_v28  ;;  %v3745_v5 = vadd.f32 1.0, %v3004_v6  ;;  %999 = vst.msk [vmem:[#allocation2 + $0x198] sm:$0xff] %vm5088_vm13, %v934_v30  ;;  %v935_v40 = vadd.f32 %v853_v63, %v376_v31  ;;  %v2151_v51 = vsel %vm3708_vm5, %v2150_v37, %v2146_v42  ;;  %vm5089_vm2 = vmmov %vm5087_vm12 }
  0xd7   : > { %v3008_v12 = vpop.eup %3007  ;;  %v3750_v27 = vadd.f32 1.0, %v3006_v7  ;;  %3011 = vpow2.f32 %v2857_v24  ;;  %952 = vst.msk [vmem:[#allocation2 + $0x20] sm:$0xff] %vm5089_vm2, %v887_v17  ;;  %v888_v47 = vadd.f32 %v735_v21, %v329_v32  ;;  %v2412_v48 = vmul.f32 %v2151_v51, %v3545_v45  ;;  %vm5090_vm14 = vmmov %vm5089_vm2 }
  0xd8   : > { %v1437_v52 = vadd.f32 %v3706_v9, %v1436_v43  ;;  %v1445_v33 = vor.u32 1.1754944e-38, %v1444_v60  ;;  %v1674_v54 = vmul.f32 %v3008_v12, %v3701_v62  ;;  %968 = vst.msk [vmem:[#allocation2 + $0xa0] sm:$0xff] %vm5090_vm14, %v903_v35  ;;  %v3010_v57 = vpop.eup %3009  ;;  %vm1440_vm15 = vmor %vm1438_vm6, %vm1439_vm11  ;;  %v1682_v58 = vand.u32 2147483647, %v3701_v62 }
  0xd9   : > { %v1684_v36 = vand.u32 2147483648, %v3701_v62  ;;  %3013 = vrcp.f32 %v3745_v5  ;;  %vm5091_vm0 = vmmov %vm5089_vm2  ;;  %v904_v45 = vadd.f32 %v775_v50, %v345_v46  ;;  %v2476_v59 = vpack.c.bf16 %v2412_v48, %v2412_v48 }
  0xda   : > { %984 = vst.msk [vmem:[#allocation2 + $0x120] sm:$0xff] %vm5091_vm0, %v919_v38  ;;  %v1441_v56 = vsel %vm1440_vm15, %v3706_v9, %v1437_v52  ;;  %v1675_v61 = vsub.f32 1.0, %v1674_v54  ;;  %3015 = vrcp.f32 %v3750_v27  ;;  %vm5092_vm1 = vmmov %vm5091_vm0  ;;  %vm1678_vm3 = vweird.f32 %v3701_v62 }
  0xdb   : > { %1000 = vst.msk [vmem:[#allocation2 + $0x1a0] sm:$0xff] %vm5092_vm1, %v935_v40  ;;  %v1446_v55 = vsel %vm3721_vm9, %v1445_v33, %v1441_v56  ;;  %v1924_v0 = vand.u32 2147483648, %v3745_v5  ;;  %vm5093_vm4 = vmmov %vm5091_vm0  ;;  %vm1679_vm6 = vweird.f32 %v3008_v12  ;;  %v1922_v41 = vand.u32 2147483647, %v3745_v5 }
  0xdc   : > { %953 = vst.msk [vmem:[#allocation2 + $0x28] sm:$0xff] %vm5093_vm4, %v888_v47  ;;  %vm5094_vm5 = vmmov %vm5082_vm8  ;;  %v2365_v1 = vmul.f32 %v1446_v55, %v3549_v49  ;;  %v1676_v44 = vmul.f32 %v3008_v12, %v1675_v61  ;;  %vm3777_vm8 = vcmp.eq.f32.partialorder %v1682_v58, 8.507059e+37  ;;  %v2162_v9 = vand.u32 2147483647, %v3750_v27  ;;  %v1050_v37 = vld [vmem:[#allocation2 + $0x118] sm:$0xff] }
  0xdd   : > { %2541 = vst.msk [vmem:[%s3567_s27 + $0xc4] sm:$0xf] %vm5094_vm5, %v2476_v59  ;;  %v3012_v2 = vpop.eup %3011  ;;  %v3782_v10 = vadd.f32 1.0, %v3010_v57  ;;  %vm5097_vm7 = vmmov %vm5091_vm0  ;;  %v920_v15 = vadd.f32 %v815_v19, %v361_v14  ;;  %v1685_v13 = vor.u32 1.1754944e-38, %v1684_v36  ;;  %vm1918_vm9 = vweird.f32 %v3745_v5  ;;  %v1066_v32 = vld [vmem:[#allocation2 + $0x198] sm:$0xff] }
  0xde   : > { %969 = vst.msk [vmem:[#allocation2 + $0xa8] sm:$0xff] %vm5097_vm7, %v904_v45  ;;  %v2429_v11 = vpack.c.bf16 %v2365_v1, %v2365_v1  ;;  %v1677_v49 = vadd.f32 %v3008_v12, %v1676_v44  ;;  %vm1680_vm10 = vmor %vm1678_vm3, %vm1679_vm6  ;;  %v1925_v60 = vor.u32 1.1754944e-38, %v1924_v0  ;;  %vm2158_vm11 = vweird.f32 %v3750_v27  ;;  %v1019_v24 = vld [vmem:[#allocation2 + $0x20] sm:$0xff] }
  0xdf   : > { %v3014_v18 = vpop.eup %3013  ;;  %v2164_v23 = vand.u32 2147483648, %v3750_v27  ;;  %3017 = vrcp.f32 %v3782_v10  ;;  %vm5098_vm12 = vmmov %vm5091_vm0  ;;  %vm3795_vm2 = vcmp.eq.f32.partialorder %v1922_v41, 8.507059e+37  ;;  %v3799_v62 = vadd.f32 1.0, %v3012_v2 }
  0xe0   : > { %985 = vst.msk [vmem:[#allocation2 + $0x128] sm:$0xff] %vm5098_vm12, %v920_v15  ;;  %v3016_v25 = vpop.eup %3015  ;;  %vm5099_vm13 = vmmov %vm5094_vm5  ;;  %v1681_v16 = vsel %vm1680_vm10, %v3008_v12, %v1677_v49  ;;  %v1914_v29 = vmul.f32 %v3014_v18, %v3745_v5  ;;  %v3802_v63 = vadd.f32 %v3465_v39, %v1050_v37  ;;  %vm3807_vm14 = vcmp.eq.f32.partialorder %v2162_v9, 8.507059e+37 }
  0xe1   : > { %2494 = vst.msk [vmem:[%s3567_s27 + $0x8] sm:$0xf] %vm5099_vm13, %v2429_v11  ;;  %v1686_v26 = vsel %vm3777_vm8, %v1685_v13, %v1681_v16  ;;  %v2154_v28 = vmul.f32 %v3016_v25, %v3750_v27  ;;  %v1459_v17 = vand.u32 2147483648, %v3782_v10  ;;  %v1457_v34 = vand.u32 2147483647, %v3782_v10  ;;  %v1051_v48 = vld [vmem:[#allocation2 + $0x120] sm:$0xff]  ;;  %vm5104_vm3 = vmmov %vm5094_vm5 }
  0xe2   : > { %v2381_v21 = vmul.f32 %v1686_v26, %v3556_v53  ;;  %v1915_v6 = vsub.f32 1.0, %v1914_v29  ;;  %3019 = vrcp.f32 %v3799_v62  ;;  %vm1919_vm15 = vweird.f32 %v3014_v18  ;;  %v1035_v53 = vld [vmem:[#allocation2 + $0xa0] sm:$0xff]  ;;  %vm5107_vm10 = vmmov %vm5104_vm3 }
  0xe3   : > { %v2155_v35 = vsub.f32 1.0, %v2154_v28  ;;  %vm2159_vm0 = vweird.f32 %v3016_v25  ;;  %v2165_v38 = vor.u32 1.1754944e-38, %v2164_v23  ;;  %vm1453_vm1 = vweird.f32 %v3782_v10  ;;  %v1067_v58 = vld [vmem:[#allocation2 + $0x1a0] sm:$0xff]  ;;  %vm1920_vm5 = vmor %vm1918_vm9, %vm1919_vm15  ;;  %v1020_v15 = vld [vmem:[#allocation2 + $0x28] sm:$0xff] }
  0xe4   : > { %v2445_v7 = vpack.c.bf16 %v2381_v21, %v2381_v21  ;;  %v1916_v42 = vmul.f32 %v3014_v18, %v1915_v6  ;;  %v2873_v43 = vmul.f32 -1.442695, %v3802_v63  ;;  %v3818_v40 = vadd.f32 %v3465_v39, %v1066_v32  ;;  %vm2160_vm6 = vmor %vm2158_vm11, %vm2159_vm0 }
  0xe5   : > { %v3018_v46 = vpop.eup %3017  ;;  %v2156_v50 = vmul.f32 %v3016_v25, %v2155_v35  ;;  %v1460_v12 = vor.u32 1.1754944e-38, %v1459_v17  ;;  %v1697_v51 = vand.u32 2147483647, %v3799_v62  ;;  %v3822_v47 = vadd.f32 %v3465_v39, %v1019_v24  ;;  %vm5108_vm11 = vmmov %vm5104_vm3  ;;  %v1036_v30 = vld [vmem:[#allocation2 + $0xa8] sm:$0xff] }
  0xe6   : > { %2510 = vst.msk [vmem:[%s3567_s27 + $0x48] sm:$0xf] %vm5104_vm3, %v2445_v7  ;;  %v1917_v52 = vadd.f32 %v3014_v18, %v1916_v42  ;;  %v1449_v33 = vmul.f32 %v3018_v46, %v3782_v10  ;;  %vm3827_vm4 = vcmp.eq.f32.partialorder %v1457_v34, 8.507059e+37  ;;  %v1699_v57 = vand.u32 2147483648, %v3799_v62  ;;  %vm5110_vm15 = vmmov %vm5104_vm3 }
  0xe7   : > { %3021 = vpow2.f32 %v2873_v43  ;;  %v2157_v36 = vadd.f32 %v3016_v25, %v2156_v50  ;;  %v2889_v45 = vmul.f32 -1.442695, %v3818_v40  ;;  %v2842_v59 = vmul.f32 -1.442695, %v3822_v47 }
  0xe8   : > { %v3838_v56 = vadd.f32 %v3465_v39, %v1035_v53  ;;  %v3020_v61 = vpop.eup %3019  ;;  %v1921_v14 = vsel %vm1920_vm5, %v3014_v18, %v1917_v52  ;;  %v1450_v19 = vsub.f32 1.0, %v1449_v33  ;;  %vm1454_vm8 = vweird.f32 %v3018_v46 }
  0xe9   : > { %v3844_v55 = vadd.f32 %v3465_v39, %v1051_v48  ;;  %v1926_v5 = vsel %vm3795_vm2, %v1925_v60, %v1921_v14  ;;  %v2161_v0 = vsel %vm2160_vm6, %v3016_v25, %v2157_v36  ;;  %v1689_v1 = vmul.f32 %v3020_v61, %v3799_v62  ;;  %vm1455_vm9 = vmor %vm1453_vm1, %vm1454_vm8 }
  0xea   : > { %v3850_v44 = vadd.f32 %v3465_v39, %v1067_v58  ;;  %v2397_v41 = vmul.f32 %v1926_v5, %v3574_v3  ;;  %v2166_v27 = vsel %vm3807_vm14, %v2165_v38, %v2161_v0  ;;  %v1451_v2 = vmul.f32 %v3018_v46, %v1450_v19  ;;  %vm5109_vm14 = vmmov %vm5104_vm3 }
  0xeb   : > { %3023 = vpow2.f32 %v2889_v45  ;;  %v2413_v4 = vmul.f32 %v2166_v27, %v3584_v8  ;;  %v1690_v9 = vsub.f32 1.0, %v1689_v1  ;;  %v2858_v37 = vmul.f32 -1.442695, %v3838_v56 }
  0xec   : > { %3025 = vpow2.f32 %v2842_v59  ;;  %v2461_v49 = vpack.c.bf16 %v2397_v41, %v2397_v41  ;;  %v1452_v13 = vadd.f32 %v3018_v46, %v1451_v2  ;;  %vm1694_vm7 = vweird.f32 %v3020_v61 }
  0xed   : > { %v3022_v11 = vpop.eup %3021  ;;  %v2874_v3 = vmul.f32 -1.442695, %v3844_v55  ;;  %v2477_v18 = vpack.c.bf16 %v2413_v4, %v2413_v4  ;;  %v1691_v60 = vmul.f32 %v3020_v61, %v1690_v9  ;;  %3027 = vpow2.f32 %v2858_v37 }
  0xee   : > { %v3861_v23 = vadd.f32 1.0, %v3022_v11  ;;  %2526 = vst.msk [vmem:[%s3567_s27 + $0x88] sm:$0xf] %vm5107_vm10, %v2461_v49  ;;  %v1456_v8 = vsel %vm1455_vm9, %v3018_v46, %v1452_v13  ;;  %v2890_v25 = vmul.f32 -1.442695, %v3850_v44  ;;  %v3867_v16 = vadd.f32 %v3465_v39, %v1020_v15  ;;  %v3931_v49 = vpop.f32.mrf.mxu3 }
  0xef   : > { %3029 = vpow2.f32 %v2874_v3  ;;  %2542 = vst.msk [vmem:[%s3567_s27 + $0xc8] sm:$0xf] %vm5108_vm11, %v2477_v18  ;;  %v1461_v29 = vsel %vm3827_vm4, %v1460_v12, %v1456_v8  ;;  %v1692_v10 = vadd.f32 %v3020_v61, %v1691_v60  ;;  %vm1693_vm12 = vweird.f32 %v3799_v62 }
  0xf0   : > { %3031 = vrcp.f32 %v3861_v23  ;;  %v2366_v26 = vmul.f32 %v1461_v29, %v3601_v20  ;;  %vm1695_vm13 = vmor %vm1693_vm12, %vm1694_vm7  ;;  %v1700_v28 = vor.u32 1.1754944e-38, %v1699_v57  ;;  %vm1698_vm2 = vcmp.eq.f32.partialorder %v1697_v51, 8.507059e+37 }
  0xf1   : > { %v3024_v31 = vpop.eup %3023  ;;  %v1696_v32 = vsel %vm1695_vm13, %v3020_v61, %v1692_v10  ;;  %v2843_v6 = vmul.f32 -1.442695, %v3867_v16  ;;  %3033 = vpow2.f32 %v2890_v25  ;;  %v1937_v20 = vand.u32 2147483647, %v3861_v23 }
  0xf2   : > { %v3026_v17 = vpop.eup %3025  ;;  %v3877_v21 = vadd.f32 1.0, %v3024_v31  ;;  %v2430_v34 = vpack.c.bf16 %v2366_v26, %v2366_v26  ;;  %v1701_v24 = vsel %vm1698_vm2, %v1700_v28, %v1696_v32  ;;  %v3884_v38 = vadd.f32 %v3465_v39, %v1036_v30  ;;  %v3946_v30 = vpop.f32.mrf.mxu0 }
  0xf3   : > { %v3028_v62 = vpop.eup %3027  ;;  %v2382_v35 = vmul.f32 %v1701_v24, %v3726_v22  ;;  %v1939_v42 = vand.u32 2147483648, %v3861_v23  ;;  %v3889_v43 = vadd.f32 1.0, %v3026_v17  ;;  %vm1933_vm0 = vweird.f32 %v3861_v23 }
  0xf4   : > { %3035 = vrcp.f32 %v3877_v21  ;;  %2495 = vst.msk [vmem:[%s3567_s27 + $0xc] sm:$0xf] %vm5109_vm14, %v2430_v34  ;;  %v3891_v53 = vadd.f32 1.0, %v3028_v62  ;;  %v2177_v51 = vand.u32 2147483647, %v3877_v21  ;;  %v2179_v39 = vand.u32 2147483648, %v3877_v21  ;;  %v3952_v34 = vpop.f32.mrf.mxu1 }
  0xf5   : > { %v3030_v7 = vpop.eup %3029  ;;  %v2446_v50 = vpack.c.bf16 %v2382_v35, %v2382_v35  ;;  %3037 = vpow2.f32 %v2843_v6  ;;  %v2859_v48 = vmul.f32 -1.442695, %v3884_v38  ;;  %vm3904_vm1 = vcmp.eq.f32.partialorder %v1937_v20, 8.507059e+37 }
  0xf6   : > { %v3032_v46 = vpop.eup %3031  ;;  %v3893_v22 = vadd.f32 1.0, %v3030_v7  ;;  %3039 = vrcp.f32 %v3889_v43  ;;  %v1940_v57 = vor.u32 1.1754944e-38, %v1939_v42  ;;  %vm2173_vm3 = vweird.f32 %v3877_v21 }
  0xf7   : > { %v1929_v12 = vmul.f32 %v3032_v46, %v3861_v23  ;;  %2511 = vst.msk [vmem:[%s3567_s27 + $0x4c] sm:$0xf] %vm5110_vm15, %v2446_v50  ;;  %3041 = vrcp.f32 %v3891_v53  ;;  %v3034_v52 = vpop.eup %3033  ;;  %v1472_v36 = vand.u32 2147483647, %v3889_v43  ;;  %v1474_v45 = vand.u32 2147483648, %v3889_v43 }
  0xf8   : > { %3043 = vrcp.f32 %v3893_v22  ;;  %vm1934_vm4 = vweird.f32 %v3032_v46  ;;  %vm3913_vm5 = vcmp.eq.f32.partialorder %v2177_v51, 8.507059e+37  ;;  %v1712_v19 = vand.u32 2147483647, %v3891_v53 }
  0xf9   : > { %v1930_v33 = vsub.f32 1.0, %v1929_v12  ;;  %v2180_v0 = vor.u32 1.1754944e-38, %v2179_v39  ;;  %vm1468_vm6 = vweird.f32 %v3889_v43  ;;  %v3919_v1 = vadd.f32 1.0, %v3034_v52  ;;  %vm1935_vm7 = vmor %vm1933_vm0, %vm1934_vm4 }
  0xfa   : > { %v3036_v58 = vpop.eup %3035  ;;  %3045 = vpow2.f32 %v2859_v48  ;;  %vm1708_vm8 = vweird.f32 %v3891_v53  ;;  %v1714_v4 = vand.u32 2147483648, %v3891_v53  ;;  %vm3927_vm10 = vcmp.eq.f32.partialorder %v1472_v36, 8.507059e+37 }
  0xfb   : > { %v1931_v59 = vmul.f32 %v3032_v46, %v1930_v33  ;;  %v2169_v61 = vmul.f32 %v3036_v58, %v3877_v21  ;;  %v3038_v5 = vpop.eup %3037  ;;  %vm2174_vm9 = vweird.f32 %v3036_v58  ;;  %v1475_v11 = vor.u32 1.1754944e-38, %v1474_v45 }
  0xfc   : > { %v3040_v41 = vpop.eup %3039  ;;  %vm3934_vm11 = vcmp.eq.f32.partialorder %v1712_v19, 8.507059e+37  ;;  %vm1948_vm12 = vweird.f32 %v3893_v22  ;;  %3047 = vrcp.f32 %v3919_v1  ;;  %v3942_v29 = vadd.f32 1.0, %v3038_v5  ;;  %vm2175_vm13 = vmor %vm2173_vm3, %vm2174_vm9 }
  0xfd   : > { %v1932_v27 = vadd.f32 %v3032_v46, %v1931_v59  ;;  %v2170_v2 = vsub.f32 1.0, %v2169_v61  ;;  %v3042_v9 = vpop.eup %3041  ;;  %v1464_v37 = vmul.f32 %v3040_v41, %v3889_v43  ;;  %vm1469_vm2 = vweird.f32 %v3040_v41  ;;  %v858_v59 = vpop.f32.mrf.mxu3 }
  0xfe   : > { %v1704_v18 = vmul.f32 %v3042_v9, %v3891_v53  ;;  %v3044_v23 = vpop.eup %3043  ;;  %vm1709_vm14 = vweird.f32 %v3042_v9  ;;  %v1954_v6 = vand.u32 2147483648, %v3893_v22  ;;  %v1952_v42 = vand.u32 2147483647, %v3893_v22 }
  0xff   : > { %v1936_v13 = vsel %vm1935_vm7, %v3032_v46, %v1932_v27  ;;  %v2171_v3 = vmul.f32 %v3036_v58, %v2170_v2  ;;  %v1465_v25 = vsub.f32 1.0, %v1464_v37  ;;  %v1944_v28 = vmul.f32 %v3044_v23, %v3893_v22  ;;  %vm1710_vm3 = vmor %vm1708_vm8, %vm1709_vm14  ;;  %v1052_v22 = vld [vmem:[#allocation2 + $0x128] sm:$0xff] }
 0x100   : > { %v1941_v8 = vsel %vm3904_vm1, %v1940_v57, %v1936_v13  ;;  %v1705_v26 = vsub.f32 1.0, %v1704_v18  ;;  %v3046_v17 = vpop.eup %3045  ;;  %vm1949_vm15 = vweird.f32 %v3044_v23  ;;  %vm5119_vm0 = vcmask 519168   ;;  %vm1470_vm1 = vmor %vm1468_vm6, %vm1469_vm2  ;;  %v818_v57 = vpop.f32.mrf.mxu2  ;;  %v346_v13 = vld [vmem:[#allocation2 + $0xb0] sm:$0xff] }
 0x101   : > { %v2398_v10 = vmul.f32 %v1941_v8, %v3802_v63  ;;  %v2172_v31 = vadd.f32 %v3036_v58, %v2171_v3  ;;  %v1466_v32 = vmul.f32 %v3040_v41, %v1465_v25  ;;  %v1945_v35 = vsub.f32 1.0, %v1944_v28  ;;  %vm1950_vm4 = vmor %vm1948_vm12, %vm1949_vm15  ;;  %v780_v3 = vpop.f32.mrf.mxu1 }
 0x102   : > { %v1706_v62 = vmul.f32 %v3042_v9, %v1705_v26  ;;  %3049 = vrcp.f32 %v3942_v29  ;;  %v3963_v12 = vpop.eup %3047  ;;  %v1715_v39 = vor.u32 1.1754944e-38, %v1714_v4  ;;  %v1955_v48 = vor.u32 1.1754944e-38, %v1954_v6  ;;  %vm5121_vm7 = vmmov %vm5119_vm0 }
 0x103   : > { %v2462_v63 = vpack.c.bf16 %v2398_v10, %v2398_v10  ;;  %v2176_v24 = vsel %vm2175_vm13, %v3036_v58, %v2172_v31  ;;  %v1467_v7 = vadd.f32 %v3040_v41, %v1466_v32  ;;  %v1946_v50 = vmul.f32 %v3044_v23, %v1945_v35  ;;  %v378_v10 = vld [vmem:[#allocation2 + $0x1b0] sm:$0xff]  ;;  %v331_v32 = vld [vmem:[#allocation2 + $0x38] sm:$0xff]  ;;  %vm5125_vm12 = vmmov %vm5119_vm0 }
 0x104   : > { %v2181_v20 = vsel %vm3913_vm5, %v2180_v0, %v2176_v24  ;;  %v1707_v46 = vadd.f32 %v3042_v9, %v1706_v62  ;;  %v3968_v52 = vadd.f32 1.0, %v3046_v17  ;;  %v2184_v53 = vmul.f32 %v3963_v12, %v3919_v1  ;;  %vm5120_vm5 = vmmov %vm5119_vm0 }
 0x105   : > { %2527 = vst.msk [vmem:[%s3567_s27 + $0x8c] sm:$0xf] %vm5119_vm0, %v2462_v63  ;;  %v2414_v21 = vmul.f32 %v2181_v20, %v3818_v40  ;;  %v1471_v51 = vsel %vm1470_vm1, %v3040_v41, %v1467_v7  ;;  %v1947_v54 = vadd.f32 %v3044_v23, %v1946_v50  ;;  %v2192_v45 = vand.u32 2147483647, %v3919_v1  ;;  %v377_v41 = vld [vmem:[#allocation2 + $0x1a8] sm:$0xff] }
 0x106   : > { %v1476_v43 = vsel %vm3927_vm10, %v1475_v11, %v1471_v51  ;;  %v1711_v33 = vsel %vm1710_vm3, %v3042_v9, %v1707_v46  ;;  %vm1953_vm6 = vcmp.eq.f32.partialorder %v1952_v42, 8.507059e+37  ;;  %v2185_v0 = vsub.f32 1.0, %v2184_v53  ;;  %v740_v9 = vpop.f32.mrf.mxu0  ;;  %v379_v51 = vld [vmem:[#allocation2 + $0x1b8] sm:$0xff] }
 0x107   : > { %v2478_v40 = vpack.c.bf16 %v2414_v21, %v2414_v21  ;;  %v2367_v58 = vmul.f32 %v1476_v43, %v3822_v47  ;;  %v1716_v36 = vsel %vm3934_vm11, %v1715_v39, %v1711_v33  ;;  %v1951_v14 = vsel %vm1950_vm4, %v3044_v23, %v1947_v54  ;;  %vm5124_vm11 = vmmov %vm5119_vm0  ;;  %v4005_v23 = vld [vmem:[%s5063_s2] ss:$0 sm:$0xff]  ;;  %v363_v21 = vld [vmem:[#allocation2 + $0x138] sm:$0xff]  ;;  %v860_v39 = vpop.f32.mrf.mxu3 }
 0x108   : > { %v2383_v61 = vmul.f32 %v1716_v36, %v3838_v56  ;;  %v2194_v47 = vand.u32 2147483648, %v3919_v1  ;;  %v1956_v5 = vsel %vm1953_vm6, %v1955_v48, %v1951_v14  ;;  %3051 = vrcp.f32 %v3968_v52  ;;  %v3986_v27 = vpop.eup %3049  ;;  %v330_v56 = vld [vmem:[#allocation2 + $0x30] sm:$0xff]  ;;  %v820_v46 = vpop.f32.mrf.mxu2  ;;  %v348_v14 = vld [vmem:[#allocation2 + $0xc0] sm:$0xff] }
 0x109   : > { %2543 = vst.msk [vmem:[%s3567_s27 + $0xcc] sm:$0xf] %vm5120_vm5, %v2478_v40  ;;  %v2431_v19 = vpack.c.bf16 %v2367_v58, %v2367_v58  ;;  %v2399_v4 = vmul.f32 %v1956_v5, %v3844_v55  ;;  %vm2188_vm8 = vweird.f32 %v3919_v1  ;;  %v2186_v37 = vmul.f32 %v3963_v12, %v2185_v0  ;;  %v362_v55 = vld [vmem:[#allocation2 + $0x130] sm:$0xff]  ;;  %v347_v1 = vld [vmem:[#allocation2 + $0xb8] sm:$0xff] }
 0x10a   : > { %v2447_v2 = vpack.c.bf16 %v2383_v61, %v2383_v61  ;;  %vm2189_vm9 = vweird.f32 %v3963_v12  ;;  %vm3994_vm10 = vcmp.eq.f32.partialorder %v2192_v45, 8.507059e+37  ;;  %v1479_v11 = vmul.f32 %v3986_v27, %v3942_v29  ;;  %v332_v45 = vld [vmem:[#allocation2 + $0x40] sm:$0xff] }
 0x10b   : > { %2496 = vst.msk [vmem:[%s3567_s27 + $0x10] sm:$0xf] %vm5121_vm7, %v2431_v19  ;;  %v2463_v18 = vpack.c.bf16 %v2399_v4, %v2399_v4  ;;  %v2195_v60 = vor.u32 1.1754944e-38, %v2194_v47  ;;  %v4008_v8 = vadd.f32 %v4005_v23, %v1052_v22  ;;  %v936_v25 = vadd.f32 %v3931_v49, %v377_v41  ;;  %vm2190_vm13 = vmor %vm2188_vm8, %vm2189_vm9  ;;  %v783_v47 = vpop.f32.mrf.mxu1 }
 0x10c   : > { %2512 = vst.msk [vmem:[%s3567_s27 + $0x50] sm:$0xf] %vm5124_vm11, %v2447_v2  ;;  %v2187_v31 = vadd.f32 %v3963_v12, %v2186_v37  ;;  %v1480_v26 = vsub.f32 1.0, %v1479_v11  ;;  %v1487_v28 = vand.u32 2147483647, %v3942_v29  ;;  %v889_v17 = vadd.f32 %v3946_v30, %v330_v56  ;;  %vm5132_vm9 = vmmov %vm5124_vm11 }
 0x10d   : > { %2528 = vst.msk [vmem:[%s3567_s27 + $0x90] sm:$0xf] %vm5125_vm12, %v2463_v18  ;;  %v1489_v6 = vand.u32 2147483648, %v3942_v29  ;;  %v2875_v49 = vmul.f32 -1.442695, %v4008_v8  ;;  %v905_v63 = vadd.f32 %v3952_v34, %v346_v13  ;;  %v921_v24 = vadd.f32 %v818_v57, %v362_v55 }
 0x10e   : > { %v4023_v62 = vpop.eup %3051  ;;  %v2191_v35 = vsel %vm2190_vm13, %v3963_v12, %v2187_v31  ;;  %v1481_v30 = vmul.f32 %v3986_v27, %v1480_v26  ;;  %vm1484_vm2 = vweird.f32 %v3986_v27  ;;  %vm5126_vm14 = vcmask 523264   ;;  %v364_v26 = vld [vmem:[#allocation2 + $0x140] sm:$0xff] }
 0x10f   : > { %1001 = vst.msk [vmem:[#allocation2 + $0x1a8] sm:$0xff] %vm5126_vm14, %v936_v25  ;;  %v937_v20 = vadd.f32 %v858_v59, %v378_v10  ;;  %v2196_v7 = vsel %vm3994_vm10, %v2195_v60, %v2191_v35  ;;  %v1719_v42 = vmul.f32 %v4023_v62, %v3968_v52  ;;  %3053 = vpow2.f32 %v2875_v49  ;;  %vm5127_vm15 = vmmov %vm5126_vm14  ;;  %v743_v59 = vpop.f32.mrf.mxu0 }
 0x110   : > { %954 = vst.msk [vmem:[#allocation2 + $0x30] sm:$0xff] %vm5127_vm15, %v889_v17  ;;  %v890_v34 = vadd.f32 %v740_v9, %v331_v32  ;;  %v2415_v50 = vmul.f32 %v2196_v7, %v3850_v44  ;;  %v1482_v12 = vadd.f32 %v3986_v27, %v1481_v30  ;;  %vm1483_vm0 = vweird.f32 %v3942_v29  ;;  %vm5128_vm3 = vmmov %vm5126_vm14  ;;  %v863_v17 = vpop.f32.mrf.mxu3 }
 0x111   : > { %vm1488_vm1 = vcmp.eq.f32.partialorder %v1487_v28, 8.507059e+37  ;;  %970 = vst.msk [vmem:[#allocation2 + $0xb0] sm:$0xff] %vm5128_vm3, %v905_v63  ;;  %vm1485_vm4 = vmor %vm1483_vm0, %vm1484_vm2  ;;  %v1490_v48 = vor.u32 1.1754944e-38, %v1489_v6  ;;  %v1720_v40 = vsub.f32 1.0, %v1719_v42  ;;  %v1729_v43 = vand.u32 2147483648, %v3968_v52  ;;  %v380_v28 = vld [vmem:[#allocation2 + $0x1c0] sm:$0xff] }
 0x112   : > { %vm5129_vm5 = vmmov %vm5128_vm3  ;;  %v906_v44 = vadd.f32 %v780_v3, %v347_v1  ;;  %v2479_v33 = vpack.c.bf16 %v2415_v50, %v2415_v50  ;;  %v1486_v54 = vsel %vm1485_vm4, %v3986_v27, %v1482_v12  ;;  %v1727_v29 = vand.u32 2147483647, %v3968_v52  ;;  %v333_v42 = vld [vmem:[#allocation2 + $0x48] sm:$0xff] }
 0x113   : > { %986 = vst.msk [vmem:[#allocation2 + $0x130] sm:$0xff] %vm5129_vm5, %v921_v24  ;;  %vm5130_vm6 = vmmov %vm5128_vm3  ;;  %v922_v57 = vadd.f32 %v820_v46, %v363_v21  ;;  %v1491_v58 = vsel %vm1488_vm1, %v1490_v48, %v1486_v54  ;;  %v1721_v36 = vmul.f32 %v4023_v62, %v1720_v40  ;;  %vm1724_vm8 = vweird.f32 %v4023_v62 }
 0x114   : > { %1002 = vst.msk [vmem:[#allocation2 + $0x1b0] sm:$0xff] %vm5130_vm6, %v937_v20  ;;  %vm5131_vm7 = vmmov %vm5128_vm3  ;;  %v938_v53 = vadd.f32 %v860_v39, %v379_v51  ;;  %v2368_v61 = vmul.f32 %v1491_v58, %v3867_v16  ;;  %vm1723_vm10 = vweird.f32 %v3968_v52  ;;  %v1730_v0 = vor.u32 1.1754944e-38, %v1729_v43 }
 0x115   : > { %955 = vst.msk [vmem:[#allocation2 + $0x38] sm:$0xff] %vm5131_vm7, %v890_v34  ;;  %v3054_v19 = vpop.eup %3053  ;;  %v1722_v5 = vadd.f32 %v4023_v62, %v1721_v36  ;;  %vm5133_vm11 = vmmov %vm5128_vm3  ;;  %v891_v4 = vadd.f32 %v743_v59, %v332_v45  ;;  %vm1728_vm2 = vcmp.eq.f32.partialorder %v1727_v29, 8.507059e+37  ;;  %v907_v37 = vadd.f32 %v783_v47, %v348_v14 }
 0x116   : > { %2544 = vst.msk [vmem:[%s3567_s27 + $0xd0] sm:$0xf] %vm5132_vm9, %v2479_v33  ;;  %v1068_v22 = vld [vmem:[#allocation2 + $0x1a8] sm:$0xff]  ;;  %v2432_v41 = vpack.c.bf16 %v2368_v61, %v2368_v61  ;;  %vm1725_vm12 = vmor %vm1723_vm10, %vm1724_vm8  ;;  %v4056_v27 = vadd.f32 1.0, %v3054_v19  ;;  %v939_v20 = vadd.f32 %v863_v17, %v380_v28  ;;  %v785_v33 = vpop.f32.mrf.mxu1 }
 0x117   : > { %971 = vst.msk [vmem:[#allocation2 + $0xb8] sm:$0xff] %vm5133_vm11, %v906_v44  ;;  %v4059_v16 = vadd.f32 %v4005_v23, %v1068_v22  ;;  %v1021_v2 = vld [vmem:[#allocation2 + $0x30] sm:$0xff]  ;;  %vm5134_vm13 = vmmov %vm5128_vm3  ;;  %v1726_v52 = vsel %vm1725_vm12, %v4023_v62, %v1722_v5  ;;  %v745_v34 = vpop.f32.mrf.mxu0  ;;  %v349_v44 = vld [vmem:[#allocation2 + $0xc8] sm:$0xff] }
 0x118   : > { %987 = vst.msk [vmem:[#allocation2 + $0x138] sm:$0xff] %vm5134_vm13, %v922_v57  ;;  %v4064_v56 = vadd.f32 %v4005_v23, %v1021_v2  ;;  %v1037_v9 = vld [vmem:[#allocation2 + $0xb0] sm:$0xff]  ;;  %vm5135_vm14 = vmmov %vm5128_vm3  ;;  %v1731_v15 = vsel %vm1728_vm2, %v1730_v0, %v1726_v52  ;;  %3055 = vrcp.f32 %v4056_v27  ;;  %v892_v51 = vadd.f32 %v745_v34, %v333_v42 }
 0x119   : > { %1003 = vst.msk [vmem:[#allocation2 + $0x1b8] sm:$0xff] %vm5135_vm14, %v938_v53  ;;  %vm5136_vm15 = vmmov %vm5132_vm9  ;;  %v2384_v13 = vmul.f32 %v1731_v15, %v3884_v38  ;;  %v2891_v55 = vmul.f32 -1.442695, %v4059_v16  ;;  %v4074_v60 = vadd.f32 %v4005_v23, %v1037_v9  ;;  %v823_v38 = vpop.f32.mrf.mxu2  ;;  %v1967_v40 = vand.u32 2147483647, %v4056_v27 }
 0x11a   : > { %2497 = vst.msk [vmem:[%s3567_s27 + $0x14] sm:$0xf] %vm5136_vm15, %v2432_v41  ;;  %v1053_v11 = vld [vmem:[#allocation2 + $0x130] sm:$0xff]  ;;  %v2844_v3 = vmul.f32 -1.442695, %v4064_v56  ;;  %vm5137_vm0 = vmmov %vm5128_vm3  ;;  %v923_v30 = vadd.f32 %v823_v38, %v364_v26  ;;  %v1969_v43 = vand.u32 2147483648, %v4056_v27  ;;  %v908_v36 = vadd.f32 %v785_v33, %v349_v44 }
 0x11b   : > { %v1069_v18 = vld [vmem:[#allocation2 + $0x1b0] sm:$0xff]  ;;  %v4077_v25 = vadd.f32 %v4005_v23, %v1053_v11  ;;  %956 = vst.msk [vmem:[#allocation2 + $0x40] sm:$0xff] %vm5137_vm0, %v891_v4  ;;  %v2448_v32 = vpack.c.bf16 %v2384_v13, %v2384_v13  ;;  %3057 = vpow2.f32 %v2891_v55  ;;  %vm5138_vm1 = vmmov %vm5137_vm0  ;;  %v2860_v49 = vmul.f32 -1.442695, %v4074_v60 }
 0x11c   : > { %v4080_v10 = vadd.f32 %v4005_v23, %v1069_v18  ;;  %v1022_v31 = vld [vmem:[#allocation2 + $0x38] sm:$0xff]  ;;  %972 = vst.msk [vmem:[#allocation2 + $0xc0] sm:$0xff] %vm5138_vm1, %v907_v37  ;;  %3059 = vpow2.f32 %v2844_v3  ;;  %vm5139_vm3 = vmmov %vm5132_vm9  ;;  %vm1963_vm7 = vweird.f32 %v4056_v27  ;;  %vm1968_vm10 = vcmp.eq.f32.partialorder %v1967_v40, 8.507059e+37 }
 0x11d   : > { %v4084_v6 = vadd.f32 %v4005_v23, %v1022_v31  ;;  %v2876_v63 = vmul.f32 -1.442695, %v4077_v25  ;;  %2513 = vst.msk [vmem:[%s3567_s27 + $0x54] sm:$0xf] %vm5139_vm3, %v2448_v32  ;;  %3061 = vpow2.f32 %v2860_v49  ;;  %vm5140_vm4 = vmmov %vm5137_vm0  ;;  %v1970_v5 = vor.u32 1.1754944e-38, %v1969_v43 }
 0x11e   : > { %v2892_v24 = vmul.f32 -1.442695, %v4080_v10  ;;  %v1038_v62 = vld [vmem:[#allocation2 + $0xb8] sm:$0xff]  ;;  %v3056_v1 = vpop.eup %3055  ;;  %988 = vst.msk [vmem:[#allocation2 + $0x140] sm:$0xff] %vm5140_vm4, %v923_v30  ;;  %vm5141_vm5 = vmmov %vm5137_vm0 }
 0x11f   : > { %v1054_v35 = vld [vmem:[#allocation2 + $0x138] sm:$0xff]  ;;  %v4093_v7 = vadd.f32 %v4005_v23, %v1038_v62  ;;  %v1959_v21 = vmul.f32 %v3056_v1, %v4056_v27  ;;  %3063 = vpow2.f32 %v2876_v63  ;;  %v2845_v46 = vmul.f32 -1.442695, %v4084_v6  ;;  %1004 = vst.msk [vmem:[#allocation2 + $0x1c0] sm:$0xff] %vm5141_vm5, %v939_v20  ;;  %vm5142_vm8 = vmmov %vm5137_vm0 }
 0x120   : > { %v4098_v50 = vadd.f32 %v4005_v23, %v1054_v35  ;;  %v1070_v12 = vld [vmem:[#allocation2 + $0x1b8] sm:$0xff]  ;;  %3065 = vpow2.f32 %v2892_v24  ;;  %vm1964_vm6 = vweird.f32 %v3056_v1  ;;  %957 = vst.msk [vmem:[#allocation2 + $0x48] sm:$0xff] %vm5142_vm8, %v892_v51  ;;  %vm5143_vm9 = vmmov %vm5137_vm0 }
 0x121   : > { %v3058_v39 = vpop.eup %3057  ;;  %v1960_v48 = vsub.f32 1.0, %v1959_v21  ;;  %v2861_v57 = vmul.f32 -1.442695, %v4093_v7  ;;  %v4108_v58 = vadd.f32 %v4005_v23, %v1070_v12  ;;  %3067 = vpow2.f32 %v2845_v46  ;;  %973 = vst.msk [vmem:[#allocation2 + $0xc8] sm:$0xff] %vm5143_vm9, %v908_v36  ;;  %vm1965_vm11 = vmor %vm1963_vm7, %vm1964_vm6 }
 0x122   : > { %v3060_v54 = vpop.eup %3059  ;;  %v4104_v29 = vadd.f32 1.0, %v3058_v39  ;;  %v2877_v59 = vmul.f32 -1.442695, %v4098_v50  ;;  %v1023_v61 = vld [vmem:[#allocation2 + $0x40] sm:$0xff]  ;;  %vm5146_vm14 = vmmov %vm5139_vm3 }
 0x123   : > { %v1961_v53 = vmul.f32 %v3056_v1, %v1960_v48  ;;  %v4111_v45 = vadd.f32 1.0, %v3060_v54  ;;  %v3062_v14 = vpop.eup %3061  ;;  %v4122_v41 = vmul.f32 -1.442695, %v4108_v58  ;;  %v4125_v27 = vadd.f32 %v4005_v23, %v1023_v61  ;;  %v1039_v49 = vld [vmem:[#allocation2 + $0xc0] sm:$0xff] }
 0x124   : > { %3069 = vrcp.f32 %v4104_v29  ;;  %v4119_v22 = vadd.f32 1.0, %v3062_v14  ;;  %v2207_v37 = vand.u32 2147483647, %v4104_v29  ;;  %v2209_v15 = vand.u32 2147483648, %v4104_v29 }
 0x125   : > { %v3064_v47 = vpop.eup %3063  ;;  %v1962_v19 = vadd.f32 %v3056_v1, %v1961_v53  ;;  %3071 = vrcp.f32 %v4111_v45  ;;  %v1502_v55 = vand.u32 2147483647, %v4111_v45  ;;  %v1504_v3 = vand.u32 2147483648, %v4111_v45  ;;  %v1055_v39 = vld [vmem:[#allocation2 + $0x140] sm:$0xff] }
 0x126   : > { %v3066_v0 = vpop.eup %3065  ;;  %3073 = vpow2.f32 %v2861_v57  ;;  %v4127_v4 = vadd.f32 1.0, %v3064_v47  ;;  %vm2203_vm12 = vweird.f32 %v4104_v29  ;;  %vm1498_vm13 = vweird.f32 %v4111_v45 }
 0x127   : > { %v1966_v2 = vsel %vm1965_vm11, %v3056_v1, %v1962_v19  ;;  %v4129_v52 = vadd.f32 1.0, %v3066_v0  ;;  %3075 = vpow2.f32 %v2877_v59  ;;  %v3068_v11 = vpop.eup %3067  ;;  %v1742_v31 = vand.u32 2147483647, %v4119_v22 }
 0x128   : > { %v1971_v9 = vsel %vm1968_vm10, %v1970_v5, %v1966_v2  ;;  %3077 = vrcp.f32 %v4119_v22  ;;  %v1744_v28 = vand.u32 2147483648, %v4119_v22  ;;  %v1984_v17 = vand.u32 2147483648, %v4127_v4 }
 0x129   : > { %v2400_v13 = vmul.f32 %v1971_v9, %v4008_v8  ;;  %3079 = vrcp.f32 %v4127_v4  ;;  %vm4145_vm2 = vcmp.eq.f32.partialorder %v2207_v37, 8.507059e+37  ;;  %v2210_v63 = vor.u32 1.1754944e-38, %v2209_v15 }
 0x12a   : > { %v3070_v18 = vpop.eup %3069  ;;  %3081 = vrcp.f32 %v4129_v52  ;;  %v1982_v62 = vand.u32 2147483647, %v4127_v4  ;;  %vm4155_vm15 = vcmp.eq.f32.partialorder %v1502_v55, 8.507059e+37  ;;  %v1505_v1 = vor.u32 1.1754944e-38, %v1504_v3 }
 0x12b   : > { %v3072_v26 = vpop.eup %3071  ;;  %v2464_v38 = vpack.c.bf16 %v2400_v13, %v2400_v13  ;;  %v2199_v8 = vmul.f32 %v3070_v18, %v4104_v29  ;;  %vm1738_vm0 = vweird.f32 %v4119_v22  ;;  %vm2204_vm1 = vweird.f32 %v3070_v18 }
 0x12c   : > { %v3074_v32 = vpop.eup %3073  ;;  %v1494_v24 = vmul.f32 %v3072_v26, %v4111_v45  ;;  %vm1499_vm3 = vweird.f32 %v3072_v26  ;;  %vm1978_vm4 = vweird.f32 %v4127_v4  ;;  %v4161_v21 = vadd.f32 1.0, %v3068_v11  ;;  %vm2205_vm8 = vmor %vm2203_vm12, %vm2204_vm1 }
 0x12d   : > { %v4151_v35 = vpop.eup %3075  ;;  %2529 = vst.msk [vmem:[%s3567_s27 + $0x94] sm:$0xf] %vm5146_vm14, %v2464_v38  ;;  %v2200_v30 = vsub.f32 1.0, %v2199_v8  ;;  %vm4164_vm5 = vcmp.eq.f32.partialorder %v1742_v31, 8.507059e+37  ;;  %v1745_v48 = vor.u32 1.1754944e-38, %v1744_v28  ;;  %v1985_v40 = vor.u32 1.1754944e-38, %v1984_v17  ;;  %vm1500_vm9 = vmor %vm1498_vm13, %vm1499_vm3 }
 0x12e   : > { %v3078_v42 = vpop.eup %3077  ;;  %v1495_v34 = vsub.f32 1.0, %v1494_v24  ;;  %vm4169_vm6 = vcmp.eq.f32.partialorder %v1982_v62, 8.507059e+37  ;;  %v2222_v57 = vand.u32 2147483647, %v4129_v52  ;;  %v2224_v36 = vand.u32 2147483648, %v4129_v52 }
 0x12f   : > { %v3080_v46 = vpop.eup %3079  ;;  %v2201_v12 = vmul.f32 %v3070_v18, %v2200_v30  ;;  %v1734_v51 = vmul.f32 %v3078_v42, %v4119_v22  ;;  %v4176_v14 = vadd.f32 1.0, %v3074_v32  ;;  %vm1739_vm7 = vweird.f32 %v3078_v42 }
 0x130   : > { %v3082_v43 = vpop.eup %3081  ;;  %v1496_v44 = vmul.f32 %v3072_v26, %v1495_v34  ;;  %v1974_v33 = vmul.f32 %v3080_v46, %v4127_v4  ;;  %3083 = vrcp.f32 %v4161_v21  ;;  %vm1979_vm10 = vweird.f32 %v3080_v46  ;;  %vm1740_vm12 = vmor %vm1738_vm0, %vm1739_vm7 }
 0x131   : > { %v2202_v53 = vadd.f32 %v3070_v18, %v2201_v12  ;;  %v1735_v59 = vsub.f32 1.0, %v1734_v51  ;;  %v2214_v61 = vmul.f32 %v3082_v43, %v4129_v52  ;;  %vm2219_vm11 = vweird.f32 %v3082_v43  ;;  %vm1980_vm14 = vmor %vm1978_vm4, %vm1979_vm10 }
 0x132   : > { %v1497_v47 = vadd.f32 %v3072_v26, %v1496_v44  ;;  %v1975_v19 = vsub.f32 1.0, %v1974_v33  ;;  %vm2218_vm13 = vweird.f32 %v4129_v52  ;;  %3085 = vrcp.f32 %v4176_v14 }
 0x133   : > { %v2206_v5 = vsel %vm2205_vm8, %v3070_v18, %v2202_v53  ;;  %v1736_v0 = vmul.f32 %v3078_v42, %v1735_v59  ;;  %v2215_v2 = vsub.f32 1.0, %v2214_v61  ;;  %v2225_v8 = vor.u32 1.1754944e-38, %v2224_v36 }
 0x134   : > { %v2211_v9 = vsel %vm4145_vm2, %v2210_v63, %v2206_v5  ;;  %v1501_v37 = vsel %vm1500_vm9, %v3072_v26, %v1497_v47  ;;  %v1976_v15 = vmul.f32 %v3080_v46, %v1975_v19  ;;  %vm4195_vm2 = vcmp.eq.f32.partialorder %v2222_v57, 8.507059e+37  ;;  %v365_v47 = vld [vmem:[#allocation2 + $0x148] sm:$0xff]  ;;  %v825_v19 = vpop.f32.mrf.mxu2 }
 0x135   : > { %v2416_v29 = vmul.f32 %v2211_v9, %v4059_v16  ;;  %v1506_v11 = vsel %vm4155_vm15, %v1505_v1, %v1501_v37  ;;  %v1737_v13 = vadd.f32 %v3078_v42, %v1736_v0  ;;  %v2216_v55 = vmul.f32 %v3082_v43, %v2215_v2  ;;  %vm2220_vm15 = vmor %vm2218_vm13, %vm2219_vm11 }
 0x136   : > { %v2369_v3 = vmul.f32 %v1506_v11, %v4064_v56  ;;  %v1977_v45 = vadd.f32 %v3080_v46, %v1976_v15  ;;  %v3084_v22 = vpop.eup %3083  ;;  %vm5155_vm0 = vcmask 519168   ;;  %v1517_v62 = vand.u32 2147483647, %v4161_v21 }
 0x137   : > { %v2480_v16 = vpack.c.bf16 %v2416_v29, %v2416_v29  ;;  %v1741_v31 = vsel %vm1740_vm12, %v3078_v42, %v1737_v13  ;;  %v2217_v56 = vadd.f32 %v3082_v43, %v2216_v55  ;;  %v1509_v32 = vmul.f32 %v3084_v22, %v4161_v21  ;;  %vm5156_vm1 = vmmov %vm5155_vm0 }
 0x138   : > { %v2433_v26 = vpack.c.bf16 %v2369_v3, %v2369_v3  ;;  %v1746_v38 = vsel %vm4164_vm5, %v1745_v48, %v1741_v31  ;;  %v1981_v52 = vsel %vm1980_vm14, %v3080_v46, %v1977_v45  ;;  %v1519_v1 = vand.u32 2147483648, %v4161_v21  ;;  %v3086_v46 = vpop.eup %3085  ;;  %vm5157_vm3 = vmmov %vm5155_vm0  ;;  %v1071_v48 = vld [vmem:[#allocation2 + $0x1c0] sm:$0xff] }
 0x139   : > { %2545 = vst.msk [vmem:[%s3567_s27 + $0xd4] sm:$0xf] %vm5155_vm0, %v2480_v16  ;;  %v2385_v28 = vmul.f32 %v1746_v38, %v4074_v60  ;;  %v1986_v4 = vsel %vm4169_vm6, %v1985_v40, %v1981_v52  ;;  %v2221_v17 = vsel %vm2220_vm15, %v3082_v43, %v2217_v56  ;;  %v1510_v20 = vsub.f32 1.0, %v1509_v32  ;;  %vm5158_vm5 = vmmov %vm5155_vm0  ;;  %v1024_v40 = vld [vmem:[#allocation2 + $0x48] sm:$0xff]  ;;  %v865_v32 = vpop.f32.mrf.mxu3 }
 0x13a   : > { %2498 = vst.msk [vmem:[%s3567_s27 + $0x18] sm:$0xf] %vm5156_vm1, %v2433_v26  ;;  %v2401_v63 = vmul.f32 %v1986_v4, %v4077_v25  ;;  %v2226_v24 = vsel %vm4195_vm2, %v2225_v8, %v2221_v17  ;;  %v4221_v34 = vadd.f32 1.0, %v4151_v35  ;;  %3087 = vpow2.f32 %v4122_v41  ;;  %vm5161_vm7 = vmmov %vm5155_vm0  ;;  %v1040_v52 = vld [vmem:[#allocation2 + $0xc8] sm:$0xff] }
 0x13b   : > { %v2449_v30 = vpack.c.bf16 %v2385_v28, %v2385_v28  ;;  %v2417_v60 = vmul.f32 %v2226_v24, %v4080_v10  ;;  %v4225_v25 = vadd.f32 %v4005_v23, %v1039_v49  ;;  %v1511_v51 = vmul.f32 %v3084_v22, %v1510_v20  ;;  %vm5163_vm15 = vmmov %vm5155_vm0  ;;  %v381_v17 = vld [vmem:[#allocation2 + $0x1c8] sm:$0xff] }
 0x13c   : > { %v2465_v42 = vpack.c.bf16 %v2401_v63, %v2401_v63  ;;  %vm1514_vm4 = vweird.f32 %v3084_v22  ;;  %v2846_v10 = vmul.f32 -1.442695, %v4125_v27  ;;  %vm1513_vm6 = vweird.f32 %v4161_v21 }
 0x13d   : > { %2514 = vst.msk [vmem:[%s3567_s27 + $0x58] sm:$0xf] %vm5157_vm3, %v2449_v30  ;;  %v2481_v12 = vpack.c.bf16 %v2417_v60, %v2417_v60  ;;  %vm4233_vm8 = vcmp.eq.f32.partialorder %v1517_v62, 8.507059e+37  ;;  %v1749_v35 = vmul.f32 %v3086_v46, %v4176_v14  ;;  %3089 = vrcp.f32 %v4221_v34  ;;  %vm1515_vm9 = vmor %vm1513_vm6, %vm1514_vm4 }
 0x13e   : > { %2530 = vst.msk [vmem:[%s3567_s27 + $0x98] sm:$0xf] %vm5158_vm5, %v2465_v42  ;;  %v1512_v43 = vadd.f32 %v3084_v22, %v1511_v51  ;;  %v1520_v44 = vor.u32 1.1754944e-38, %v1519_v1  ;;  %v1757_v33 = vand.u32 2147483647, %v4176_v14  ;;  %3091 = vpow2.f32 %v2846_v10 }
 0x13f   : > { %2546 = vst.msk [vmem:[%s3567_s27 + $0xd8] sm:$0xf] %vm5161_vm7, %v2481_v12  ;;  %v1750_v54 = vsub.f32 1.0, %v1749_v35  ;;  %v2862_v21 = vmul.f32 -1.442695, %v4225_v25  ;;  %v4245_v57 = vadd.f32 %v4005_v23, %v1055_v39  ;;  %v4248_v36 = vadd.f32 %v4005_v23, %v1071_v48 }
 0x140   : > { %v1516_v53 = vsel %vm1515_vm9, %v3084_v22, %v1512_v43  ;;  %vm1754_vm10 = vweird.f32 %v3086_v46  ;;  %v1759_v59 = vand.u32 2147483648, %v4176_v14  ;;  %v4252_v61 = vadd.f32 %v4005_v23, %v1024_v40  ;;  %v3088_v5 = vpop.eup %3087 }
 0x141   : > { %v1521_v0 = vsel %vm4233_vm8, %v1520_v44, %v1516_v53  ;;  %v1751_v2 = vmul.f32 %v3086_v46, %v1750_v54  ;;  %3093 = vpow2.f32 %v2862_v21  ;;  %v2878_v9 = vmul.f32 -1.442695, %v4245_v57 }
 0x142   : > { %v2370_v37 = vmul.f32 %v1521_v0, %v4084_v6  ;;  %vm1753_vm11 = vweird.f32 %v4176_v14  ;;  %v1997_v15 = vand.u32 2147483647, %v4221_v34  ;;  %v4260_v29 = vadd.f32 1.0, %v3088_v5 }
 0x143   : > { %v3090_v11 = vpop.eup %3089  ;;  %v1752_v13 = vadd.f32 %v3086_v46, %v1751_v2  ;;  %3095 = vpow2.f32 %v2878_v9  ;;  %v2894_v55 = vmul.f32 -1.442695, %v4248_v36  ;;  %v924_v3 = vadd.f32 %v825_v19, %v365_v47  ;;  %vm1755_vm12 = vmor %vm1753_vm11, %vm1754_vm10 }
 0x144   : > { %v3092_v45 = vpop.eup %3091  ;;  %v2434_v18 = vpack.c.bf16 %v2370_v37, %v2370_v37  ;;  %v1760_v16 = vor.u32 1.1754944e-38, %v1759_v59  ;;  %v1989_v6 = vmul.f32 %v3090_v11, %v4221_v34  ;;  %3097 = vrcp.f32 %v4260_v29 }
 0x145   : > { %v1756_v14 = vsel %vm1755_vm12, %v3086_v46, %v1752_v13  ;;  %vm1758_vm13 = vcmp.eq.f32.partialorder %v1757_v33, 8.507059e+37  ;;  %vm1993_vm2 = vweird.f32 %v4221_v34  ;;  %v2847_v31 = vmul.f32 -1.442695, %v4252_v61  ;;  %vm5171_vm12 = vmmov %vm5157_vm3 }
 0x146   : > { %vm5162_vm14 = vcmask 523264   ;;  %2499 = vst.msk [vmem:[%s3567_s27 + $0x1c] sm:$0xf] %vm5163_vm15, %v2434_v18  ;;  %v1761_v56 = vsel %vm1758_vm13, %v1760_v16, %v1756_v14  ;;  %v1990_v22 = vsub.f32 1.0, %v1989_v6  ;;  %v1999_v26 = vand.u32 2147483648, %v4221_v34  ;;  %v4336_v18 = vpop.f32.mrf.mxu0 }
 0x147   : > { %989 = vst.msk [vmem:[#allocation2 + $0x148] sm:$0xff] %vm5162_vm14, %v924_v3  ;;  %v4272_v38 = vadd.f32 1.0, %v3092_v45  ;;  %v3094_v8 = vpop.eup %3093  ;;  %v2386_v28 = vmul.f32 %v1761_v56, %v4093_v7  ;;  %vm1994_vm0 = vweird.f32 %v3090_v11  ;;  %vm4275_vm1 = vcmp.eq.f32.partialorder %v1997_v15, 8.507059e+37  ;;  %vm5168_vm8 = vmmov %vm5162_vm14 }
 0x148   : > { %3099 = vpow2.f32 %v2894_v55  ;;  %v1991_v49 = vmul.f32 %v3090_v11, %v1990_v22  ;;  %v2237_v63 = vand.u32 2147483647, %v4260_v29  ;;  %v2239_v24 = vand.u32 2147483648, %v4260_v29  ;;  %vm1995_vm4 = vmor %vm1993_vm2, %vm1994_vm0 }
 0x149   : > { %3101 = vrcp.f32 %v4272_v38  ;;  %v3096_v62 = vpop.eup %3095  ;;  %v2450_v30 = vpack.c.bf16 %v2386_v28, %v2386_v28  ;;  %v4282_v60 = vadd.f32 1.0, %v3094_v8  ;;  %v4285_v7 = vadd.f32 %v4005_v23, %v1040_v52 }
 0x14a   : > { %3103 = vpow2.f32 %v2847_v31  ;;  %v3098_v20 = vpop.eup %3097  ;;  %v1992_v1 = vadd.f32 %v3090_v11, %v1991_v49  ;;  %v2000_v42 = vor.u32 1.1754944e-38, %v1999_v26  ;;  %v4287_v46 = vadd.f32 1.0, %v3096_v62  ;;  %v4338_v31 = vpop.f32.mrf.mxu1 }
 0x14b   : > { %v940_v12 = vadd.f32 %v865_v32, %v381_v17  ;;  %2515 = vst.msk [vmem:[%s3567_s27 + $0x5c] sm:$0xf] %vm5157_vm3, %v2450_v30  ;;  %v2229_v51 = vmul.f32 %v3098_v20, %v4260_v29  ;;  %v1532_v10 = vand.u32 2147483647, %v4272_v38  ;;  %v1534_v39 = vand.u32 2147483648, %v4272_v38 }
 0x14c   : > { %3105 = vrcp.f32 %v4282_v60  ;;  %v1996_v48 = vsel %vm1995_vm4, %v3090_v11, %v1992_v1  ;;  %vm2233_vm5 = vweird.f32 %v4260_v29  ;;  %vm4299_vm6 = vcmp.eq.f32.partialorder %v2237_v63, 8.507059e+37 }
 0x14d   : > { %v2240_v35 = vor.u32 1.1754944e-38, %v2239_v24  ;;  %1005 = vst.msk [vmem:[#allocation2 + $0x1c8] sm:$0xff] %vm5168_vm8, %v940_v12  ;;  %v2001_v40 = vsel %vm4275_vm1, %v2000_v42, %v1996_v48  ;;  %v2230_v43 = vsub.f32 1.0, %v2229_v51  ;;  %3107 = vrcp.f32 %v4287_v46  ;;  %v828_v48 = vpop.f32.mrf.mxu2 }
 0x14e   : > { %v3100_v34 = vpop.eup %3099  ;;  %v2863_v44 = vmul.f32 -1.442695, %v4285_v7  ;;  %v2402_v54 = vmul.f32 %v2001_v40, %v4098_v50  ;;  %vm2234_vm7 = vweird.f32 %v3098_v20  ;;  %vm1528_vm9 = vweird.f32 %v4272_v38 }
 0x14f   : > { %v3102_v33 = vpop.eup %3101  ;;  %v1772_v21 = vand.u32 2147483647, %v4282_v60  ;;  %v2231_v59 = vmul.f32 %v3098_v20, %v2230_v43  ;;  %vm4312_vm10 = vcmp.eq.f32.partialorder %v1532_v10, 8.507059e+37  ;;  %v1535_v5 = vor.u32 1.1754944e-38, %v1534_v39  ;;  %vm2235_vm13 = vmor %vm2233_vm5, %vm2234_vm7 }
 0x150   : > { %v3104_v53 = vpop.eup %3103  ;;  %v1524_v47 = vmul.f32 %v3102_v33, %v4272_v38  ;;  %v1774_v0 = vand.u32 2147483648, %v4282_v60  ;;  %v2466_v2 = vpack.c.bf16 %v2402_v54, %v2402_v54  ;;  %vm1768_vm11 = vweird.f32 %v4282_v60 }
 0x151   : > { %v2012_v50 = vand.u32 2147483647, %v4287_v46  ;;  %v4319_v9 = vadd.f32 1.0, %v3100_v34  ;;  %v2232_v15 = vadd.f32 %v3098_v20, %v2231_v59  ;;  %v2014_v13 = vand.u32 2147483648, %v4287_v46 }
 0x152   : > { %v3106_v37 = vpop.eup %3105  ;;  %v1525_v11 = vsub.f32 1.0, %v1524_v47  ;;  %3109 = vpow2.f32 %v2863_v44  ;;  %2531 = vst.msk [vmem:[%s3567_s27 + $0x9c] sm:$0xf] %vm5171_vm12, %v2466_v2  ;;  %vm4328_vm2 = vcmp.eq.f32.partialorder %v1772_v21, 8.507059e+37  ;;  %vm2008_vm14 = vweird.f32 %v4287_v46  ;;  %v868_v44 = vpop.f32.mrf.mxu3  ;;  %v350_v2 = vld [vmem:[#allocation2 + $0xd0] sm:$0xff] }
 0x153   : > { %v1764_v55 = vmul.f32 %v3106_v37, %v4282_v60  ;;  %3111 = vrcp.f32 %v4319_v9  ;;  %v4334_v45 = vadd.f32 1.0, %v3104_v53  ;;  %v3108_v16 = vpop.eup %3107  ;;  %v2236_v6 = vsel %vm2235_vm13, %v3098_v20, %v2232_v15  ;;  %v1056_v53 = vld [vmem:[#allocation2 + $0x148] sm:$0xff]  ;;  %v750_v47 = vpop.f32.mrf.mxu0 }
 0x154   : > { %v1526_v14 = vmul.f32 %v3102_v33, %v1525_v11  ;;  %vm1529_vm15 = vweird.f32 %v3102_v33  ;;  %v1775_v29 = vor.u32 1.1754944e-38, %v1774_v0  ;;  %v2241_v56 = vsel %vm4299_vm6, %v2240_v35, %v2236_v6  ;;  %vm5176_vm6 = vmmov %vm5171_vm12  ;;  %v1072_v59 = vld [vmem:[#allocation2 + $0x1c8] sm:$0xff]  ;;  %v334_v0 = vld [vmem:[#allocation2 + $0x50] sm:$0xff] }
 0x155   : > { %v1765_v22 = vsub.f32 1.0, %v1764_v55  ;;  %v2004_v26 = vmul.f32 %v3108_v16, %v4287_v46  ;;  %vm4343_vm0 = vcmp.eq.f32.partialorder %v2012_v50, 8.507059e+37  ;;  %v2418_v8 = vmul.f32 %v2241_v56, %v4108_v58  ;;  %vm1530_vm1 = vmor %vm1528_vm9, %vm1529_vm15  ;;  %v790_v50 = vpop.f32.mrf.mxu1  ;;  %v366_v55 = vld [vmem:[#allocation2 + $0x150] sm:$0xff] }
 0x156   : > { %v1527_v28 = vadd.f32 %v3102_v33, %v1526_v14  ;;  %v2015_v4 = vor.u32 1.1754944e-38, %v2014_v13  ;;  %v2252_v17 = vand.u32 2147483647, %v4319_v9  ;;  %vm1769_vm3 = vweird.f32 %v3106_v37  ;;  %vm5179_vm12 = vmmov %vm5176_vm6 }
 0x157   : > { %v1766_v32 = vmul.f32 %v3106_v37, %v1765_v22  ;;  %v2005_v49 = vsub.f32 1.0, %v2004_v26  ;;  %3113 = vrcp.f32 %v4334_v45  ;;  %v2482_v24 = vpack.c.bf16 %v2418_v8, %v2418_v8  ;;  %vm1770_vm8 = vmor %vm1768_vm11, %vm1769_vm3 }
 0x158   : > { %v3110_v63 = vpop.eup %3109  ;;  %v1531_v62 = vsel %vm1530_vm1, %v3102_v33, %v1527_v28  ;;  %vm2009_vm4 = vweird.f32 %v3108_v16  ;;  %vm2248_vm5 = vweird.f32 %v4319_v9  ;;  %v2254_v58 = vand.u32 2147483648, %v4319_v9 }
 0x159   : > { %v4354_v30 = vpop.eup %3111  ;;  %v1536_v38 = vsel %vm4312_vm10, %v1535_v5, %v1531_v62  ;;  %v1767_v20 = vadd.f32 %v3106_v37, %v1766_v32  ;;  %v2006_v1 = vmul.f32 %v3108_v16, %v2005_v49  ;;  %v4358_v42 = vadd.f32 1.0, %v3110_v63  ;;  %2547 = vst.msk [vmem:[%s3567_s27 + $0xdc] sm:$0xf] %vm5176_vm6, %v2482_v24  ;;  %vm2010_vm9 = vmor %vm2008_vm14, %vm2009_vm4 }
 0x15a   : > { %v2371_v12 = vmul.f32 %v1536_v38, %v4125_v27  ;;  %v2244_v51 = vmul.f32 %v4354_v30, %v4319_v9  ;;  %vm4368_vm7 = vcmp.eq.f32.partialorder %v2252_v17, 8.507059e+37  ;;  %v1547_v39 = vand.u32 2147483647, %v4334_v45  ;;  %v351_v17 = vld [vmem:[#allocation2 + $0xd8] sm:$0xff]  ;;  %v870_v10 = vpop.f32.mrf.mxu3 }
 0x15b   : > { %v1771_v41 = vsel %vm1770_vm8, %v3106_v37, %v1767_v20  ;;  %v2007_v35 = vadd.f32 %v3108_v16, %v2006_v1  ;;  %v1549_v34 = vand.u32 2147483648, %v4334_v45  ;;  %3115 = vrcp.f32 %v4358_v42 }
 0x15c   : > { %v2435_v27 = vpack.c.bf16 %v2371_v12, %v2371_v12  ;;  %v1776_v60 = vsel %vm4328_vm2, %v1775_v29, %v1771_v41  ;;  %v2245_v40 = vsub.f32 1.0, %v2244_v51  ;;  %v2255_v43 = vor.u32 1.1754944e-38, %v2254_v58  ;;  %v382_v29 = vld [vmem:[#allocation2 + $0x1d0] sm:$0xff]  ;;  %vm5182_vm2 = vmmov %vm5176_vm6  ;;  %v367_v58 = vld [vmem:[#allocation2 + $0x158] sm:$0xff]  ;;  %v753_v41 = vpop.f32.mrf.mxu0 }
 0x15d   : > { %v4380_v33 = vpop.eup %3113  ;;  %v2387_v54 = vmul.f32 %v1776_v60, %v4225_v25  ;;  %v2011_v21 = vsel %vm2010_vm9, %v3108_v16, %v2007_v35  ;;  %vm2249_vm10 = vweird.f32 %v4354_v30  ;;  %vm1543_vm11 = vweird.f32 %v4334_v45  ;;  %v383_v51 = vld [vmem:[#allocation2 + $0x1d8] sm:$0xff]  ;;  %v793_v60 = vpop.f32.mrf.mxu1 }
 0x15e   : > { %2500 = vst.msk [vmem:[%s3567_s27 + $0x20] sm:$0xf] %vm5179_vm12, %v2435_v27  ;;  %v2016_v46 = vsel %vm4343_vm0, %v2015_v4, %v2011_v21  ;;  %v2246_v19 = vmul.f32 %v4354_v30, %v2245_v40  ;;  %v1539_v5 = vmul.f32 %v4380_v33, %v4334_v45  ;;  %vm4392_vm13 = vcmp.eq.f32.partialorder %v1547_v39, 8.507059e+37  ;;  %vm2250_vm14 = vmor %vm2248_vm5, %vm2249_vm10  ;;  %v335_v4 = vld [vmem:[#allocation2 + $0x58] sm:$0xff]  ;;  %v352_v27 = vld [vmem:[#allocation2 + $0xe0] sm:$0xff] }
 0x15f   : > { %v2451_v37 = vpack.c.bf16 %v2387_v54, %v2387_v54  ;;  %v2403_v15 = vmul.f32 %v2016_v46, %v4245_v57  ;;  %v1550_v11 = vor.u32 1.1754944e-38, %v1549_v34  ;;  %v1787_v13 = vand.u32 2147483647, %v4358_v42  ;;  %vm5183_vm0 = vmmov %vm5182_vm2 }
 0x160   : > { %v2247_v3 = vadd.f32 %v4354_v30, %v2246_v19  ;;  %v1540_v16 = vsub.f32 1.0, %v1539_v5  ;;  %v4400_v6 = vadd.f32 %v4005_v23, %v1056_v53  ;;  %v4403_v14 = vadd.f32 %v4005_v23, %v1072_v59 }
 0x161   : > { %v3116_v56 = vpop.eup %3115  ;;  %2516 = vst.msk [vmem:[%s3567_s27 + $0x60] sm:$0xf] %vm5182_vm2, %v2451_v37  ;;  %v2467_v22 = vpack.c.bf16 %v2403_v15, %v2403_v15  ;;  %vm1544_vm15 = vweird.f32 %v4380_v33  ;;  %v893_v57 = vadd.f32 %v4336_v18, %v334_v0  ;;  %v909_v26 = vadd.f32 %v4338_v31, %v350_v2 }
 0x162   : > { %v2251_v52 = vsel %vm2250_vm14, %v4354_v30, %v2247_v3  ;;  %v1541_v23 = vmul.f32 %v4380_v33, %v1540_v16  ;;  %v1779_v8 = vmul.f32 %v3116_v56, %v4358_v42  ;;  %v925_v28 = vadd.f32 %v828_v48, %v366_v55  ;;  %v830_v30 = vpop.f32.mrf.mxu2  ;;  %vm1545_vm3 = vmor %vm1543_vm11, %vm1544_vm15  ;;  %v336_v48 = vld [vmem:[#allocation2 + $0x60] sm:$0xff] }
 0x163   : > { %2532 = vst.msk [vmem:[%s3567_s27 + $0xa0] sm:$0xf] %vm5183_vm0, %v2467_v22  ;;  %v2256_v9 = vsel %vm4368_vm7, %v2255_v43, %v2251_v52  ;;  %v2879_v32 = vmul.f32 -1.442695, %v4400_v6  ;;  %v2895_v18 = vmul.f32 -1.442695, %v4403_v14  ;;  %v941_v49 = vadd.f32 %v868_v44, %v382_v29  ;;  %vm5188_vm7 = vmmov %vm5183_vm0 }
 0x164   : > { %v2419_v31 = vmul.f32 %v2256_v9, %v4248_v36  ;;  %v1542_v63 = vadd.f32 %v4380_v33, %v1541_v23  ;;  %v1780_v24 = vsub.f32 1.0, %v1779_v8  ;;  %v1789_v62 = vand.u32 2147483648, %v4358_v42  ;;  %vm5192_vm14 = vmmov %vm5183_vm0  ;;  %v384_v22 = vld [vmem:[#allocation2 + $0x1e0] sm:$0xff] }
 0x165   : > { %vm5184_vm1 = vcmask 523264   ;;  %vm1784_vm4 = vweird.f32 %v3116_v56  ;;  %3117 = vpow2.f32 %v2879_v32  ;;  %v894_v36 = vadd.f32 %v750_v47, %v335_v4 }
 0x166   : > { %958 = vst.msk [vmem:[#allocation2 + $0x50] sm:$0xff] %vm5184_vm1, %v893_v57  ;;  %vm5185_vm5 = vmmov %vm5184_vm1  ;;  %v910_v38 = vadd.f32 %v790_v50, %v351_v17  ;;  %v2483_v20 = vpack.c.bf16 %v2419_v31, %v2419_v31  ;;  %v1546_v1 = vsel %vm1545_vm3, %v4380_v33, %v1542_v63  ;;  %v1781_v12 = vmul.f32 %v3116_v56, %v1780_v24  ;;  %v873_v57 = vpop.f32.mrf.mxu3 }
 0x167   : > { %974 = vst.msk [vmem:[#allocation2 + $0xd0] sm:$0xff] %vm5185_vm5, %v909_v26  ;;  %3119 = vpow2.f32 %v2895_v18  ;;  %vm5186_vm6 = vmmov %vm5184_vm1  ;;  %v1551_v45 = vsel %vm4392_vm13, %v1550_v11, %v1546_v1  ;;  %v926_v39 = vadd.f32 %v830_v30, %v367_v58  ;;  %vm1783_vm9 = vweird.f32 %v4358_v42  ;;  %v4455_v42 = vld [vmem:[%s5063_s2] ss:$0 sm:$0xff]  ;;  %v337_v58 = vld [vmem:[#allocation2 + $0x68] sm:$0xff]  ;;  %v755_v30 = vpop.f32.mrf.mxu0 }
 0x168   : > { %990 = vst.msk [vmem:[#allocation2 + $0x150] sm:$0xff] %vm5186_vm6, %v925_v28  ;;  %vm5187_vm8 = vmmov %vm5184_vm1  ;;  %v2372_v35 = vmul.f32 %v1551_v45, %v4252_v61  ;;  %v1782_v34 = vadd.f32 %v3116_v56, %v1781_v12  ;;  %v1790_v40 = vor.u32 1.1754944e-38, %v1789_v62  ;;  %v942_v43 = vadd.f32 %v870_v10, %v383_v51  ;;  %v353_v10 = vld [vmem:[#allocation2 + $0xe8] sm:$0xff]  ;;  %v795_v45 = vpop.f32.mrf.mxu1 }
 0x169   : > { %1006 = vst.msk [vmem:[#allocation2 + $0x1d0] sm:$0xff] %vm5187_vm8, %v941_v49  ;;  %vm1785_vm10 = vmor %vm1783_vm9, %vm1784_vm4  ;;  %vm1788_vm12 = vcmp.eq.f32.partialorder %v1787_v13, 8.507059e+37  ;;  %v895_v61 = vadd.f32 %v753_v41, %v336_v48  ;;  %v911_v59 = vadd.f32 %v793_v60, %v352_v27  ;;  %v368_v13 = vld [vmem:[#allocation2 + $0x160] sm:$0xff]  ;;  %v943_v49 = vadd.f32 %v873_v57, %v384_v22 }
 0x16a   : > { %2548 = vst.msk [vmem:[%s3567_s27 + $0xe0] sm:$0xf] %vm5188_vm7, %v2483_v20  ;;  %vm5189_vm11 = vmmov %vm5184_vm1  ;;  %v2436_v44 = vpack.c.bf16 %v2372_v35, %v2372_v35  ;;  %v1786_v33 = vsel %vm1785_vm10, %v3116_v56, %v1782_v34  ;;  %v833_v56 = vpop.f32.mrf.mxu2  ;;  %v896_v34 = vadd.f32 %v755_v30, %v337_v58 }
 0x16b   : > { %959 = vst.msk [vmem:[#allocation2 + $0x58] sm:$0xff] %vm5189_vm11, %v894_v36  ;;  %vm5190_vm13 = vmmov %vm5184_vm1  ;;  %v3118_v54 = vpop.eup %3117  ;;  %v1791_v21 = vsel %vm1788_vm12, %v1790_v40, %v1786_v33  ;;  %v927_v18 = vadd.f32 %v833_v56, %v368_v13 }
 0x16c   : > { %975 = vst.msk [vmem:[#allocation2 + $0xd8] sm:$0xff] %vm5190_vm13, %v910_v38  ;;  %vm5191_vm2 = vmmov %vm5184_vm1  ;;  %v2388_v46 = vmul.f32 %v1791_v21, %v4285_v7  ;;  %v4450_v19 = vadd.f32 1.0, %v3118_v54  ;;  %v912_v54 = vadd.f32 %v795_v45, %v353_v10 }
 0x16d   : > { %v1025_v53 = vld [vmem:[#allocation2 + $0x50] sm:$0xff]  ;;  %991 = vst.msk [vmem:[#allocation2 + $0x158] sm:$0xff] %vm5191_vm2, %v926_v39  ;;  %v3120_v47 = vpop.eup %3119  ;;  %vm5193_vm15 = vmmov %vm5184_vm1 }
 0x16e   : > { %2501 = vst.msk [vmem:[%s3567_s27 + $0x24] sm:$0xf] %vm5192_vm14, %v2436_v44  ;;  %v4458_v5 = vadd.f32 %v4455_v42, %v1025_v53  ;;  %v1041_v25 = vld [vmem:[#allocation2 + $0xd0] sm:$0xff]  ;;  %v4460_v0 = vadd.f32 1.0, %v3120_v47  ;;  %v2452_v7 = vpack.c.bf16 %v2388_v46, %v2388_v46  ;;  %3121 = vrcp.f32 %v4450_v19  ;;  %vm5194_vm0 = vmmov %vm5184_vm1 }
 0x16f   : > { %v4463_v2 = vadd.f32 %v4455_v42, %v1041_v25  ;;  %v1057_v50 = vld [vmem:[#allocation2 + $0x150] sm:$0xff]  ;;  %1007 = vst.msk [vmem:[#allocation2 + $0x1d8] sm:$0xff] %vm5193_vm15, %v942_v43  ;;  %vm5195_vm1 = vmmov %vm5194_vm0  ;;  %vm2023_vm4 = vweird.f32 %v4450_v19  ;;  %v2027_v8 = vand.u32 2147483647, %v4450_v19  ;;  %v2029_v24 = vand.u32 2147483648, %v4450_v19 }
 0x170   : > { %v1073_v37 = vld [vmem:[#allocation2 + $0x1d0] sm:$0xff]  ;;  %960 = vst.msk [vmem:[#allocation2 + $0x60] sm:$0xff] %vm5194_vm0, %v895_v61  ;;  %3123 = vrcp.f32 %v4460_v0  ;;  %vm5196_vm3 = vmmov %vm5188_vm7  ;;  %v2848_v15 = vmul.f32 -1.442695, %v4458_v5  ;;  %v4474_v11 = vadd.f32 %v4455_v42, %v1057_v50  ;;  %vm2263_vm5 = vweird.f32 %v4460_v0 }
 0x171   : > { %976 = vst.msk [vmem:[#allocation2 + $0xe0] sm:$0xff] %vm5195_vm1, %v911_v59  ;;  %v2864_v55 = vmul.f32 -1.442695, %v4463_v2  ;;  %v4478_v3 = vadd.f32 %v4455_v42, %v1073_v37  ;;  %v2267_v38 = vand.u32 2147483647, %v4460_v0  ;;  %v2269_v20 = vand.u32 2147483648, %v4460_v0  ;;  %vm5197_vm6 = vmmov %vm5194_vm0 }
 0x172   : > { %2517 = vst.msk [vmem:[%s3567_s27 + $0x64] sm:$0xf] %vm5196_vm3, %v2452_v7  ;;  %v1026_v16 = vld [vmem:[#allocation2 + $0x58] sm:$0xff]  ;;  %3125 = vpow2.f32 %v2848_v15  ;;  %v2880_v26 = vmul.f32 -1.442695, %v4474_v11  ;;  %vm5198_vm9 = vmmov %vm5194_vm0  ;;  %vm4520_vm11 = vcmp.eq.f32.partialorder %v2027_v8, 8.507059e+37 }
 0x173   : > { %v1042_v29 = vld [vmem:[#allocation2 + $0xd8] sm:$0xff]  ;;  %v4482_v52 = vadd.f32 %v4455_v42, %v1026_v16  ;;  %3127 = vpow2.f32 %v2864_v55  ;;  %v2896_v28 = vmul.f32 -1.442695, %v4478_v3  ;;  %992 = vst.msk [vmem:[#allocation2 + $0x160] sm:$0xff] %vm5197_vm6, %v927_v18  ;;  %vm5199_vm10 = vmmov %vm5194_vm0  ;;  %v2030_v46 = vor.u32 1.1754944e-38, %v2029_v24 }
 0x174   : > { %v1058_v23 = vld [vmem:[#allocation2 + $0x158] sm:$0xff]  ;;  %v4488_v4 = vadd.f32 %v4455_v42, %v1042_v29  ;;  %v3122_v17 = vpop.eup %3121  ;;  %3129 = vpow2.f32 %v2880_v26  ;;  %1008 = vst.msk [vmem:[#allocation2 + $0x1e0] sm:$0xff] %vm5198_vm9, %v943_v49  ;;  %vm4532_vm13 = vcmp.eq.f32.partialorder %v2267_v38, 8.507059e+37  ;;  %vm5204_vm2 = vmmov %vm5194_vm0 }
 0x175   : > { %v2849_v9 = vmul.f32 -1.442695, %v4482_v52  ;;  %v4492_v32 = vadd.f32 %v4455_v42, %v1058_v23  ;;  %v2019_v63 = vmul.f32 %v3122_v17, %v4450_v19  ;;  %vm2024_vm8 = vweird.f32 %v3122_v17  ;;  %961 = vst.msk [vmem:[#allocation2 + $0x68] sm:$0xff] %vm5199_vm10, %v896_v34  ;;  %vm5205_vm1 = vmmov %vm5196_vm3 }
 0x176   : > { %v4494_v31 = vpop.eup %3123  ;;  %v2865_v62 = vmul.f32 -1.442695, %v4488_v4  ;;  %v1074_v1 = vld [vmem:[#allocation2 + $0x1d8] sm:$0xff]  ;;  %3131 = vpow2.f32 %v2896_v28  ;;  %vm2025_vm12 = vmor %vm2023_vm4, %vm2024_vm8  ;;  %977 = vst.msk [vmem:[#allocation2 + $0xe8] sm:$0xff] %vm5204_vm2, %v912_v54  ;;  %v2270_v19 = vor.u32 1.1754944e-38, %v2269_v20 }
 0x177   : > { %v2259_v36 = vmul.f32 %v4494_v31, %v4460_v0  ;;  %v2020_v12 = vsub.f32 1.0, %v2019_v63  ;;  %vm2264_vm7 = vweird.f32 %v4494_v31  ;;  %v1027_v51 = vld [vmem:[#allocation2 + $0x60] sm:$0xff]  ;;  %3133 = vpow2.f32 %v2849_v9  ;;  %vm5206_vm3 = vmmov %vm5205_vm1 }
 0x178   : > { %v3126_v39 = vpop.eup %3125  ;;  %v2881_v41 = vmul.f32 -1.442695, %v4492_v32  ;;  %v1043_v35 = vld [vmem:[#allocation2 + $0xe0] sm:$0xff]  ;;  %3135 = vpow2.f32 %v2865_v62  ;;  %v4511_v43 = vadd.f32 %v4455_v42, %v1074_v1  ;;  %v4517_v61 = vadd.f32 %v4455_v42, %v1027_v51  ;;  %vm2265_vm14 = vmor %vm2263_vm5, %vm2264_vm7 }
 0x179   : > { %v2260_v48 = vsub.f32 1.0, %v2259_v36  ;;  %v3128_v27 = vpop.eup %3127  ;;  %v2021_v60 = vmul.f32 %v3122_v17, %v2020_v12  ;;  %v4508_v40 = vadd.f32 1.0, %v3126_v39  ;;  %v4526_v47 = vadd.f32 %v4455_v42, %v1043_v35 }
 0x17a   : > { %v4514_v33 = vadd.f32 1.0, %v3128_v27  ;;  %v3130_v21 = vpop.eup %3129  ;;  %v2897_v15 = vmul.f32 -1.442695, %v4511_v43  ;;  %v4549_v56 = vmul.f32 -1.442695, %v4517_v61 }
 0x17b   : > { %v2261_v44 = vmul.f32 %v4494_v31, %v2260_v48  ;;  %v2022_v53 = vadd.f32 %v3122_v17, %v2021_v60  ;;  %3137 = vrcp.f32 %v4508_v40  ;;  %v4546_v29 = vadd.f32 1.0, %v3130_v21 }
 0x17c   : > { %3139 = vrcp.f32 %v4514_v33  ;;  %v3132_v7 = vpop.eup %3131  ;;  %v1562_v26 = vand.u32 2147483647, %v4508_v40  ;;  %v4556_v23 = vmul.f32 -1.442695, %v4526_v47  ;;  %v1564_v28 = vand.u32 2147483648, %v4508_v40 }
 0x17d   : > { %v2262_v25 = vadd.f32 %v4494_v31, %v2261_v44  ;;  %v2026_v37 = vsel %vm2025_vm12, %v3122_v17, %v2022_v53  ;;  %3141 = vpow2.f32 %v2881_v41  ;;  %v3134_v13 = vpop.eup %3133  ;;  %v1802_v17 = vand.u32 2147483647, %v4514_v33 }
 0x17e   : > { %v2031_v55 = vsel %vm4520_vm11, %v2030_v46, %v2026_v37  ;;  %v3136_v22 = vpop.eup %3135  ;;  %3143 = vrcp.f32 %v4546_v29  ;;  %v1804_v18 = vand.u32 2147483648, %v4514_v33  ;;  %v4563_v49 = vadd.f32 1.0, %v3132_v7 }
 0x17f   : > { %v2266_v16 = vsel %vm2265_vm14, %v4494_v31, %v2262_v25  ;;  %v2404_v57 = vmul.f32 %v2031_v55, %v4400_v6  ;;  %v4565_v31 = vadd.f32 1.0, %v3134_v13  ;;  %vm1558_vm15 = vweird.f32 %v4508_v40 }
 0x180   : > { %v2271_v0 = vsel %vm4532_vm13, %v2270_v19, %v2266_v16  ;;  %vm1798_vm0 = vweird.f32 %v4514_v33  ;;  %v2042_v30 = vand.u32 2147483647, %v4546_v29  ;;  %v2044_v36 = vand.u32 2147483648, %v4546_v29 }
 0x181   : > { %v2420_v8 = vmul.f32 %v2271_v0, %v4403_v14  ;;  %v3138_v9 = vpop.eup %3137  ;;  %v2468_v6 = vpack.c.bf16 %v2404_v57, %v2404_v57  ;;  %3145 = vrcp.f32 %v4563_v49  ;;  %vm4578_vm4 = vcmp.eq.f32.partialorder %v1562_v26, 8.507059e+37 }
 0x182   : > { %v3140_v63 = vpop.eup %3139  ;;  %v1554_v62 = vmul.f32 %v3138_v9, %v4508_v40  ;;  %v1565_v1 = vor.u32 1.1754944e-38, %v1564_v28  ;;  %v2284_v12 = vand.u32 2147483648, %v4563_v49  ;;  %vm4583_vm5 = vcmp.eq.f32.partialorder %v1802_v17, 8.507059e+37 }
 0x183   : > { %v2484_v24 = vpack.c.bf16 %v2420_v8, %v2420_v8  ;;  %v3142_v14 = vpop.eup %3141  ;;  %2533 = vst.msk [vmem:[%s3567_s27 + $0xa4] sm:$0xf] %vm5205_vm1, %v2468_v6  ;;  %v1794_v58 = vmul.f32 %v3140_v63, %v4514_v33  ;;  %v1805_v45 = vor.u32 1.1754944e-38, %v1804_v18  ;;  %3147 = vrcp.f32 %v4565_v31  ;;  %v1059_v18 = vld [vmem:[#allocation2 + $0x160] sm:$0xff] }
 0x184   : > { %v1555_v38 = vsub.f32 1.0, %v1554_v62  ;;  %v3144_v39 = vpop.eup %3143  ;;  %vm1559_vm6 = vweird.f32 %v3138_v9  ;;  %vm2038_vm8 = vweird.f32 %v4546_v29  ;;  %v2282_v41 = vand.u32 2147483647, %v4563_v49 }
 0x185   : > { %2549 = vst.msk [vmem:[%s3567_s27 + $0xe4] sm:$0xf] %vm5206_vm3, %v2484_v24  ;;  %v1795_v51 = vsub.f32 1.0, %v1794_v58  ;;  %vm1799_vm7 = vweird.f32 %v3140_v63  ;;  %v2034_v34 = vmul.f32 %v3144_v39, %v4546_v29  ;;  %vm4591_vm9 = vcmp.eq.f32.partialorder %v2042_v30, 8.507059e+37  ;;  %vm1560_vm11 = vmor %vm1558_vm15, %vm1559_vm6 }
 0x186   : > { %v1556_v48 = vmul.f32 %v3138_v9, %v1555_v38  ;;  %v2045_v60 = vor.u32 1.1754944e-38, %v2044_v36  ;;  %vm2278_vm10 = vweird.f32 %v4563_v49  ;;  %v2285_v54 = vor.u32 1.1754944e-38, %v2284_v12  ;;  %vm1800_vm12 = vmor %vm1798_vm0, %vm1799_vm7 }
 0x187   : > { %v1796_v35 = vmul.f32 %v3140_v63, %v1795_v51  ;;  %v1577_v21 = vand.u32 2147483647, %v4565_v31  ;;  %v4597_v53 = vadd.f32 1.0, %v3136_v22  ;;  %v3146_v59 = vpop.eup %3145  ;;  %v2035_v25 = vsub.f32 1.0, %v2034_v34 }
 0x188   : > { %v1557_v44 = vadd.f32 %v3138_v9, %v1556_v48  ;;  %v1579_v50 = vand.u32 2147483648, %v4565_v31  ;;  %3149 = vpow2.f32 %v2897_v15  ;;  %vm2039_vm13 = vweird.f32 %v3144_v39 }
 0x189   : > { %v1797_v46 = vadd.f32 %v3140_v63, %v1796_v35  ;;  %v2274_v37 = vmul.f32 %v3146_v59, %v4563_v49  ;;  %vm4606_vm2 = vcmp.eq.f32.partialorder %v2282_v41, 8.507059e+37  ;;  %vm1573_vm14 = vweird.f32 %v4565_v31  ;;  %v3148_v40 = vpop.eup %3147  ;;  %vm2040_vm1 = vmor %vm2038_vm8, %vm2039_vm13 }
 0x18a   : > { %v1561_v7 = vsel %vm1560_vm11, %v3138_v9, %v1557_v44  ;;  %3151 = vrcp.f32 %v4597_v53  ;;  %v2036_v55 = vmul.f32 %v3144_v39, %v2035_v25  ;;  %v4614_v16 = vadd.f32 1.0, %v3142_v14 }
 0x18b   : > { %v1566_v15 = vsel %vm4578_vm4, %v1565_v1, %v1561_v7  ;;  %v1801_v13 = vsel %vm1800_vm12, %v3140_v63, %v1797_v46  ;;  %v2275_v57 = vsub.f32 1.0, %v2274_v37  ;;  %v1569_v0 = vmul.f32 %v3148_v40, %v4565_v31  ;;  %v1028_v7 = vld [vmem:[#allocation2 + $0x68] sm:$0xff] }
 0x18c   : > { %v2373_v33 = vmul.f32 %v1566_v15, %v4458_v5  ;;  %v1806_v22 = vsel %vm4583_vm5, %v1805_v45, %v1801_v13  ;;  %vm4620_vm15 = vcmp.eq.f32.partialorder %v1577_v21, 8.507059e+37  ;;  %v2037_v28 = vadd.f32 %v3144_v39, %v2036_v55  ;;  %v369_v37 = vld [vmem:[#allocation2 + $0x168] sm:$0xff]  ;;  %v835_v13 = vpop.f32.mrf.mxu2 }
 0x18d   : > { %v2389_v8 = vmul.f32 %v1806_v22, %v4463_v2  ;;  %vm2279_vm0 = vweird.f32 %v3146_v59  ;;  %v1580_v17 = vor.u32 1.1754944e-38, %v1579_v50  ;;  %v2276_v5 = vmul.f32 %v3146_v59, %v2275_v57  ;;  %v1044_v15 = vld [vmem:[#allocation2 + $0xe8] sm:$0xff] }
 0x18e   : > { %v2437_v9 = vpack.c.bf16 %v2373_v33, %v2373_v33  ;;  %v1570_v6 = vsub.f32 1.0, %v1569_v0  ;;  %vm1574_vm3 = vweird.f32 %v3148_v40  ;;  %v3150_v63 = vpop.eup %3149  ;;  %v2041_v62 = vsel %vm2040_vm1, %v3144_v39, %v2037_v28  ;;  %vm2280_vm6 = vmor %vm2278_vm10, %vm2279_vm0  ;;  %v385_v57 = vld [vmem:[#allocation2 + $0x1e8] sm:$0xff]  ;;  %v875_v0 = vpop.f32.mrf.mxu3 }
 0x18f   : > { %v2453_v24 = vpack.c.bf16 %v2389_v8, %v2389_v8  ;;  %v1817_v14 = vand.u32 2147483647, %v4597_v53  ;;  %3153 = vrcp.f32 %v4614_v16  ;;  %vm5217_vm4 = vcmask 519168   ;;  %vm1575_vm7 = vmor %vm1573_vm14, %vm1574_vm3 }
 0x190   : > { %v3152_v2 = vpop.eup %3151  ;;  %2502 = vst.msk [vmem:[%s3567_s27 + $0x28] sm:$0xf] %vm5217_vm4, %v2437_v9  ;;  %v2046_v58 = vsel %vm4591_vm9, %v2045_v60, %v2041_v62  ;;  %v2277_v29 = vadd.f32 %v3146_v59, %v2276_v5  ;;  %v1571_v30 = vmul.f32 %v3148_v40, %v1570_v6  ;;  %v1819_v36 = vand.u32 2147483648, %v4597_v53  ;;  %vm5218_vm5 = vmmov %vm5217_vm4  ;;  %v758_v62 = vpop.f32.mrf.mxu0 }
 0x191   : > { %2518 = vst.msk [vmem:[%s3567_s27 + $0x68] sm:$0xf] %vm5218_vm5, %v2453_v24  ;;  %v2405_v38 = vmul.f32 %v2046_v58, %v4474_v11  ;;  %v1809_v20 = vmul.f32 %v3152_v2, %v4597_v53  ;;  %vm1813_vm8 = vweird.f32 %v4597_v53  ;;  %v4644_v1 = vadd.f32 %v4455_v42, %v1059_v18  ;;  %vm5221_vm10 = vmmov %vm5217_vm4  ;;  %v338_v24 = vld [vmem:[#allocation2 + $0x70] sm:$0xff] }
 0x192   : > { %v2281_v12 = vsel %vm2280_vm6, %v3146_v59, %v2277_v29  ;;  %v1572_v51 = vadd.f32 %v3148_v40, %v1571_v30  ;;  %v2057_v10 = vand.u32 2147483647, %v4614_v16  ;;  %v2059_v45 = vand.u32 2147483648, %v4614_v16  ;;  %v1075_v59 = vld [vmem:[#allocation2 + $0x1e0] sm:$0xff] }
 0x193   : > { %v2469_v39 = vpack.c.bf16 %v2405_v38, %v2405_v38  ;;  %v2286_v11 = vsel %vm4606_vm2, %v2285_v54, %v2281_v12  ;;  %v1810_v49 = vsub.f32 1.0, %v1809_v20  ;;  %v4653_v48 = vadd.f32 1.0, %v3150_v63  ;;  %vm5224_vm2 = vmmov %vm5217_vm4 }
 0x194   : > { %v2421_v41 = vmul.f32 %v2286_v11, %v4478_v3  ;;  %v1576_v35 = vsel %vm1575_vm7, %v3148_v40, %v1572_v51  ;;  %vm4656_vm9 = vcmp.eq.f32.partialorder %v1817_v14, 8.507059e+37  ;;  %v1820_v27 = vor.u32 1.1754944e-38, %v1819_v36  ;;  %vm5225_vm0 = vmmov %vm5224_vm2  ;;  %v798_v11 = vpop.f32.mrf.mxu1 }
 0x195   : > { %v3154_v60 = vpop.eup %3153  ;;  %2534 = vst.msk [vmem:[%s3567_s27 + $0xa8] sm:$0xf] %vm5221_vm10, %v2469_v39  ;;  %v1581_v44 = vsel %vm4620_vm15, %v1580_v17, %v1576_v35  ;;  %v1811_v31 = vmul.f32 %v3152_v2, %v1810_v49  ;;  %vm1814_vm11 = vweird.f32 %v3152_v2  ;;  %3155 = vrcp.f32 %v4653_v48  ;;  %vm5227_vm4 = vmmov %vm5225_vm0  ;;  %v354_v39 = vld [vmem:[#allocation2 + $0xf0] sm:$0xff] }
 0x196   : > { %v2485_v54 = vpack.c.bf16 %v2421_v41, %v2421_v41  ;;  %v2374_v3 = vmul.f32 %v1581_v44, %v4482_v52  ;;  %v2049_v21 = vmul.f32 %v3154_v60, %v4614_v16  ;;  %vm2053_vm12 = vweird.f32 %v4614_v16  ;;  %vm1815_vm14 = vmor %vm1813_vm8, %vm1814_vm11 }
 0x197   : > { %v1812_v46 = vadd.f32 %v3152_v2, %v1811_v31  ;;  %vm4668_vm13 = vcmp.eq.f32.partialorder %v2057_v10, 8.507059e+37  ;;  %v2060_v50 = vor.u32 1.1754944e-38, %v2059_v45  ;;  %3157 = vpow2.f32 %v4549_v56  ;;  %vm5230_vm10 = vmmov %vm5225_vm0 }
 0x198   : > { %2550 = vst.msk [vmem:[%s3567_s27 + $0xe8] sm:$0xf] %vm5224_vm2, %v2485_v54  ;;  %v2438_v19 = vpack.c.bf16 %v2374_v3, %v2374_v3  ;;  %v2050_v52 = vsub.f32 1.0, %v2049_v21  ;;  %3159 = vpow2.f32 %v4556_v23  ;;  %v2882_v40 = vmul.f32 -1.442695, %v4644_v1 }
 0x199   : > { %v1816_v55 = vsel %vm1815_vm14, %v3152_v2, %v1812_v46  ;;  %vm2054_vm15 = vweird.f32 %v3154_v60  ;;  %v2297_v56 = vand.u32 2147483647, %v4653_v48  ;;  %v4682_v33 = vadd.f32 %v4455_v42, %v1075_v59 }
 0x19a   : > { %2503 = vst.msk [vmem:[%s3567_s27 + $0x2c] sm:$0xf] %vm5225_vm0, %v2438_v19  ;;  %v1821_v53 = vsel %vm4656_vm9, %v1820_v27, %v1816_v55  ;;  %v2051_v22 = vmul.f32 %v3154_v60, %v2050_v52  ;;  %3161 = vpow2.f32 %v2882_v40  ;;  %v4689_v23 = vadd.f32 %v4455_v42, %v1028_v7  ;;  %vm2055_vm1 = vmor %vm2053_vm12, %vm2054_vm15 }
 0x19b   : > { %v3156_v26 = vpop.eup %3155  ;;  %v2390_v8 = vmul.f32 %v1821_v53, %v4488_v4  ;;  %v2898_v28 = vmul.f32 -1.442695, %v4682_v33  ;;  %v4694_v17 = vadd.f32 %v4455_v42, %v1044_v15  ;;  %v928_v9 = vadd.f32 %v835_v13, %v369_v37 }
 0x19c   : > { %v2052_v5 = vadd.f32 %v3154_v60, %v2051_v22  ;;  %v2289_v6 = vmul.f32 %v3156_v26, %v4653_v48  ;;  %v2299_v18 = vand.u32 2147483648, %v4653_v48  ;;  %v2851_v63 = vmul.f32 -1.442695, %v4689_v23 }
 0x19d   : > { %v3158_v14 = vpop.eup %3157  ;;  %v2454_v2 = vpack.c.bf16 %v2390_v8, %v2390_v8  ;;  %3163 = vpow2.f32 %v2898_v28  ;;  %v2867_v4 = vmul.f32 -1.442695, %v4694_v17  ;;  %vm5226_vm3 = vcmask 523264  }
 0x19e   : > { %993 = vst.msk [vmem:[#allocation2 + $0x168] sm:$0xff] %vm5226_vm3, %v928_v9  ;;  %v944_v58 = vadd.f32 %v875_v0, %v385_v57  ;;  %v3160_v29 = vpop.eup %3159  ;;  %v2056_v30 = vsel %vm2055_vm1, %v3154_v60, %v2052_v5  ;;  %v2290_v36 = vsub.f32 1.0, %v2289_v6  ;;  %v4704_v38 = vadd.f32 1.0, %v3158_v14  ;;  %vm5228_vm6 = vmmov %vm5226_vm3 }
 0x19f   : > { %3165 = vpow2.f32 %v2851_v63  ;;  %2519 = vst.msk [vmem:[%s3567_s27 + $0x6c] sm:$0xf] %vm5227_vm4, %v2454_v2  ;;  %v2061_v20 = vsel %vm4668_vm13, %v2060_v50, %v2056_v30  ;;  %v4710_v12 = vadd.f32 1.0, %v3160_v29  ;;  %v897_v16 = vadd.f32 %v758_v62, %v338_v24  ;;  %vm5229_vm8 = vmmov %vm5226_vm3 }
 0x1a0   : > { %3167 = vpow2.f32 %v2867_v4  ;;  %v3162_v51 = vpop.eup %3161  ;;  %v2406_v10 = vmul.f32 %v2061_v20, %v4492_v32  ;;  %v2291_v45 = vmul.f32 %v3156_v26, %v2290_v36  ;;  %vm2294_vm5 = vweird.f32 %v3156_v26  ;;  %1009 = vst.msk [vmem:[#allocation2 + $0x1e8] sm:$0xff] %vm5228_vm6, %v944_v58  ;;  %vm5231_vm12 = vmmov %vm5226_vm3 }
 0x1a1   : > { %3169 = vrcp.f32 %v4704_v38  ;;  %962 = vst.msk [vmem:[#allocation2 + $0x70] sm:$0xff] %vm5229_vm8, %v897_v16  ;;  %vm2293_vm7 = vweird.f32 %v4653_v48  ;;  %v2300_v35 = vor.u32 1.1754944e-38, %v2299_v18  ;;  %v1592_v32 = vand.u32 2147483647, %v4704_v38 }
 0x1a2   : > { %3171 = vrcp.f32 %v4710_v12  ;;  %v2470_v49 = vpack.c.bf16 %v2406_v10, %v2406_v10  ;;  %v2292_v41 = vadd.f32 %v3156_v26, %v2291_v45  ;;  %vm2295_vm9 = vmor %vm2293_vm7, %vm2294_vm5  ;;  %v1594_v27 = vand.u32 2147483648, %v4704_v38 }
 0x1a3   : > { %v3164_v34 = vpop.eup %3163  ;;  %v4720_v60 = vadd.f32 1.0, %v3162_v51  ;;  %v913_v44 = vadd.f32 %v798_v11, %v354_v39  ;;  %vm2298_vm11 = vcmp.eq.f32.partialorder %v2297_v56, 8.507059e+37  ;;  %v1832_v3 = vand.u32 2147483647, %v4710_v12 }
 0x1a4   : > { %2535 = vst.msk [vmem:[%s3567_s27 + $0xac] sm:$0xf] %vm5230_vm10, %v2470_v49  ;;  %v2296_v54 = vsel %vm2295_vm9, %v3156_v26, %v2292_v41  ;;  %v4725_v21 = vadd.f32 1.0, %v3164_v34  ;;  %v1834_v46 = vand.u32 2147483648, %v4710_v12  ;;  %vm1588_vm13 = vweird.f32 %v4704_v38  ;;  %v838_v41 = vpop.f32.mrf.mxu2 }
 0x1a5   : > { %v3166_v31 = vpop.eup %3165  ;;  %v2301_v59 = vsel %vm2298_vm11, %v2300_v35, %v2296_v54  ;;  %3173 = vrcp.f32 %v4720_v60  ;;  %978 = vst.msk [vmem:[#allocation2 + $0xf0] sm:$0xff] %vm5231_vm12, %v913_v44  ;;  %vm4734_vm2 = vcmp.eq.f32.partialorder %v1592_v32, 8.507059e+37  ;;  %v1595_v52 = vor.u32 1.1754944e-38, %v1594_v27  ;;  %v1060_v0 = vld [vmem:[#allocation2 + $0x168] sm:$0xff]  ;;  %v878_v44 = vpop.f32.mrf.mxu3 }
 0x1a6   : > { %v3168_v48 = vpop.eup %3167  ;;  %v2422_v50 = vmul.f32 %v2301_v59, %v4511_v43  ;;  %3175 = vrcp.f32 %v4725_v21  ;;  %vm1828_vm14 = vweird.f32 %v4710_v12  ;;  %vm4740_vm15 = vcmp.eq.f32.partialorder %v1832_v3, 8.507059e+37 }
 0x1a7   : > { %v3170_v25 = vpop.eup %3169  ;;  %v2072_v13 = vand.u32 2147483647, %v4720_v60  ;;  %v2074_v55 = vand.u32 2147483648, %v4720_v60  ;;  %v1835_v53 = vor.u32 1.1754944e-38, %v1834_v46  ;;  %v2312_v22 = vand.u32 2147483647, %v4725_v21 }
 0x1a8   : > { %v3172_v7 = vpop.eup %3171  ;;  %v1584_v37 = vmul.f32 %v3170_v25, %v4704_v38  ;;  %v2486_v40 = vpack.c.bf16 %v2422_v50, %v2422_v50  ;;  %v4747_v57 = vadd.f32 1.0, %v3166_v31  ;;  %vm1589_vm1 = vweird.f32 %v3170_v25  ;;  %v1076_v28 = vld [vmem:[#allocation2 + $0x1e8] sm:$0xff]  ;;  %v1029_v19 = vld [vmem:[#allocation2 + $0x70] sm:$0xff] }
 0x1a9   : > { %v1824_v15 = vmul.f32 %v3172_v7, %v4710_v12  ;;  %vm2068_vm3 = vweird.f32 %v4720_v60  ;;  %v4752_v8 = vadd.f32 1.0, %v3168_v48  ;;  %vm1829_vm4 = vweird.f32 %v3172_v7  ;;  %vm1590_vm7 = vmor %vm1588_vm13, %vm1589_vm1 }
 0x1aa   : > { %v1585_v56 = vsub.f32 1.0, %v1584_v37  ;;  %2551 = vst.msk [vmem:[%s3567_s27 + $0xec] sm:$0xf] %vm5225_vm0, %v2486_v40  ;;  %vm2308_vm5 = vweird.f32 %v4725_v21  ;;  %v2314_v6 = vand.u32 2147483648, %v4725_v21  ;;  %3177 = vrcp.f32 %v4747_v57  ;;  %vm1830_vm9 = vmor %vm1828_vm14, %vm1829_vm4 }
 0x1ab   : > { %v1825_v26 = vsub.f32 1.0, %v1824_v15  ;;  %v3174_v9 = vpop.eup %3173  ;;  %vm4758_vm6 = vcmp.eq.f32.partialorder %v2072_v13, 8.507059e+37  ;;  %v2075_v14 = vor.u32 1.1754944e-38, %v2074_v55  ;;  %v4763_v2 = vadd.f32 %v4455_v42, %v1060_v0  ;;  %v370_v13 = vld [vmem:[#allocation2 + $0x170] sm:$0xff] }
 0x1ac   : > { %v1586_v5 = vmul.f32 %v3170_v25, %v1585_v56  ;;  %v3176_v18 = vpop.eup %3175  ;;  %v2064_v24 = vmul.f32 %v3174_v9, %v4720_v60  ;;  %vm4766_vm8 = vcmp.eq.f32.partialorder %v2312_v22, 8.507059e+37  ;;  %v1609_v30 = vand.u32 2147483648, %v4747_v57  ;;  %v1045_v43 = vld [vmem:[#allocation2 + $0xf0] sm:$0xff] }
 0x1ad   : > { %v1826_v63 = vmul.f32 %v3172_v7, %v1825_v26  ;;  %v2304_v58 = vmul.f32 %v3176_v18, %v4725_v21  ;;  %v4772_v36 = vadd.f32 %v4455_v42, %v1076_v28  ;;  %v1607_v51 = vand.u32 2147483647, %v4747_v57  ;;  %v386_v28 = vld [vmem:[#allocation2 + $0x1f0] sm:$0xff] }
 0x1ae   : > { %v1587_v4 = vadd.f32 %v3170_v25, %v1586_v5  ;;  %v2065_v16 = vsub.f32 1.0, %v2064_v24  ;;  %3179 = vrcp.f32 %v4752_v8  ;;  %vm2069_vm10 = vweird.f32 %v3174_v9  ;;  %v760_v5 = vpop.f32.mrf.mxu0  ;;  %v355_v24 = vld [vmem:[#allocation2 + $0xf8] sm:$0xff] }
 0x1af   : > { %v1827_v20 = vadd.f32 %v3172_v7, %v1826_v63  ;;  %v2305_v45 = vsub.f32 1.0, %v2304_v58  ;;  %v2315_v39 = vor.u32 1.1754944e-38, %v2314_v6  ;;  %vm2309_vm11 = vweird.f32 %v3176_v18 }
 0x1b0   : > { %v1591_v10 = vsel %vm1590_vm7, %v3170_v25, %v1587_v4  ;;  %v2066_v38 = vmul.f32 %v3174_v9, %v2065_v16  ;;  %vm1603_vm12 = vweird.f32 %v4747_v57  ;;  %v4785_v35 = vpop.eup %3177  ;;  %v1610_v27 = vor.u32 1.1754944e-38, %v1609_v30  ;;  %vm2310_vm0 = vmor %vm2308_vm5, %vm2309_vm11  ;;  %v371_v16 = vld [vmem:[#allocation2 + $0x178] sm:$0xff] }
 0x1b1   : > { %v1596_v11 = vsel %vm4734_vm2, %v1595_v52, %v1591_v10  ;;  %v1831_v49 = vsel %vm1830_vm9, %v3172_v7, %v1827_v20  ;;  %v2306_v32 = vmul.f32 %v3176_v18, %v2305_v45  ;;  %v1599_v3 = vmul.f32 %v4785_v35, %v4747_v57  ;;  %vm2070_vm2 = vmor %vm2068_vm3, %vm2069_vm10 }
 0x1b2   : > { %v2375_v34 = vmul.f32 %v1596_v11, %v4517_v61  ;;  %v1836_v12 = vsel %vm4740_vm15, %v1835_v53, %v1831_v49  ;;  %v2067_v54 = vadd.f32 %v3174_v9, %v2066_v38  ;;  %vm4793_vm13 = vcmp.eq.f32.partialorder %v1607_v51, 8.507059e+37  ;;  %v840_v51 = vpop.f32.mrf.mxu2  ;;  %v880_v11 = vpop.f32.mrf.mxu3 }
 0x1b3   : > { %v2391_v31 = vmul.f32 %v1836_v12, %v4526_v47  ;;  %v1847_v59 = vand.u32 2147483647, %v4752_v8  ;;  %v2307_v46 = vadd.f32 %v3176_v18, %v2306_v32  ;;  %vm1604_vm14 = vweird.f32 %v4785_v35 }
 0x1b4   : > { %v2439_v61 = vpack.c.bf16 %v2375_v34, %v2375_v34  ;;  %vm1843_vm15 = vweird.f32 %v4752_v8  ;;  %v1849_v47 = vand.u32 2147483648, %v4752_v8  ;;  %v4804_v25 = vpop.eup %3179  ;;  %v2071_v7 = vsel %vm2070_vm2, %v3174_v9, %v2067_v54  ;;  %v339_v9 = vld [vmem:[#allocation2 + $0x78] sm:$0xff]  ;;  %vm1605_vm5 = vmor %vm1603_vm12, %vm1604_vm14 }
 0x1b5   : > { %v2455_v50 = vpack.c.bf16 %v2391_v31, %v2391_v31  ;;  %v1600_v37 = vsub.f32 1.0, %v1599_v3  ;;  %v2883_v60 = vmul.f32 -1.442695, %v4763_v2  ;;  %vm5242_vm1 = vcmask 519168  }
 0x1b6   : > { %2504 = vst.msk [vmem:[%s3567_s27 + $0x30] sm:$0xf] %vm5242_vm1, %v2439_v61  ;;  %v2076_v52 = vsel %vm4758_vm6, %v2075_v14, %v2071_v7  ;;  %v2311_v40 = vsel %vm2310_vm0, %v3176_v18, %v2307_v46  ;;  %v1839_v15 = vmul.f32 %v4804_v25, %v4752_v8  ;;  %vm1844_vm3 = vweird.f32 %v4804_v25  ;;  %vm5243_vm4 = vmmov %vm5242_vm1 }
 0x1b7   : > { %2520 = vst.msk [vmem:[%s3567_s27 + $0x70] sm:$0xf] %vm5243_vm4, %v2455_v50  ;;  %v2407_v21 = vmul.f32 %v2076_v52, %v4644_v1  ;;  %v2316_v55 = vsel %vm4766_vm8, %v2315_v39, %v2311_v40  ;;  %v1601_v56 = vmul.f32 %v4785_v35, %v1600_v37  ;;  %3181 = vpow2.f32 %v2883_v60  ;;  %vm5244_vm6 = vmmov %vm5242_vm1  ;;  %v387_v39 = vld [vmem:[#allocation2 + $0x1f8] sm:$0xff] }
 0x1b8   : > { %v2423_v53 = vmul.f32 %v2316_v55, %v4682_v33  ;;  %v1840_v22 = vsub.f32 1.0, %v1839_v15  ;;  %v2899_v0 = vmul.f32 -1.442695, %v4772_v36  ;;  %v4826_v26 = vadd.f32 %v4455_v42, %v1029_v19  ;;  %v800_v33 = vpop.f32.mrf.mxu1  ;;  %vm5245_vm8 = vmmov %vm5242_vm1 }
 0x1b9   : > { %v2471_v6 = vpack.c.bf16 %v2407_v21, %v2407_v21  ;;  %v1602_v1 = vadd.f32 %v4785_v35, %v1601_v56  ;;  %v4830_v18 = vadd.f32 %v4455_v42, %v1045_v43  ;;  %v929_v63 = vadd.f32 %v838_v41, %v370_v13  ;;  %vm1845_vm7 = vmor %vm1843_vm15, %vm1844_vm3 }
 0x1ba   : > { %v2487_v62 = vpack.c.bf16 %v2423_v53, %v2423_v53  ;;  %v1841_v14 = vmul.f32 %v4804_v25, %v1840_v22  ;;  %3183 = vpow2.f32 %v2899_v0  ;;  %v2852_v4 = vmul.f32 -1.442695, %v4826_v26  ;;  %vm5250_vm2 = vmmov %vm5242_vm1 }
 0x1bb   : > { %2536 = vst.msk [vmem:[%s3567_s27 + $0xb0] sm:$0xf] %vm5244_vm6, %v2471_v6  ;;  %v1606_v58 = vsel %vm1605_vm5, %v4785_v35, %v1602_v1  ;;  %v2868_v29 = vmul.f32 -1.442695, %v4830_v18  ;;  %v945_v30 = vadd.f32 %v878_v44, %v386_v28  ;;  %v898_v20 = vadd.f32 %v760_v5, %v339_v9  ;;  %vm5253_vm0 = vmmov %vm5242_vm1 }
 0x1bc   : > { %2552 = vst.msk [vmem:[%s3567_s27 + $0xf0] sm:$0xf] %vm5245_vm8, %v2487_v62  ;;  %v1611_v57 = vsel %vm4793_vm13, %v1610_v27, %v1606_v58  ;;  %v1842_v10 = vadd.f32 %v4804_v25, %v1841_v14  ;;  %3185 = vpow2.f32 %v2852_v4  ;;  %v914_v45 = vadd.f32 %v800_v33, %v355_v24 }
 0x1bd   : > { %v3182_v49 = vpop.eup %3181  ;;  %v2376_v38 = vmul.f32 %v1611_v57, %v4689_v23  ;;  %v1850_v41 = vor.u32 1.1754944e-38, %v1849_v47  ;;  %3187 = vpow2.f32 %v2868_v29  ;;  %vm5246_vm9 = vcmask 523264  }
 0x1be   : > { %994 = vst.msk [vmem:[#allocation2 + $0x170] sm:$0xff] %vm5246_vm9, %v929_v63  ;;  %v1846_v35 = vsel %vm1845_vm7, %v4804_v25, %v1842_v10  ;;  %vm1848_vm10 = vcmp.eq.f32.partialorder %v1847_v59, 8.507059e+37  ;;  %v4856_v34 = vadd.f32 1.0, %v3182_v49  ;;  %vm5247_vm11 = vmmov %vm5246_vm9  ;;  %v930_v23 = vadd.f32 %v840_v51, %v371_v16 }
 0x1bf   : > { %1010 = vst.msk [vmem:[#allocation2 + $0x1f0] sm:$0xff] %vm5247_vm11, %v945_v30  ;;  %v2440_v12 = vpack.c.bf16 %v2376_v38, %v2376_v38  ;;  %v1851_v32 = vsel %vm1848_vm10, %v1850_v41, %v1846_v35  ;;  %vm5248_vm12 = vmmov %vm5246_vm9  ;;  %v946_v27 = vadd.f32 %v880_v11, %v387_v39 }
 0x1c0   : > { %963 = vst.msk [vmem:[#allocation2 + $0x78] sm:$0xff] %vm5248_vm12, %v898_v20  ;;  %v3184_v44 = vpop.eup %3183  ;;  %v2392_v31 = vmul.f32 %v1851_v32, %v4694_v17  ;;  %3189 = vrcp.f32 %v4856_v34  ;;  %vm5249_vm13 = vmmov %vm5246_vm9  ;;  %v2087_v59 = vand.u32 2147483647, %v4856_v34  ;;  %v2089_v61 = vand.u32 2147483648, %v4856_v34 }
 0x1c1   : > { %979 = vst.msk [vmem:[#allocation2 + $0xf8] sm:$0xff] %vm5249_vm13, %v914_v45  ;;  %v4865_v8 = vadd.f32 1.0, %v3184_v44  ;;  %vm5251_vm14 = vmmov %vm5246_vm9  ;;  %vm2083_vm1 = vweird.f32 %v4856_v34 }
 0x1c2   : > { %2505 = vst.msk [vmem:[%s3567_s27 + $0x34] sm:$0xf] %vm5250_vm2, %v2440_v12  ;;  %v3186_v54 = vpop.eup %3185  ;;  %v2456_v3 = vpack.c.bf16 %v2392_v31, %v2392_v31  ;;  %vm5252_vm15 = vmmov %vm5246_vm9  ;;  %vm4886_vm3 = vcmp.eq.f32.partialorder %v2087_v59, 8.507059e+37  ;;  %v2090_v40 = vor.u32 1.1754944e-38, %v2089_v61 }
 0x1c3   : > { %995 = vst.msk [vmem:[#allocation2 + $0x178] sm:$0xff] %vm5251_vm14, %v930_v23  ;;  %v3188_v48 = vpop.eup %3187  ;;  %3191 = vrcp.f32 %v4865_v8  ;;  %v2329_v17 = vand.u32 2147483648, %v4865_v8  ;;  %v4875_v46 = vadd.f32 1.0, %v3186_v54  ;;  %v2327_v37 = vand.u32 2147483647, %v4865_v8  ;;  %vm5258_vm14 = vmmov %vm5253_vm0 }
 0x1c4   : > { %1011 = vst.msk [vmem:[#allocation2 + $0x1f8] sm:$0xff] %vm5252_vm15, %v946_v27  ;;  %v4877_v47 = vadd.f32 1.0, %v3188_v48  ;;  %vm2323_vm5 = vweird.f32 %v4865_v8 }
 0x1c5   : > { %2521 = vst.msk [vmem:[%s3567_s27 + $0x74] sm:$0xf] %vm5253_vm0, %v2456_v3  ;;  %v1061_v25 = vld [vmem:[#allocation2 + $0x170] sm:$0xff]  ;;  %3193 = vrcp.f32 %v4875_v46  ;;  %v2330_v15 = vor.u32 1.1754944e-38, %v2329_v17  ;;  %v1622_v43 = vand.u32 2147483647, %v4875_v46  ;;  %vm1618_vm6 = vweird.f32 %v4875_v46 }
 0x1c6   : > { %v4880_v50 = vadd.f32 %v4455_v42, %v1061_v25  ;;  %v3190_v7 = vpop.eup %3189  ;;  %v1077_v60 = vld [vmem:[#allocation2 + $0x1f0] sm:$0xff]  ;;  %3195 = vrcp.f32 %v4877_v47  ;;  %v1624_v56 = vand.u32 2147483648, %v4875_v46  ;;  %vm4900_vm7 = vcmp.eq.f32.partialorder %v2327_v37, 8.507059e+37 }
 0x1c7   : > { %v2079_v19 = vmul.f32 %v3190_v7, %v4856_v34  ;;  %vm2084_vm4 = vweird.f32 %v3190_v7  ;;  %v1030_v13 = vld [vmem:[#allocation2 + $0x78] sm:$0xff]  ;;  %v4897_v22 = vadd.f32 %v4455_v42, %v1077_v60  ;;  %vm1858_vm9 = vweird.f32 %v4877_v47 }
 0x1c8   : > { %v2884_v53 = vmul.f32 -1.442695, %v4880_v50  ;;  %v1046_v0 = vld [vmem:[#allocation2 + $0xf8] sm:$0xff]  ;;  %v1862_v6 = vand.u32 2147483647, %v4877_v47  ;;  %v1864_v1 = vand.u32 2147483648, %v4877_v47  ;;  %v4909_v62 = vadd.f32 %v4455_v42, %v1030_v13  ;;  %vm2085_vm11 = vmor %vm2083_vm1, %vm2084_vm4 }
 0x1c9   : > { %v3192_v21 = vpop.eup %3191  ;;  %v2080_v55 = vsub.f32 1.0, %v2079_v19  ;;  %v2900_v33 = vmul.f32 -1.442695, %v4897_v22  ;;  %v4912_v58 = vadd.f32 %v4455_v42, %v1046_v0  ;;  %v1625_v59 = vor.u32 1.1754944e-38, %v1624_v56 }
 0x1ca   : > { %v1062_v28 = vld [vmem:[#allocation2 + $0x178] sm:$0xff]  ;;  %v2319_v9 = vmul.f32 %v3192_v21, %v4865_v8  ;;  %vm2324_vm8 = vweird.f32 %v3192_v21  ;;  %3197 = vpow2.f32 %v2884_v53  ;;  %v2853_v45 = vmul.f32 -1.442695, %v4909_v62 }
 0x1cb   : > { %v1078_v63 = vld [vmem:[#allocation2 + $0x1f8] sm:$0xff]  ;;  %v2081_v24 = vmul.f32 %v3190_v7, %v2080_v55  ;;  %v3194_v14 = vpop.eup %3193  ;;  %v4915_v29 = vadd.f32 %v4455_v42, %v1062_v28  ;;  %3199 = vpow2.f32 %v2900_v33  ;;  %vm2325_vm13 = vmor %vm2323_vm5, %vm2324_vm8  ;;  %vm1623_vm15 = vcmp.eq.f32.partialorder %v1622_v43, 8.507059e+37 }
 0x1cc   : > { %v2320_v4 = vsub.f32 1.0, %v2319_v9  ;;  %v4918_v30 = vadd.f32 %v4455_v42, %v1078_v63  ;;  %v3196_v20 = vpop.eup %3195  ;;  %v1614_v51 = vmul.f32 %v3194_v14, %v4875_v46  ;;  %vm1619_vm10 = vweird.f32 %v3194_v14 }
 0x1cd   : > { %v2082_v16 = vadd.f32 %v3190_v7, %v2081_v24  ;;  %v1854_v10 = vmul.f32 %v3196_v20, %v4877_v47  ;;  %vm1859_vm12 = vweird.f32 %v3196_v20  ;;  %v2869_v42 = vmul.f32 -1.442695, %v4912_v58  ;;  %vm1620_vm2 = vmor %vm1618_vm6, %vm1619_vm10 }
 0x1ce   : > { %v2321_v57 = vmul.f32 %v3192_v21, %v2320_v4  ;;  %v1615_v11 = vsub.f32 1.0, %v1614_v51  ;;  %v2885_v49 = vmul.f32 -1.442695, %v4915_v29  ;;  %3201 = vpow2.f32 %v2853_v45  ;;  %vm1860_vm0 = vmor %vm1858_vm9, %vm1859_vm12 }
 0x1cf   : > { %v2086_v39 = vsel %vm2085_vm11, %v3190_v7, %v2082_v16  ;;  %v1855_v35 = vsub.f32 1.0, %v1854_v10  ;;  %3203 = vpow2.f32 %v2869_v42  ;;  %v2901_v32 = vmul.f32 -1.442695, %v4918_v30 }
 0x1d0   : > { %v2091_v38 = vsel %vm4886_vm3, %v2090_v40, %v2086_v39  ;;  %v2322_v41 = vadd.f32 %v3192_v21, %v2321_v57  ;;  %v3198_v34 = vpop.eup %3197  ;;  %v1616_v12 = vmul.f32 %v3194_v14, %v1615_v11  ;;  %3205 = vpow2.f32 %v2885_v49  ;;  %vm5259_vm3 = vmmov %vm5258_vm14 }
 0x1d1   : > { %v2408_v23 = vmul.f32 %v2091_v38, %v4763_v2  ;;  %v1856_v44 = vmul.f32 %v3196_v20, %v1855_v35  ;;  %v4935_v31 = vadd.f32 1.0, %v3198_v34  ;;  %v3200_v54 = vpop.eup %3199  ;;  %3207 = vpow2.f32 %v2901_v32  ;;  %vm5260_vm4 = vmmov %vm5259_vm3 }
 0x1d2   : > { %v2326_v27 = vsel %vm2325_vm13, %v3192_v21, %v2322_v41  ;;  %v1617_v2 = vadd.f32 %v3194_v14, %v1616_v12  ;;  %v4951_v25 = vadd.f32 1.0, %v3200_v54  ;;  %vm1863_vm1 = vcmp.eq.f32.partialorder %v1862_v6, 8.507059e+37  ;;  %vm5261_vm5 = vmmov %vm5259_vm3 }
 0x1d3   : > { %v2472_v3 = vpack.c.bf16 %v2408_v23, %v2408_v23  ;;  %v2331_v48 = vsel %vm4900_vm7, %v2330_v15, %v2326_v27  ;;  %v1857_v61 = vadd.f32 %v3196_v20, %v1856_v44  ;;  %3209 = vrcp.f32 %v4935_v31 }
 0x1d4   : > { %v2424_v8 = vmul.f32 %v2331_v48, %v4772_v36  ;;  %v1621_v17 = vsel %vm1620_vm2, %v3194_v14, %v1617_v2  ;;  %v1865_v36 = vor.u32 1.1754944e-38, %v1864_v1  ;;  %v3202_v7 = vpop.eup %3201  ;;  %v2102_v47 = vand.u32 2147483647, %v4935_v31 }
 0x1d5   : > { %2537 = vst.msk [vmem:[%s3567_s27 + $0xb4] sm:$0xf] %vm5258_vm14, %v2472_v3  ;;  %v1626_v60 = vsel %vm1623_vm15, %v1625_v59, %v1621_v17  ;;  %v1861_v19 = vsel %vm1860_vm0, %v3196_v20, %v1857_v61  ;;  %v3204_v52 = vpop.eup %3203  ;;  %3211 = vrcp.f32 %v4951_v25  ;;  %v2104_v55 = vand.u32 2147483648, %v4935_v31 }
 0x1d6   : > { %v2488_v37 = vpack.c.bf16 %v2424_v8, %v2424_v8  ;;  %v2377_v40 = vmul.f32 %v1626_v60, %v4826_v26  ;;  %v1866_v15 = vsel %vm1863_vm1, %v1865_v36, %v1861_v19  ;;  %v3206_v13 = vpop.eup %3205  ;;  %v4960_v56 = vadd.f32 1.0, %v3202_v7 }
 0x1d7   : > { %v2393_v46 = vmul.f32 %v1866_v15, %v4830_v18  ;;  %v3208_v43 = vpop.eup %3207  ;;  %v4962_v53 = vadd.f32 1.0, %v3204_v52  ;;  %v4964_v28 = vadd.f32 1.0, %v3206_v13  ;;  %v2342_v9 = vand.u32 2147483647, %v4951_v25 }
 0x1d8   : > { %2553 = vst.msk [vmem:[%s3567_s27 + $0xf4] sm:$0xf] %vm5259_vm3, %v2488_v37  ;;  %v2441_v21 = vpack.c.bf16 %v2377_v40, %v2377_v40  ;;  %3213 = vrcp.f32 %v4960_v56  ;;  %v2344_v5 = vand.u32 2147483648, %v4951_v25  ;;  %v4975_v6 = vadd.f32 1.0, %v3208_v43 }
 0x1d9   : > { %v3210_v26 = vpop.eup %3209  ;;  %v2457_v0 = vpack.c.bf16 %v2393_v46, %v2393_v46  ;;  %3215 = vrcp.f32 %v4962_v53  ;;  %vm2098_vm6 = vweird.f32 %v4935_v31  ;;  %vm4978_vm8 = vcmp.eq.f32.partialorder %v2102_v47, 8.507059e+37 }
 0x1da   : > { %2506 = vst.msk [vmem:[%s3567_s27 + $0x38] sm:$0xf] %vm5260_vm4, %v2441_v21  ;;  %v2094_v18 = vmul.f32 %v3210_v26, %v4935_v31  ;;  %v2105_v24 = vor.u32 1.1754944e-38, %v2104_v55  ;;  %vm2338_vm7 = vweird.f32 %v4951_v25  ;;  %v1637_v14 = vand.u32 2147483647, %v4960_v56 }
 0x1db   : > { %2522 = vst.msk [vmem:[%s3567_s27 + $0x78] sm:$0xf] %vm5261_vm5, %v2457_v0  ;;  %v3212_v33 = vpop.eup %3211  ;;  %v1639_v4 = vand.u32 2147483648, %v4960_v56  ;;  %3217 = vrcp.f32 %v4964_v28  ;;  %vm2099_vm9 = vweird.f32 %v3210_v26  ;;  %v1877_v51 = vand.u32 2147483647, %v4962_v53 }
 0x1dc   : > { %v2095_v1 = vsub.f32 1.0, %v2094_v18  ;;  %v2334_v16 = vmul.f32 %v3212_v33, %v4951_v25  ;;  %vm4988_vm10 = vcmp.eq.f32.partialorder %v2342_v9, 8.507059e+37  ;;  %v2345_v10 = vor.u32 1.1754944e-38, %v2344_v5  ;;  %vm2100_vm13 = vmor %vm2098_vm6, %vm2099_vm9 }
 0x1dd   : > { %v1879_v45 = vand.u32 2147483648, %v4962_v53  ;;  %3219 = vrcp.f32 %v4975_v6  ;;  %vm1633_vm11 = vweird.f32 %v4960_v56  ;;  %vm1873_vm12 = vweird.f32 %v4962_v53 }
 0x1de   : > { %v2096_v20 = vmul.f32 %v3210_v26, %v2095_v1  ;;  %v3214_v39 = vpop.eup %3213  ;;  %v2335_v42 = vsub.f32 1.0, %v2334_v16  ;;  %vm2339_vm2 = vweird.f32 %v3212_v33  ;;  %vm4999_vm14 = vcmp.eq.f32.partialorder %v1637_v14, 8.507059e+37 }
 0x1df   : > { %v3216_v49 = vpop.eup %3215  ;;  %v1629_v38 = vmul.f32 %v3214_v39, %v4960_v56  ;;  %v1640_v35 = vor.u32 1.1754944e-38, %v1639_v4  ;;  %vm5004_vm15 = vcmp.eq.f32.partialorder %v1877_v51, 8.507059e+37  ;;  %vm2113_vm0 = vweird.f32 %v4964_v28  ;;  %vm2340_vm1 = vmor %vm2338_vm7, %vm2339_vm2 }
 0x1e0   : > { %v2097_v11 = vadd.f32 %v3210_v26, %v2096_v20  ;;  %v2336_v23 = vmul.f32 %v3212_v33, %v2335_v42  ;;  %v1869_v12 = vmul.f32 %v3216_v49, %v4962_v53  ;;  %v1880_v54 = vor.u32 1.1754944e-38, %v1879_v45 }
 0x1e1   : > { %v3218_v27 = vpop.eup %3217  ;;  %v1630_v31 = vsub.f32 1.0, %v1629_v38  ;;  %v2117_v3 = vand.u32 2147483647, %v4964_v28  ;;  %vm1634_vm3 = vweird.f32 %v3214_v39  ;;  %vm1874_vm4 = vweird.f32 %v3216_v49 }
 0x1e2   : > { %v2101_v34 = vsel %vm2100_vm13, %v3210_v26, %v2097_v11  ;;  %v2337_v2 = vadd.f32 %v3212_v33, %v2336_v23  ;;  %v1870_v8 = vsub.f32 1.0, %v1869_v12  ;;  %v2109_v59 = vmul.f32 %v3218_v27, %v4964_v28  ;;  %vm1635_vm6 = vmor %vm1633_vm11, %vm1634_vm3 }
 0x1e3   : > { %v2106_v44 = vsel %vm4978_vm8, %v2105_v24, %v2101_v34  ;;  %v3220_v61 = vpop.eup %3219  ;;  %v1631_v17 = vmul.f32 %v3214_v39, %v1630_v31  ;;  %v2119_v36 = vand.u32 2147483648, %v4964_v28  ;;  %v2357_v15 = vand.u32 2147483647, %v4975_v6  ;;  %vm1875_vm7 = vmor %vm1873_vm12, %vm1874_vm4 }
 0x1e4   : > { %v2409_v48 = vmul.f32 %v2106_v44, %v4880_v50  ;;  %v2341_v37 = vsel %vm2340_vm1, %v3212_v33, %v2337_v2  ;;  %v1871_v60 = vmul.f32 %v3216_v49, %v1870_v8  ;;  %v2110_v19 = vsub.f32 1.0, %v2109_v59  ;;  %vm5270_vm11 = vmmov %vm5261_vm5 }
 0x1e5   : > { %v2346_v50 = vsel %vm4988_vm10, %v2345_v10, %v2341_v37  ;;  %v1632_v52 = vadd.f32 %v3214_v39, %v1631_v17  ;;  %v2349_v40 = vmul.f32 %v3220_v61, %v4975_v6  ;;  %vm2114_vm8 = vweird.f32 %v3218_v27 }
 0x1e6   : > { %v2473_v7 = vpack.c.bf16 %v2409_v48, %v2409_v48  ;;  %v2425_v25 = vmul.f32 %v2346_v50, %v4897_v22  ;;  %v1872_v13 = vadd.f32 %v3216_v49, %v1871_v60  ;;  %v2111_v46 = vmul.f32 %v3218_v27, %v2110_v19  ;;  %vm2115_vm9 = vmor %vm2113_vm0, %vm2114_vm8 }
 0x1e7   : > { %v1636_v47 = vsel %vm1635_vm6, %v3214_v39, %v1632_v52  ;;  %v2120_v43 = vor.u32 1.1754944e-38, %v2119_v36  ;;  %v2350_v21 = vsub.f32 1.0, %v2349_v40  ;;  %v2359_v55 = vand.u32 2147483648, %v4975_v6  ;;  %vm5272_vm0 = vmmov %vm5261_vm5 }
 0x1e8   : > { %2538 = vst.msk [vmem:[%s3567_s27 + $0xb8] sm:$0xf] %vm5261_vm5, %v2473_v7  ;;  %v2489_v26 = vpack.c.bf16 %v2425_v25, %v2425_v25  ;;  %v1641_v22 = vsel %vm4999_vm14, %v1640_v35, %v1636_v47  ;;  %v1876_v0 = vsel %vm1875_vm7, %v3216_v49, %v1872_v13  ;;  %v2112_v56 = vadd.f32 %v3218_v27, %v2111_v46  ;;  %vm5271_vm14 = vmmov %vm5261_vm5 }
 0x1e9   : > { %v2378_v18 = vmul.f32 %v1641_v22, %v4909_v62  ;;  %v1881_v9 = vsel %vm5004_vm15, %v1880_v54, %v1876_v0  ;;  %v2351_v53 = vmul.f32 %v3220_v61, %v2350_v21  ;;  %vm2354_vm10 = vweird.f32 %v3220_v61  ;;  %vm5273_vm1 = vmmov %vm5272_vm0 }
 0x1ea   : > { %2554 = vst.msk [vmem:[%s3567_s27 + $0xf8] sm:$0xf] %vm5270_vm11, %v2489_v26  ;;  %v2394_v5 = vmul.f32 %v1881_v9, %v4912_v58  ;;  %v2116_v1 = vsel %vm2115_vm9, %v3218_v27, %v2112_v56  ;;  %vm2118_vm12 = vcmp.eq.f32.partialorder %v2117_v3, 8.507059e+37  ;;  %vm2353_vm13 = vweird.f32 %v4975_v6  ;;  %vm5274_vm3 = vmmov %vm5272_vm0 }
 0x1eb   : > { %v2442_v63 = vpack.c.bf16 %v2378_v18, %v2378_v18  ;;  %v2121_v24 = vsel %vm2118_vm12, %v2120_v43, %v2116_v1  ;;  %v2352_v62 = vadd.f32 %v3220_v61, %v2351_v53  ;;  %vm2355_vm2 = vmor %vm2353_vm13, %vm2354_vm10  ;;  %v2360_v14 = vor.u32 1.1754944e-38, %v2359_v55 }
 0x1ec   : > { %v2458_v33 = vpack.c.bf16 %v2394_v5, %v2394_v5  ;;  %v2410_v28 = vmul.f32 %v2121_v24, %v4915_v29  ;;  %vm2358_vm15 = vcmp.eq.f32.partialorder %v2357_v15, 8.507059e+37 }
 0x1ed   : > { %2507 = vst.msk [vmem:[%s3567_s27 + $0x3c] sm:$0xf] %vm5271_vm14, %v2442_v63  ;;  %v2356_v4 = vsel %vm2355_vm2, %v3220_v61, %v2352_v62 }
 0x1ee   : > { %2523 = vst.msk [vmem:[%s3567_s27 + $0x7c] sm:$0xf] %vm5272_vm0, %v2458_v33  ;;  %v2474_v58 = vpack.c.bf16 %v2410_v28, %v2410_v28  ;;  %v2361_v20 = vsel %vm2358_vm15, %v2360_v14, %v2356_v4 }
 0x1ef   : > { %v2426_v16 = vmul.f32 %v2361_v20, %v4918_v30 }
 0x1f0   : > { %2539 = vst.msk [vmem:[%s3567_s27 + $0xbc] sm:$0xf] %vm5273_vm1, %v2474_v58 }
 0x1f1   : > { %v2490_v51 = vpack.c.bf16 %v2426_v16, %v2426_v16 }
 0x1f3   : > { %2555 = vst.msk [vmem:[%s3567_s27 + $0xfc] sm:$0xf] %vm5274_vm3, %v2490_v51 }
 0x1f4 PF: > { %s13_s14 = sadd.s32 1, %s3245_s14   ;;  %s5275_s12 = smov %s3241_s13 }
 0x1f5   : > { %p10_p5 = scmp.ge.s32.totalorder %s13_s14, 4   ;;  %s5276_s13 = smov %s5278_s15 }
 0x1f7   :  { %12 = sbr.rel (!%p10_p5) target bundleno = 2 (0x2), region = 76 }

</bundles_post_ra>
